<compile_context>
chip_gen: v6e
topology: v6e:2x2x1
jax: 0.10.0
libtpu: 0.0.40
codegen_flags: <defaults>
</compile_context>

<pallas_src>
import math
import functools

import jax
import jax.numpy as jnp
from jax import lax
from jax.experimental import pallas as pl
from jax.experimental.pallas import tpu as pltpu

# Full-precision f32 matmuls for the reference path (and in-kernel dots).
jax.config.update("jax_default_matmul_precision", "highest")


# ----------------------------------------------------------------------------
# Helpers
# ----------------------------------------------------------------------------
def _itemsize(dt):
    return jnp.dtype(dt).itemsize


def _pick_tile(dim, target, align):
    """Largest `align`-multiple divisor of `dim` that is <= target, else dim."""
    if dim <= target:
        return dim
    t = (target // align) * align
    while t >= align:
        if dim % t == 0:
            return t
        t -= align
    return dim  # full dimension is always a legal block


def _compiler_params(dims, est_bytes):
    # Explicit scoped-VMEM limit: defaults are 16 MiB (v5e) / 32 MiB (v6e),
    # well below physical.  Size the request from the actual double-buffered
    # block footprint so it scales with the problem instead of a magic number.
    limit = int(min(max(int(est_bytes * 1.5) + (8 << 20), 32 << 20), 100 << 20))
    return pltpu.CompilerParams(dimension_semantics=dims,
                                vmem_limit_bytes=limit)


# ----------------------------------------------------------------------------
# Kernels
# ----------------------------------------------------------------------------
def _linear_kernel(x_ref, w_ref, b_ref, o_ref, acc_ref):
    """Tiled y = x @ w + b with an f32 accumulator resident across the K axis."""
    @pl.when(pl.program_id(2) == 0)
    def _():
        acc_ref[...] = jnp.zeros_like(acc_ref)

    acc_ref[...] += jnp.dot(
        x_ref[...], w_ref[...], preferred_element_type=jnp.float32
    )

    @pl.when(pl.program_id(2) == pl.num_programs(2) - 1)
    def _():
        o_ref[...] = (acc_ref[...] + b_ref[...].astype(jnp.float32)).astype(
            o_ref.dtype
        )


def _attention_kernel(q_ref, k_ref, v_ref, h_ref, a_ref, *,
                      num_heads, d_k, scale, approx_recip):
    """All heads of one (batch, q-tile) per grid step.

    q_ref: (1, tq, D)    k_ref, v_ref: (1, S_kv, D)
    h_ref: (1, tq, D)    a_ref: (1, H, tq, S_kv)
    """
    q = q_ref[0]          # (tq,   D)
    k = k_ref[0]          # (S_kv, D)
    v = v_ref[0]          # (S_kv, D)

    # Head-major operands (H, rows, d_k): static lane-tile slices stacked once.
    # (A lane-splitting reshape (rows, D)->(rows, H, d_k) would also work, but
    #  d_k-boundary slices keep clean lane tiles and a trivial leading-axis
    #  concat, which lowers robustly for any d_k.)
    def to_heads(x):
        return jnp.stack(
            [x[:, h * d_k:(h + 1) * d_k] for h in range(num_heads)], axis=0)

    qh = to_heads(q)      # (H, tq,   d_k)
    kh = to_heads(k)      # (H, S_kv, d_k)
    vh = to_heads(v)      # (H, S_kv, d_k)

    # ONE batched matmul for the scores of all heads (H is the batch dim).
    s = lax.dot_general(
        qh, kh,
        dimension_numbers=(((2,), (2,)), ((0,), (0,))),
        preferred_element_type=jnp.float32,
    ) * scale                                             # (H, tq, S_kv) f32

    # Numerically-stable softmax, emitted once for all heads, f32 math.
    m = jnp.max(s, axis=-1, keepdims=True)
    e = jnp.exp(s - m)
    l = jnp.sum(e, axis=-1, keepdims=True)
    if approx_recip:
        p = e * pl.reciprocal(l, approx=True)             # EUP slot
    else:
        p = e / l

    a_ref[0] = p.astype(a_ref.dtype)                      # single lane-dense store

    # ONE batched matmul for the context of all heads.
    o = lax.dot_general(
        p.astype(vh.dtype), vh,
        dimension_numbers=(((2,), (1,)), ((0,), (0,))),
        preferred_element_type=jnp.float32,
    )                                                     # (H, tq, d_k) f32

    # Assemble a single lane-dense (tq, D) slab and store it exactly once
    # (no per-head masked partial stores).
    h_ref[0] = jnp.concatenate(
        [o[h] for h in range(num_heads)], axis=-1).astype(h_ref.dtype)

    # TODO(synk): training-mode dropout on the attention weights (pltpu.prng_*).
    # TODO(synk): flash-style kv-tiled variant (online softmax, no A output)
    #             for callers that do not consume A; this module returns the
    #             full (B, H, Sq, Skv) A so it must be materialized here.


# ----------------------------------------------------------------------------
# pallas_call wrappers
# ----------------------------------------------------------------------------
def pallas_linear(x2d, w_t, bias=None, *, out_dtype=None,
                  tm_target=512, tn_target=512, tk_target=1024):
    """y = x2d @ w_t (+ bias). w_t is already (K, N) (pre-transposed once)."""
    M, K = x2d.shape
    K2, N = w_t.shape
    assert K == K2
    out_dtype = out_dtype or x2d.dtype

    if bias is None:
        b2 = jnp.zeros((1, N), dtype=jnp.float32)
    else:
        b2 = bias.reshape(1, N).astype(jnp.float32)

    sub_align = 16 if _itemsize(x2d.dtype) == 2 else 8
    tm = _pick_tile(M, tm_target, sub_align)
    tn = _pick_tile(N, tn_target, 128)
    tk = _pick_tile(K, tk_target, 128)
    grid = (M // tm, N // tn, K // tk)

    est = (2 * (tm * tk * _itemsize(x2d.dtype)
                + tk * tn * _itemsize(w_t.dtype)
                + tn * 4)
           + 2 * tm * tn * _itemsize(out_dtype)
           + tm * tn * 4)  # accumulator scratch

    return pl.pallas_call(
        _linear_kernel,
        out_shape=jax.ShapeDtypeStruct((M, N), out_dtype),
        grid_spec=pltpu.PrefetchScalarGridSpec(
            num_scalar_prefetch=0,
            grid=grid,
            in_specs=[
                pl.BlockSpec((tm, tk), lambda i, j, k: (i, k)),
                pl.BlockSpec((tk, tn), lambda i, j, k: (k, j)),
                pl.BlockSpec((1, tn), lambda i, j, k: (0, j)),
            ],
            out_specs=pl.BlockSpec((tm, tn), lambda i, j, k: (i, j)),
            scratch_shapes=[pltpu.VMEM((tm, tn), jnp.float32)],
        ),
        compiler_params=_compiler_params(
            ("parallel", "parallel", "arbitrary"), est),
    )(x2d, w_t, b2)


def pallas_attention(q_arr, k_arr, v_arr, num_heads, d_model, *,
                     q_col=0, k_col=0, v_col=0,
                     attn_dtype=None, out_dtype=None,
                     tq_target=128, approx_recip=True):
    """q_arr: (B, S_q, nq*D); k_arr / v_arr: (B, S_kv, n*D).

    The *_col arguments select which D-wide column block of a (possibly fused
    QKV / KV) activation holds Q / K / V, so no XLA slice copies are needed
    after a fused projection.  Returns (H_cat (B,S_q,D), A (B,H,S_q,S_kv)).
    """
    B, S_q, qw = q_arr.shape
    Bk, S_kv, kw = k_arr.shape
    Bv, S_kv2, vw = v_arr.shape
    assert B == Bk == Bv and S_kv == S_kv2
    assert d_model % num_heads == 0
    for w, c in ((qw, q_col), (kw, k_col), (vw, v_col)):
        assert w % d_model == 0 and (c + 1) * d_model <= w

    d_k = d_model // num_heads
    scale = 1.0 / math.sqrt(d_k)
    attn_dtype = attn_dtype or q_arr.dtype
    out_dtype = out_dtype or q_arr.dtype

    sub_align = 16 if _itemsize(q_arr.dtype) == 2 else 8
    tq = _pick_tile(S_q, tq_target, sub_align)
    grid = (B, S_q // tq)

    kernel = functools.partial(
        _attention_kernel, num_heads=num_heads, d_k=d_k, scale=scale,
        approx_recip=approx_recip)

    q_spec = pl.BlockSpec((1, tq, d_model), lambda b, qi, c=q_col: (b, qi, c))
    # K/V blocks are resident across the qi axis (block index constant in qi).
    # TODO(synk): pipeline_mode=pl.Buffered(1) on k/v specs (plus smaller tq)
    #             to halve the resident-KV VMEM footprint under v7x's 64 MiB.
    k_spec = pl.BlockSpec((1, S_kv, d_model), lambda b, qi, c=k_col: (b, 0, c))
    v_spec = pl.BlockSpec((1, S_kv, d_model), lambda b, qi, c=v_col: (b, 0, c))
    h_spec = pl.BlockSpec((1, tq, d_model), lambda b, qi: (b, qi, 0))
    a_spec = pl.BlockSpec((1, num_heads, tq, S_kv), lambda b, qi: (b, 0, qi, 0))

    est = (2 * tq * d_model * _itemsize(q_arr.dtype)
           + 2 * S_kv * d_model * (_itemsize(k_arr.dtype)
                                   + _itemsize(v_arr.dtype))
           + 2 * tq * d_model * _itemsize(out_dtype)
           + 2 * num_heads * tq * S_kv * _itemsize(attn_dtype)
           + 4 * num_heads * tq * S_kv * 4)  # f32 score/softmax temporaries

    return pl.pallas_call(
        kernel,
        out_shape=(
            jax.ShapeDtypeStruct((B, S_q, d_model), out_dtype),
            jax.ShapeDtypeStruct((B, num_heads, S_q, S_kv), attn_dtype),
        ),
        grid=grid,
        in_specs=[q_spec, k_spec, v_spec],
        out_specs=(h_spec, a_spec),
        compiler_params=_compiler_params(("parallel", "parallel"), est),
    )(q_arr, k_arr, v_arr)


# ----------------------------------------------------------------------------
# Parameter preparation (done once, outside the per-call path)
# ----------------------------------------------------------------------------
def prepare_params(params, compute_dtype=None):
    """Transpose torch-style (out,in) weights to (in,out) once; optionally
    pre-cast to the MXU compute dtype; pre-concat fused QKV and KV weights."""
    cd = compute_dtype or params["W_q"].dtype
    w_q = params["W_q"].T.astype(cd)
    w_k = params["W_k"].T.astype(cd)
    w_v = params["W_v"].T.astype(cd)
    return {
        "w_q": w_q,
        "w_k": w_k,
        "w_v": w_v,
        "w_qkv": jnp.concatenate([w_q, w_k, w_v], axis=1),  # (d_in, 3*d_model)
        "w_kv": jnp.concatenate([w_k, w_v], axis=1),        # (d_in, 2*d_model)
        "w_h": params["W_h_w"].T.astype(cd),                # (d_model, d_model)
        "b_h": params["W_h_b"].astype(jnp.float32),
    }


# ----------------------------------------------------------------------------
# Forward pass
# ----------------------------------------------------------------------------
def multi_head_attention_forward(X_q, X_k, X_v, prepared, num_heads,
                                 compute_dtype=None, approx_recip=True):
    """Pallas implementation of MultiHeadAttention.forward. Returns (H, A)."""
    B, S_q, _ = X_q.shape
    d_model = prepared["w_h"].shape[1]
    assert d_model % num_heads == 0
    out_dtype = X_q.dtype
    # Compute dtype follows the prepared weights unless overridden (bf16
    # weights => bf16 MXU operands with f32 accumulation / f32 softmax).
    cd = compute_dtype if compute_dtype is not None else prepared["w_h"].dtype

    xq2 = X_q.reshape(B * S_q, -1).astype(cd)

    if (X_k is X_q) and (X_v is X_q):
        # Self-attention: one fused (M,K)x(K,3*d_model) projection; the Q/K/V
        # split happens via BlockSpec column selection (no HBM slice copies).
        qkv = pallas_linear(xq2, prepared["w_qkv"],
                            out_dtype=cd).reshape(B, S_q, 3 * d_model)
        q_arr = k_arr = v_arr = qkv
        q_col, k_col, v_col = 0, 1, 2
    elif X_k is X_v:
        # Encoder-decoder cross-attention with shared K/V input: one fused
        # (M,K)x(K,2*d_model) projection for K and V.
        S_kv = X_k.shape[1]
        xkv2 = X_k.reshape(B * S_kv, -1).astype(cd)
        q_arr = pallas_linear(xq2, prepared["w_q"],
                              out_dtype=cd).reshape(B, S_q, d_model)
        kv = pallas_linear(xkv2, prepared["w_kv"],
                           out_dtype=cd).reshape(B, S_kv, 2 * d_model)
        k_arr = v_arr = kv
        q_col, k_col, v_col = 0, 0, 1
    else:
        S_kv = X_k.shape[1]
        assert X_v.shape[1] == S_kv
        xk2 = X_k.reshape(B * S_kv, -1).astype(cd)
        xv2 = X_v.reshape(B * S_kv, -1).astype(cd)
        q_arr = pallas_linear(xq2, prepared["w_q"],
                              out_dtype=cd).reshape(B, S_q, d_model)
        k_arr = pallas_linear(xk2, prepared["w_k"],
                              out_dtype=cd).reshape(B, S_kv, d_model)
        v_arr = pallas_linear(xv2, prepared["w_v"],
                              out_dtype=cd).reshape(B, S_kv, d_model)
        q_col = k_col = v_col = 0

    H_cat, A = pallas_attention(
        q_arr, k_arr, v_arr, num_heads, d_model,
        q_col=q_col, k_col=k_col, v_col=v_col,
        attn_dtype=cd, out_dtype=cd, approx_recip=approx_recip)

    H = pallas_linear(
        H_cat.reshape(B * S_q, d_model), prepared["w_h"], prepared["b_h"],
        out_dtype=out_dtype,
    ).reshape(B, S_q, d_model)
    return H, A


# ----------------------------------------------------------------------------
# Pure-JAX reference (for sanity check)
# ----------------------------------------------------------------------------
def reference_forward(X_q, X_k, X_v, params, num_heads):
    B, S_q, _ = X_q.shape
    S_kv = X_k.shape[1]
    d_model = params["W_q"].shape[0]
    d_k = d_model // num_heads

    def split_heads(x, s):
        return x.reshape(B, s, num_heads, d_k).transpose(0, 2, 1, 3)

    Q = split_heads(X_q @ params["W_q"].T, S_q)
    K = split_heads(X_k @ params["W_k"].T, S_kv)
    V = split_heads(X_v @ params["W_v"].T, S_kv)

    scores = jnp.einsum("bhqd,bhkd->bhqk", Q / math.sqrt(d_k), K)
    A = jax.nn.softmax(scores, axis=-1)
    H_heads = jnp.einsum("bhqk,bhkd->bhqd", A, V)
    H_cat = H_heads.transpose(0, 2, 1, 3).reshape(B, S_q, d_model)
    H = H_cat @ params["W_h_w"].T + params["W_h_b"]
    return H, A


# ----------------------------------------------------------------------------
# Main
# ----------------------------------------------------------------------------
if __name__ == "__main__":
    batch = 2
    seq_q = 128
    seq_kv = 256
    d_model = 256
    num_heads = 2
    dropout_p = 0.1  # identity at inference

    key = jax.random.PRNGKey(0)
    k_xq, k_xk, k_xv, k_wq, k_wk, k_wv, k_wh, k_bh = jax.random.split(key, 8)

    X_q = jax.random.normal(k_xq, (batch, seq_q, d_model), dtype=jnp.float32)
    X_k = jax.random.normal(k_xk, (batch, seq_kv, d_model), dtype=jnp.float32)
    X_v = jax.random.normal(k_xv, (batch, seq_kv, d_model), dtype=jnp.float32)

    s = 0.0625
    params = {
        "W_q": jax.random.normal(k_wq, (d_model, d_model), jnp.float32) * s,
        "W_k": jax.random.normal(k_wk, (d_model, d_model), jnp.float32) * s,
        "W_v": jax.random.normal(k_wv, (d_model, d_model), jnp.float32) * s,
        "W_h_w": jax.random.normal(k_wh, (d_model, d_model), jnp.float32) * s,
        "W_h_b": jax.random.normal(k_bh, (d_model,), jnp.float32) * s,
    }

    prepared_f32 = prepare_params(params)
    prepared_bf16 = prepare_params(params, compute_dtype=jnp.bfloat16)

    # 1) Cross-attention, distinct K/V inputs, kv length != q length, f32.
    H1, A1 = multi_head_attention_forward(X_q, X_k, X_v, prepared_f32, num_heads)
    jax.block_until_ready((H1, A1))
    H1_ref, A1_ref = reference_forward(X_q, X_k, X_v, params, num_heads)
    assert H1.shape == (batch, seq_q, d_model)
    assert A1.shape == (batch, num_heads, seq_q, seq_kv)
    assert jnp.allclose(H1, H1_ref, atol=5e-3, rtol=5e-3)
    assert jnp.allclose(A1, A1_ref, atol=5e-3, rtol=5e-3)

    # 2) Cross-attention with shared K/V input (fused KV projection path), f32.
    H2, A2 = multi_head_attention_forward(X_q, X_k, X_k, prepared_f32, num_heads)
    jax.block_until_ready((H2, A2))
    H2_ref, A2_ref = reference_forward(X_q, X_k, X_k, params, num_heads)
    assert jnp.allclose(H2, H2_ref, atol=5e-3, rtol=5e-3)
    assert jnp.allclose(A2, A2_ref, atol=5e-3, rtol=5e-3)

    # 3) Self-attention (fused QKV projection, slice-free BlockSpec split), f32.
    H3, A3 = multi_head_attention_forward(X_q, X_q, X_q, prepared_f32, num_heads)
    jax.block_until_ready((H3, A3))
    H3_ref, A3_ref = reference_forward(X_q, X_q, X_q, params, num_heads)
    assert jnp.allclose(H3, H3_ref, atol=5e-3, rtol=5e-3)
    assert jnp.allclose(A3, A3_ref, atol=5e-3, rtol=5e-3)

    # 4) Self-attention with bf16 MXU operands (f32 accumulation / softmax).
    H4, A4 = multi_head_attention_forward(
        X_q, X_q, X_q, prepared_bf16, num_heads, compute_dtype=jnp.bfloat16)
    jax.block_until_ready((H4, A4))
    assert jnp.allclose(H4.astype(jnp.float32), H3_ref, atol=7e-2, rtol=7e-2)
    assert jnp.allclose(A4.astype(jnp.float32), A3_ref, atol=7e-2, rtol=7e-2)

    print("KERNEL_OK")
</pallas_src>

<mosaic_0001>
module attributes {stable_mosaic.version = 11 : i64} {
  func.func @_linear_kernel(%arg0: i32, %arg1: i32, %arg2: i32, %arg3: memref<256x256xf32, #tpu.memory_space<vmem>>, %arg4: memref<256x256xf32, #tpu.memory_space<vmem>>, %arg5: memref<1x256xf32, #tpu.memory_space<vmem>>, %arg6: memref<256x256xf32, #tpu.memory_space<vmem>>, %arg7: memref<256x256xf32, #tpu.memory_space<vmem>>) attributes {dimension_semantics = [#tpu.dimension_semantics<parallel>, #tpu.dimension_semantics<parallel>, #tpu.dimension_semantics<arbitrary>], iteration_bounds = array<i64: 1, 1, 1>, scalar_prefetch = 0 : i64, scratch_operands = 1 : i64, tpu.core_type = #tpu.core_type<tc>, window_params = [{transform_indices = @transform_0, window_bounds = array<i64: 256, 256>}, {transform_indices = @transform_1, window_bounds = array<i64: 256, 256>}, {transform_indices = @transform_2, window_bounds = array<i64: 1, 256>}, {transform_indices = @transform_3, window_bounds = array<i64: 256, 256>}]} {
    %c0_i32 = arith.constant 0 : i32
    %0 = arith.cmpi eq, %arg2, %c0_i32 : i32
    %1 = arith.extui %0 : i1 to i32
    %c0_i32_0 = arith.constant 0 : i32
    %2 = arith.cmpi ne, %1, %c0_i32_0 : i32
    scf.if %2 {
      %cst_10 = arith.constant 0.000000e+00 : f32
      %12 = vector.broadcast %cst_10 : f32 to vector<256x256xf32>
      %c0_11 = arith.constant 0 : index
      %c0_12 = arith.constant 0 : index
      %13 = vector.load %arg7[%c0_11, %c0_12] : memref<256x256xf32, #tpu.memory_space<vmem>>, vector<256x256xf32>
      tpu.vector_store %arg7[%c0_11, %c0_12], %12 {strides = array<i32>} : memref<256x256xf32, #tpu.memory_space<vmem>>, vector<256x256xf32>,
    } else {
    }
    %c0 = arith.constant 0 : index
    %c0_1 = arith.constant 0 : index
    %3 = vector.load %arg7[%c0, %c0_1] : memref<256x256xf32, #tpu.memory_space<vmem>>, vector<256x256xf32>
    %c0_2 = arith.constant 0 : index
    %c0_3 = arith.constant 0 : index
    %4 = vector.load %arg3[%c0_2, %c0_3] : memref<256x256xf32, #tpu.memory_space<vmem>>, vector<256x256xf32>
    %c0_4 = arith.constant 0 : index
    %c0_5 = arith.constant 0 : index
    %5 = vector.load %arg4[%c0_4, %c0_5] : memref<256x256xf32, #tpu.memory_space<vmem>>, vector<256x256xf32>
    %cst = arith.constant dense<0.000000e+00> : vector<256x256xf32>
    %6 = tpu.matmul %4, %5, %cst {dimension_numbers = #tpu.dot_dimension_numbers<[1], [0], [0], [1], [0, 0, 1, 1], [], []>, precision = #tpu.contract_precision<fp32>} : vector<256x256xf32>, vector<256x256xf32>, vector<256x256xf32> -> vector<256x256xf32>
    %7 = arith.addf %3, %6 : vector<256x256xf32>
    %c0_6 = arith.constant 0 : index
    %c0_7 = arith.constant 0 : index
    %8 = vector.load %arg7[%c0_6, %c0_7] : memref<256x256xf32, #tpu.memory_space<vmem>>, vector<256x256xf32>
    tpu.vector_store %arg7[%c0_6, %c0_7], %7 {strides = array<i32>} : memref<256x256xf32, #tpu.memory_space<vmem>>, vector<256x256xf32>,
    %c0_i32_8 = arith.constant 0 : i32
    %9 = arith.cmpi eq, %arg2, %c0_i32_8 : i32
    %10 = arith.extui %9 : i1 to i32
    %c0_i32_9 = arith.constant 0 : i32
    %11 = arith.cmpi ne, %10, %c0_i32_9 : i32
    scf.if %11 {
      %c0_10 = arith.constant 0 : index
      %c0_11 = arith.constant 0 : index
      %12 = vector.load %arg7[%c0_10, %c0_11] : memref<256x256xf32, #tpu.memory_space<vmem>>, vector<256x256xf32>
      %c0_12 = arith.constant 0 : index
      %c0_13 = arith.constant 0 : index
      %13 = vector.load %arg5[%c0_12, %c0_13] : memref<1x256xf32, #tpu.memory_space<vmem>>, vector<1x256xf32>
      %14 = vector.broadcast %13 : vector<1x256xf32> to vector<256x256xf32>
      %15 = arith.addf %12, %14 : vector<256x256xf32>
      %c0_14 = arith.constant 0 : index
      %c0_15 = arith.constant 0 : index
      %16 = vector.load %arg6[%c0_14, %c0_15] : memref<256x256xf32, #tpu.memory_space<vmem>>, vector<256x256xf32>
      tpu.vector_store %arg6[%c0_14, %c0_15], %15 {strides = array<i32>} : memref<256x256xf32, #tpu.memory_space<vmem>>, vector<256x256xf32>,
    } else {
    }
    return
  }
  func.func @transform_0(%arg0: i32, %arg1: i32, %arg2: i32) -> (i32, i32) {
    %c0_i32 = arith.constant 0 : i32
    return %arg0, %arg2 : i32, i32
  }
  func.func @transform_1(%arg0: i32, %arg1: i32, %arg2: i32) -> (i32, i32) {
    %c0_i32 = arith.constant 0 : i32
    return %arg2, %arg1 : i32, i32
  }
  func.func @transform_2(%arg0: i32, %arg1: i32, %arg2: i32) -> (i32, i32) {
    %c0_i32 = arith.constant 0 : i32
    %c0_i32_0 = arith.constant 0 : i32
    return %c0_i32, %arg1 : i32, i32
  }
  func.func @transform_3(%arg0: i32, %arg1: i32, %arg2: i32) -> (i32, i32) {
    %c0_i32 = arith.constant 0 : i32
    return %arg0, %arg1 : i32, i32
  }
}

</mosaic_0001>

<bundles_post_ra>
// kernel: tpu_custom_call.1
= control target key start
LH: loop header
LB: loop body
LE: loop exit
PB: predicated region body
PF: predicated region fallthrough
CT: control target
= control target key end

     0   :  { %8 = vsyncpa [#allocation4], 0  ;;  %s6571_s0 = inlined_call_operand.hbm [shape: f32[256,256], index: 0, kind: input, shape index: {}]   ;;  %s6572_s1 = inlined_call_operand.hbm [shape: f32[256,256], index: 1, kind: input, shape index: {}]   ;;  %s6573_s2 = inlined_call_operand.vmem [shape: f32[1,256], index: 2, kind: input, shape index: {}]   ;;  %s6574_s3 = inlined_call_operand.hbm [shape: f32[256,256], index: 3, kind: output, shape index: {}]  }
   0x1   :  { %9 = vsyncpa [#allocation7], 0 }
   0x2   :  { %10 = vsyncpa [#allocation5], 0  ;;  %s3933_s12 = smov [#allocation3]  }
   0x3   :  { %s16_s13 = sshll.u32 %s3933_s12, 4  ;;  %s17_s13 = int_to_ptr.vmem [resolvable:$true] %s16_s13 }
   0x4   :  { %s3875_s14 = scalar_lea.vmem %s17_s13, 8192  ;;  %p3880_p1 = scmp.lt.s32.totalorder %s17_s13, %s17_s13 }
   0x5   :  { %p3876_p0 = scmp.ne.s32.totalorder %s17_s13, %s3875_s14  ;;  %p3881_p2 = scmp.lt.s32.totalorder %s3875_s14, %s3875_s14 }
   0x7   :  { %p3882_p3 = por %p3881_p2, %p3880_p1 }
   0x9   :  { %p3883_p4 = pnand %p3882_p3, %p3876_p0 }
   0xb   :  { %3886 = shalt.err (!%p3883_p4)
}
   0xc   :  { %s3934_s15 = smov 256   ;;  %s3935_s16 = smov 16  }
   0xd   :  { %22 = dma.hbm_to_vmem [thread:$0]  %s6571_s0, 8192, %s17_s13, [#allocation4], %s3934_s15, %s3934_s15, %s3935_s16  }
   0xe   :  { %s3936_s19 = smov [#allocation6]  }
   0xf   :  { %s28_s20 = sshll.u32 %s3936_s19, 4  ;;  %s29_s20 = int_to_ptr.vmem [resolvable:$true] %s28_s20 }
  0x10   :  { %s3895_s21 = scalar_lea.vmem %s29_s20, 8192  ;;  %p3900_p6 = scmp.lt.s32.totalorder %s29_s20, %s29_s20 }
  0x11   :  { %p3896_p5 = scmp.ne.s32.totalorder %s29_s20, %s3895_s21  ;;  %p3901_p7 = scmp.lt.s32.totalorder %s3895_s21, %s3895_s21 }
  0x13   :  { %p3902_p8 = por %p3901_p7, %p3900_p6 }
  0x15   :  { %p3903_p9 = pnand %p3902_p8, %p3896_p5 }
  0x17   :  { %3906 = shalt.err (!%p3903_p9)
}
  0x18   :  { %34 = dma.hbm_to_vmem [thread:$0]  %s6572_s1, 8192, %s29_s20, [#allocation7], %s3934_s15, %s3934_s15, %s3935_s16  }
  0x19   :  { %3927 = dma.done.wait [#allocation4], 8192  }
  0x1a   :  { %3928 = vsyncadd [#allocation4], 4294959104 }
  0x1b   :  { %3929 = dma.done.wait [#allocation7], 8192  }
  0x1c   :  { %3930 = vsyncadd [#allocation7], 4294959104  ;;  %v270_v0 = vld [vmem:[#allocation6 + $0xf8] sm:$0xff]  ;;  %v269_v1 = vld [vmem:[#allocation6 + $0xf0] sm:$0xff] }
  0x1d   :  { %v268_v2 = vld [vmem:[#allocation6 + $0xe8] sm:$0xff]  ;;  %v3970_v3 = vand.u32 4294901760, %v270_v0  ;;  %v3972_v4 = vand.u32 4294901760, %v269_v1  ;;  %v267_v6 = vld [vmem:[#allocation6 + $0xe0] sm:$0xff]  ;;  %v266_v7 = vld [vmem:[#allocation6 + $0xd8] sm:$0xff] }
  0x1e   :  { %v3974_v5 = vand.u32 4294901760, %v268_v2  ;;  %v265_v8 = vld [vmem:[#allocation6 + $0xd0] sm:$0xff]  ;;  %v3976_v9 = vand.u32 4294901760, %v267_v6  ;;  %v3978_v10 = vand.u32 4294901760, %v266_v7  ;;  %v264_v12 = vld [vmem:[#allocation6 + $0xc8] sm:$0xff]  ;;  %v263_v13 = vld [vmem:[#allocation6 + $0xc0] sm:$0xff] }
  0x1f   :  { %v3980_v11 = vand.u32 4294901760, %v265_v8  ;;  %v262_v14 = vld [vmem:[#allocation6 + $0xb8] sm:$0xff]  ;;  %304 = vmatprep.subr.mxu0 %v3970_v3  ;;  %v3983_v15 = vand.u32 4294901760, %v264_v12  ;;  %v3985_v16 = vand.u32 4294901760, %v263_v13  ;;  %v3990_v18 = vsub.f32 %v270_v0, %v3970_v3  ;;  %v3992_v19 = vld [vmem:[#allocation6 + $0xb0] sm:$0xff]  ;;  %v3994_v20 = vld [vmem:[#allocation6 + $0xa8] sm:$0xff] }
  0x20   :  { %7045 = vst [vmem:[#allocation12_spill] sm:$0xff] %v3974_v5  ;;  %7046 = vst [vmem:[#allocation13_spill] sm:$0xff] %v3978_v10  ;;  %v3987_v17 = vand.u32 4294901760, %v262_v14  ;;  %v3996_v21 = vld [vmem:[#allocation6 + $0xa0] sm:$0xff]  ;;  %306 = vmatpush1.msra.mxu0 %v3972_v4  ;;  %v4000_v22 = vand.u32 4294901760, %v3992_v19  ;;  %v4003_v23 = vsub.f32 %v269_v1, %v3972_v4  ;;  %v4006_v24 = vand.u32 4294901760, %v3994_v20 }
  0x21   :  { %7047 = vst [vmem:[#allocation14_spill] sm:$0xff] %v3990_v18  ;;  %v4009_v25 = vsub.f32 %v268_v2, %v3974_v5  ;;  %v4011_v26 = vld [vmem:[#allocation6 + $0x98] sm:$0xff]  ;;  %v4013_v27 = vld [vmem:[#allocation6 + $0x90] sm:$0xff]  ;;  %v4015_v28 = vld [vmem:[#allocation6 + $0x88] sm:$0xff]  ;;  %308 = vmatprep.subr.mxu0 %v3974_v5  ;;  %v6588_v29 = vand.u32 4294901760, %v3990_v18  ;;  %v4020_v30 = vand.u32 4294901760, %v3996_v21  ;;  %v4023_v31 = vsub.f32 %v267_v6, %v3976_v9 }
  0x22   :  { %7048 = vst [vmem:[#allocation15_spill] sm:$0xff] %v4003_v23  ;;  %v4026_v32 = vand.u32 4294901760, %v4011_v26  ;;  %310 = vmatpush1.msra.mxu0 %v3976_v9  ;;  %v6586_v33 = vand.u32 4294901760, %v4003_v23  ;;  %v4032_v35 = vsub.f32 %v266_v7, %v3978_v10  ;;  %v4035_v36 = vand.u32 4294901760, %v4013_v27  ;;  %v4037_v37 = vld [vmem:[#allocation6 + $0x80] sm:$0xff]  ;;  %v4061_v46 = vld [vmem:[#allocation6 + $0x78] sm:$0xff] }
  0x23   :  { %7049 = vst [vmem:[#allocation16_spill] sm:$0xff] %v4009_v25  ;;  %7050 = vst [vmem:[#allocation17_spill] sm:$0xff] %v4023_v31  ;;  %v6585_v34 = vand.u32 4294901760, %v4009_v25  ;;  %312 = vmatprep.subr.mxu0 %v3978_v10  ;;  %v947_v38 = vsub.f32 %v3990_v18, %v6588_v29  ;;  %v6583_v39 = vand.u32 4294901760, %v4023_v31  ;;  %v4045_v40 = vsub.f32 %v265_v8, %v3980_v11  ;;  %v4071_v51 = vld [vmem:[#allocation6 + $0x70] sm:$0xff]  ;;  %v4078_v56 = vld [vmem:[#allocation6 + $0x68] sm:$0xff] }
  0x24   :  { %7051 = vst [vmem:[#allocation18_spill] sm:$0xff] %v4035_v36  ;;  %v4048_v41 = vand.u32 4294901760, %v4015_v28  ;;  %314 = vmatpush1.msra.mxu0 %v3980_v11  ;;  %v953_v42 = vsub.f32 %v4003_v23, %v6586_v33  ;;  %v6581_v44 = vand.u32 4294901760, %v4032_v35  ;;  %v4059_v45 = vsub.f32 %v264_v12, %v3983_v15  ;;  %v4090_v61 = vld [vmem:[#allocation6 + $0x60] sm:$0xff]  ;;  %v4102_v2 = vld [vmem:[#allocation6 + $0x58] sm:$0xff] }
  0x25   :  { %v959_v43 = vsub.f32 %v4009_v25, %v6585_v34  ;;  %316 = vmatprep.subr.mxu0 %v3983_v15  ;;  %v948_v47 = vand.u32 4294901760, %v947_v38  ;;  %v965_v48 = vsub.f32 %v4023_v31, %v6583_v39  ;;  %v6580_v49 = vand.u32 4294901760, %v4045_v40  ;;  %v4193_v39 = vld [vmem:[#allocation6 + $0x28] sm:$0xff]  ;;  %v4203_v34 = vld [vmem:[#allocation6 + $0x20] sm:$0xff] }
  0x26   :  { %7052 = vst [vmem:[#allocation19_spill] sm:$0xff] %v4048_v41  ;;  %7053 = vst [vmem:[#allocation20_spill] sm:$0xff] %v4059_v45  ;;  %v4069_v50 = vand.u32 4294901760, %v4037_v37  ;;  %318 = vmatpush1.msra.mxu0 %v3985_v16  ;;  %v954_v52 = vand.u32 4294901760, %v953_v42  ;;  %v971_v54 = vsub.f32 %v4032_v35, %v6581_v44  ;;  %v6578_v55 = vand.u32 4294901760, %v4059_v45 }
  0x27   :  { %v960_v53 = vand.u32 4294901760, %v959_v43  ;;  %320 = vmatprep.subr.mxu0 %v3987_v17  ;;  %949 = vmatprep.subr.mxu1 %v948_v47  ;;  %v966_v57 = vand.u32 4294901760, %v965_v48  ;;  %v977_v58 = vsub.f32 %v4045_v40, %v6580_v49  ;;  %v4085_v59 = vsub.f32 %v263_v13, %v3985_v16  ;;  %v4113_v13 = vld [vmem:[#allocation6 + $0x50] sm:$0xff] }
  0x28   :  { %7054 = vst [vmem:[#allocation21_spill] sm:$0xff] %v4069_v50  ;;  %v4088_v60 = vand.u32 4294901760, %v4061_v46  ;;  %322 = vmatpush1.msra.mxu0 %v4000_v22  ;;  %955 = vmatpush1.msra.mxu1 %v954_v52  ;;  %v972_v62 = vand.u32 4294901760, %v971_v54  ;;  %v983_v63 = vsub.f32 %v4059_v45, %v6578_v55  ;;  %v4097_v0 = vsub.f32 %v262_v14, %v3987_v17  ;;  %v4180_v49 = vld [vmem:[#allocation6 + $0x30] sm:$0xff] }
  0x29   :  { %7055 = vst [vmem:[#allocation22_spill] sm:$0xff] %v4085_v59  ;;  %v4100_v1 = vand.u32 4294901760, %v4071_v51  ;;  %324 = vmatprep.subr.mxu0 %v4006_v24  ;;  %961 = vmatprep.subr.mxu1 %v960_v53  ;;  %v978_v6 = vand.u32 4294901760, %v977_v58  ;;  %v6576_v7 = vand.u32 4294901760, %v4085_v59  ;;  %v4108_v8 = vsub.f32 %v3992_v19, %v4000_v22 }
  0x2a   :  { %7056 = vst [vmem:[#allocation23_spill] sm:$0xff] %v4088_v60  ;;  %7057 = vst [vmem:[#allocation24_spill] sm:$0xff] %v4097_v0  ;;  %v4111_v12 = vand.u32 4294901760, %v4078_v56  ;;  %326 = vmatpush1.msra.mxu0 %v4020_v30  ;;  %967 = vmatpush1.msra.mxu1 %v966_v57  ;;  %v984_v14 = vand.u32 4294901760, %v983_v63  ;;  %v6575_v38 = vand.u32 4294901760, %v4097_v0  ;;  %v4119_v42 = vsub.f32 %v3994_v20, %v4006_v24  ;;  %v4136_v20 = vld [vmem:[#allocation6 + $0x48] sm:$0xff] }
  0x2b   :  { %7058 = vst [vmem:[#allocation25_spill] sm:$0xff] %v4100_v1  ;;  %v4122_v43 = vand.u32 4294901760, %v4090_v61  ;;  %328 = vmatprep.subr.mxu0 %v4026_v32  ;;  %973 = vmatprep.subr.mxu1 %v972_v62  ;;  %v989_v19 = vsub.f32 %v4085_v59, %v6576_v7  ;;  %v6577_v47 = vand.u32 4294901760, %v4108_v8  ;;  %v4131_v48 = vsub.f32 %v3996_v21, %v4020_v30 }
  0x2c   :  { %7059 = vst [vmem:[#allocation26_spill] sm:$0xff] %v4111_v12  ;;  %v4134_v52 = vand.u32 4294901760, %v4102_v2  ;;  %330 = vmatpush1.msra.mxu0 %v4035_v36  ;;  %979 = vmatpush1.msra.mxu1 %v978_v6  ;;  %v995_v53 = vsub.f32 %v4097_v0, %v6575_v38  ;;  %v6579_v54 = vand.u32 4294901760, %v4119_v42  ;;  %v4145_v57 = vsub.f32 %v4011_v26, %v4026_v32  ;;  %v4159_v38 = vld [vmem:[#allocation6 + $0x40] sm:$0xff] }
  0x2d   :  { %7060 = vst [vmem:[#allocation27_spill] sm:$0xff] %v4122_v43  ;;  %v4148_v21 = vand.u32 4294901760, %v4113_v13  ;;  %332 = vmatprep.subr.mxu0 %v4048_v41  ;;  %985 = vmatprep.subr.mxu1 %v984_v14  ;;  %v990_v58 = vand.u32 4294901760, %v989_v19  ;;  %v1001_v62 = vsub.f32 %v4108_v8, %v6577_v47  ;;  %v6582_v63 = vand.u32 4294901760, %v4131_v48  ;;  %v4169_v47 = vld [vmem:[#allocation6 + $0x38] sm:$0xff] }
  0x2e   :  { %7061 = vst [vmem:[#allocation28_spill] sm:$0xff] %v4134_v52  ;;  %v4157_v6 = vsub.f32 %v4013_v27, %v4035_v36  ;;  %334 = vmatpush1.msra.mxu0 %v4069_v50  ;;  %v996_v26 = vand.u32 4294901760, %v995_v53  ;;  %v1007_v14 = vsub.f32 %v4119_v42, %v6579_v54  ;;  %v6584_v19 = vand.u32 4294901760, %v4145_v57 }
  0x2f   :  { %7062 = vst [vmem:[#allocation29_spill] sm:$0xff] %v4148_v21  ;;  %v4167_v7 = vand.u32 4294901760, %v4136_v20  ;;  %991 = vmatpush1.msra.mxu1 %v990_v58  ;;  %336 = vmatprep.subr.mxu0 %v4088_v60  ;;  %v1002_v27 = vand.u32 4294901760, %v1001_v62  ;;  %v1013_v55 = vsub.f32 %v4131_v48, %v6582_v63  ;;  %v4178_v54 = vsub.f32 %v4015_v28, %v4048_v41 }
  0x30   :  { %7063 = vst [vmem:[#allocation30_spill] sm:$0xff] %v4157_v6  ;;  %v6587_v53 = vand.u32 4294901760, %v4157_v6  ;;  %997 = vmatprep.subr.mxu1 %v996_v26  ;;  %338 = vmatpush1.msra.mxu0 %v4100_v1  ;;  %v1008_v44 = vand.u32 4294901760, %v1007_v14  ;;  %v1019_v58 = vsub.f32 %v4145_v57, %v6584_v19  ;;  %v4187_v62 = vand.u32 4294901760, %v4159_v38 }
  0x31   :  { %7064 = vst [vmem:[#allocation31_spill] sm:$0xff] %v4167_v7  ;;  %7065 = vst [vmem:[#allocation32_spill] sm:$0xff] %v4178_v54  ;;  %v4191_v63 = vsub.f32 %v4037_v37, %v4069_v50  ;;  %1003 = vmatpush1.msra.mxu1 %v1002_v27  ;;  %340 = vmatprep.subr.mxu0 %v4111_v12  ;;  %v1014_v28 = vand.u32 4294901760, %v1013_v55  ;;  %v6591_v14 = vand.u32 4294901760, %v4178_v54  ;;  %v4201_v19 = vand.u32 4294901760, %v4169_v47 }
  0x32   :  { %7066 = vst [vmem:[#allocation33_spill] sm:$0xff] %v4187_v62  ;;  %v1025_v26 = vsub.f32 %v4157_v6, %v6587_v53  ;;  %1009 = vmatprep.subr.mxu1 %v1008_v44  ;;  %342 = vmatpush1.msra.mxu0 %v4122_v43  ;;  %v1020_v37 = vand.u32 4294901760, %v1019_v58  ;;  %v4209_v55 = vsub.f32 %v4061_v46, %v4088_v60  ;;  %v4212_v33 = vand.u32 4294901760, %v4180_v49  ;;  %v4214_v53 = vld [vmem:[#allocation6 + $0x18] sm:$0xff] }
  0x33   :  { %7067 = vst [vmem:[#allocation34_spill] sm:$0xff] %v4191_v63  ;;  %7068 = vst [vmem:[#allocation35_spill] sm:$0xff] %v4201_v19  ;;  %v6594_v27 = vand.u32 4294901760, %v4191_v63  ;;  %1015 = vmatpush1.msra.mxu1 %v1014_v28  ;;  %344 = vmatprep.subr.mxu0 %v4134_v52  ;;  %v1031_v44 = vsub.f32 %v4178_v54, %v6591_v14  ;;  %v4222_v58 = vsub.f32 %v4071_v51, %v4100_v1  ;;  %v4239_v51 = vld [vmem:[#allocation6 + $0x10] sm:$0xff] }
  0x34   :  { %7069 = vst [vmem:[#allocation36_spill] sm:$0xff] %v4209_v55  ;;  %7070 = vst [vmem:[#allocation37_spill] sm:$0xff] %v4212_v33  ;;  %v1026_v29 = vand.u32 4294901760, %v1025_v26  ;;  %v4225_v46 = vand.u32 4294901760, %v4193_v39  ;;  %1021 = vmatprep.subr.mxu1 %v1020_v37  ;;  %346 = vmatpush1.msra.mxu0 %v4148_v21  ;;  %v4234_v60 = vsub.f32 %v4078_v56, %v4111_v12  ;;  %v4237_v14 = vand.u32 4294901760, %v4203_v34  ;;  %v4250_v56 = vld [vmem:[#allocation6 + $0x8] sm:$0xff] }
  0x35   :  { %7071 = vst [vmem:[#allocation38_spill] sm:$0xff] %v4222_v58  ;;  %v1037_v28 = vsub.f32 %v4191_v63, %v6594_v27  ;;  %348 = vmatprep.subr.mxu0 %v4167_v7  ;;  %v1032_v37 = vand.u32 4294901760, %v1031_v44  ;;  %v4245_v27 = vsub.f32 %v4090_v61, %v4122_v43  ;;  %v4248_v26 = vand.u32 4294901760, %v4214_v53  ;;  %v4273_v44 = vld [vmem:[#allocation6] sm:$0xff] }
  0x36   :  { %7072 = vst [vmem:[#allocation39_spill] sm:$0xff] %v4225_v46  ;;  %7073 = vst [vmem:[#allocation40_spill] sm:$0xff] %v4234_v60  ;;  %1027 = vmatpush1.msra.mxu1 %v1026_v29  ;;  %350 = vmatpush1.msra.mxu0 %v4187_v62  ;;  %v7077_v63 = vand.u32 4294901760, %v4209_v55  ;;  %v4259_v1 = vsub.f32 %v4102_v2, %v4134_v52  ;;  %v7079_v61 = vand.u32 4294901760, %v4222_v58  ;;  %v4281_v50 = vand.u32 4294901760, %v4250_v56 }
  0x37   :  { %7074 = vst [vmem:[#allocation41_spill] sm:$0xff] %v4237_v14  ;;  %7075 = vst [vmem:[#allocation42_spill] sm:$0xff] %v4245_v27  ;;  %v1038_v12 = vand.u32 4294901760, %v1037_v28  ;;  %1033 = vmatprep.subr.mxu1 %v1032_v37  ;;  %352 = vmatprep.subr.mxu0 %v4201_v19  ;;  %v4267_v28 = vand.u32 4294901760, %v4239_v51  ;;  %v7082_v37 = vand.u32 4294901760, %v4234_v60  ;;  %v4301_v41 = vand.u32 4294901760, %v4273_v44 }
  0x38   :  { %7076 = vst [vmem:[#allocation43_spill] sm:$0xff] %v4248_v26  ;;  %v1043_v29 = vsub.f32 %v4209_v55, %v7077_v63  ;;  %7078 = vst [vmem:[#allocation44_spill] sm:$0xff] %v4259_v1  ;;  %v1049_v43 = vsub.f32 %v4222_v58, %v7079_v61  ;;  %v4271_v63 = vsub.f32 %v4113_v13, %v4148_v21  ;;  %354 = vmatpush1.msra.mxu0 %v4212_v33  ;;  %v4283_v58 = vld [vmem:[#allocation6 + $0x1f8] sm:$0xff] }
  0x39   :  { %7080 = vst [vmem:[#allocation45_spill] sm:$0xff] %v4267_v28  ;;  %1039 = vmatpush1.msra.mxu1 %v1038_v12  ;;  %v1055_v52 = vsub.f32 %v4234_v60, %v7082_v37  ;;  %7083 = vst [vmem:[#allocation47_spill] sm:$0xff] %v4281_v50  ;;  %356 = vmatprep.subr.mxu0 %v4225_v46  ;;  %v7084_v13 = vand.u32 4294901760, %v4245_v27  ;;  %v4292_v21 = vsub.f32 %v4136_v20, %v4167_v7  ;;  %v4294_v37 = vld [vmem:[#allocation6 + $0x1f0] sm:$0xff] }
  0x3a   :  { %7081 = vst [vmem:[#allocation46_spill] sm:$0xff] %v4271_v63  ;;  %v1044_v2 = vand.u32 4294901760, %v1043_v29  ;;  %v1050_v55 = vand.u32 4294901760, %v1049_v43  ;;  %358 = vmatpush1.msra.mxu0 %v4237_v14  ;;  %v7086_v43 = vand.u32 4294901760, %v4259_v1  ;;  %7087 = vst [vmem:[#allocation49_spill] sm:$0xff] %v4301_v41  ;;  %v4307_v29 = vld [vmem:[#allocation6 + $0x1e8] sm:$0xff] }
  0x3b   :  { %v1061_v12 = vsub.f32 %v4245_v27, %v7084_v13  ;;  %7085 = vst [vmem:[#allocation48_spill] sm:$0xff] %v4292_v21  ;;  %v1056_v61 = vand.u32 4294901760, %v1055_v52  ;;  %v4305_v13 = vsub.f32 %v4159_v38, %v4187_v62  ;;  %360 = vmatprep.subr.mxu0 %v4248_v26  ;;  %v7089_v52 = vand.u32 4294901760, %v4271_v63 }
  0x3c   :  { %1045 = vmatprep.subr.mxu1 %v1044_v2  ;;  %v1067_v60 = vsub.f32 %v4259_v1, %v7086_v43  ;;  %v4315_v43 = vand.u32 4294901760, %v4283_v58  ;;  %v4317_v1 = vld [vmem:[#allocation6 + $0x1e0] sm:$0xff]  ;;  %362 = vmatpush1.msra.mxu0 %v4267_v28  ;;  %v4326_v62 = vand.u32 4294901760, %v4294_v37 }
  0x3d   :  { %7088 = vst [vmem:[#allocation50_spill] sm:$0xff] %v4305_v13  ;;  %1051 = vmatpush1.msra.mxu1 %v1050_v55  ;;  %v1062_v20 = vand.u32 4294901760, %v1061_v12  ;;  %v1073_v2 = vsub.f32 %v4271_v63, %v7089_v52  ;;  %v4323_v12 = vsub.f32 %v4169_v47, %v4201_v19  ;;  %v4328_v52 = vld [vmem:[#allocation6 + $0x1d8] sm:$0xff]  ;;  %364 = vmatprep.subr.mxu0 %v4281_v50  ;;  %v4339_v47 = vand.u32 4294901760, %v4307_v29 }
  0x3e   :  { %7090 = vst [vmem:[#allocation51_spill] sm:$0xff] %v4315_v43  ;;  %1057 = vmatprep.subr.mxu1 %v1056_v61  ;;  %v1068_v38 = vand.u32 4294901760, %v1067_v60  ;;  %7092 = vst [vmem:[#allocation53_spill] sm:$0xff] %v4326_v62  ;;  %v7093_v61 = vand.u32 4294901760, %v4292_v21  ;;  %v4336_v55 = vsub.f32 %v4180_v49, %v4212_v33  ;;  %366 = vmatpush1.msra.mxu0 %v4301_v41  ;;  %v7096_v19 = vand.u32 4294901760, %v4305_v13  ;;  %v4353_v49 = vld [vmem:[#allocation6 + $0x1d0] sm:$0xff] }
  0x3f   :  { %7091 = vst [vmem:[#allocation52_spill] sm:$0xff] %v4323_v12  ;;  %1063 = vmatpush1.msra.mxu1 %v1062_v20  ;;  %v1074_v7 = vand.u32 4294901760, %v1073_v2  ;;  %7095 = vst [vmem:[#allocation55_spill] sm:$0xff] %v4339_v47  ;;  %v4348_v63 = vsub.f32 %v4193_v39, %v4225_v46  ;;  %368 = vmatprep.subr.mxu0 %v4315_v43  ;;  %v4362_v2 = vand.u32 4294901760, %v4328_v52  ;;  %v4364_v39 = vld [vmem:[#allocation6 + $0x1c8] sm:$0xff] }
  0x40   :  { %v1079_v60 = vsub.f32 %v4292_v21, %v7093_v61  ;;  %7094 = vst [vmem:[#allocation54_spill] sm:$0xff] %v4336_v55  ;;  %1069 = vmatprep.subr.mxu1 %v1068_v38  ;;  %v1085_v20 = vsub.f32 %v4305_v13, %v7096_v19  ;;  %v4351_v61 = vand.u32 4294901760, %v4317_v1  ;;  %v6637_v38 = vand.u32 4294901760, %v4336_v55  ;;  %370 = vmatpush2.msra.mxu0 %v4326_v62 }
  0x41   :  { %7097 = vst [vmem:[#allocation56_spill] sm:$0xff] %v4348_v63  ;;  %1075 = vmatpush1.msra.mxu1 %v1074_v7  ;;  %v4359_v19 = vsub.f32 %v4203_v34, %v4237_v14  ;;  %7100 = vst [vmem:[#allocation59_spill] sm:$0xff] %v4362_v2  ;;  %v7101_v13 = vand.u32 4294901760, %v4323_v12  ;;  %372 = vmatprep.subr.mxu0 %v4339_v47  ;;  %v4381_v14 = vand.u32 4294901760, %v4353_v49  ;;  %v4387_v7 = vld [vmem:[#allocation6 + $0x1c0] sm:$0xff] }
  0x42   :  { %7098 = vst [vmem:[#allocation57_spill] sm:$0xff] %v4351_v61  ;;  %v1080_v33 = vand.u32 4294901760, %v1079_v60  ;;  %v1086_v46 = vand.u32 4294901760, %v1085_v20  ;;  %v4373_v60 = vsub.f32 %v4214_v53, %v4248_v26  ;;  %v1097_v34 = vsub.f32 %v4336_v55, %v6637_v38  ;;  %374 = vmatpush2.msra.mxu0 %v4351_v61  ;;  %v4397_v55 = vld [vmem:[#allocation6 + $0x1b8] sm:$0xff] }
  0x43   :  { %7099 = vst [vmem:[#allocation58_spill] sm:$0xff] %v4359_v19  ;;  %v1091_v21 = vsub.f32 %v4323_v12, %v7101_v13  ;;  %7103 = vst [vmem:[#allocation61_spill] sm:$0xff] %v4381_v14  ;;  %v4385_v13 = vsub.f32 %v4239_v51, %v4267_v28  ;;  %v4395_v20 = vand.u32 4294901760, %v4364_v39  ;;  %v7107_v51 = vand.u32 4294901760, %v4359_v19  ;;  %376 = vmatprep.subr.mxu0 %v4362_v2 }
  0x44   :  { %7102 = vst [vmem:[#allocation60_spill] sm:$0xff] %v4373_v60  ;;  %1081 = vmatprep.subr.mxu1 %v1080_v33  ;;  %v7105_v33 = vand.u32 4294901760, %v4348_v63  ;;  %v1098_v12 = vand.u32 4294901760, %v1097_v34  ;;  %378 = vmatpush2.msra.mxu0 %v4381_v14 }
  0x45   :  { %7104 = vst [vmem:[#allocation62_spill] sm:$0xff] %v4385_v13  ;;  %1087 = vmatpush1.msra.mxu1 %v1086_v46  ;;  %v1092_v53 = vand.u32 4294901760, %v1091_v21  ;;  %7106 = vst [vmem:[#allocation63_spill] sm:$0xff] %v4395_v20  ;;  %v1109_v28 = vsub.f32 %v4359_v19, %v7107_v51  ;;  %v4406_v46 = vsub.f32 %v4250_v56, %v4281_v50  ;;  %v4415_v51 = vand.u32 4294901760, %v4387_v7  ;;  %v4421_v19 = vld [vmem:[#allocation6 + $0x1a8] sm:$0xff] }
  0x46   :  { %v1103_v26 = vsub.f32 %v4348_v63, %v7105_v33  ;;  %v4408_v33 = vld [vmem:[#allocation6 + $0x1b0] sm:$0xff]  ;;  %v7109_v63 = vand.u32 4294901760, %v4373_v60  ;;  %v4419_v21 = vsub.f32 %v4273_v44, %v4301_v41  ;;  %380 = vmatprep.subr.mxu0 %v4395_v20  ;;  %v4429_v50 = vand.u32 4294901760, %v4397_v55  ;;  %v4442_v41 = vld [vmem:[#allocation6 + $0x198] sm:$0xff] }
  0x47   :  { %7108 = vst [vmem:[#allocation64_spill] sm:$0xff] %v4406_v46  ;;  %1093 = vmatprep.subr.mxu1 %v1092_v53  ;;  %7110 = vst [vmem:[#allocation65_spill] sm:$0xff] %v4415_v51  ;;  %v1110_v56 = vand.u32 4294901760, %v1109_v28  ;;  %v7112_v53 = vand.u32 4294901760, %v4385_v13  ;;  %382 = vmatpush2.msra.mxu0 %v4415_v51  ;;  %v4437_v28 = vsub.f32 %v4283_v58, %v4315_v43  ;;  %v4453_v58 = vand.u32 4294901760, %v4421_v19 }
  0x48   :  { %v1104_v38 = vand.u32 4294901760, %v1103_v26  ;;  %v1115_v34 = vsub.f32 %v4373_v60, %v7109_v63  ;;  %7111 = vst [vmem:[#allocation66_spill] sm:$0xff] %v4419_v21  ;;  %1099 = vmatpush1.msra.mxu1 %v1098_v12  ;;  %7113 = vst [vmem:[#allocation67_spill] sm:$0xff] %v4429_v50  ;;  %v4431_v60 = vld [vmem:[#allocation6 + $0x1a0] sm:$0xff]  ;;  %v6660_v12 = vand.u32 4294901760, %v4419_v21  ;;  %384 = vmatprep.subr.mxu0 %v4429_v50 }
  0x49   :  { %v1121_v26 = vsub.f32 %v4385_v13, %v7112_v53  ;;  %7114 = vst [vmem:[#allocation68_spill] sm:$0xff] %v4437_v28  ;;  %v4440_v53 = vand.u32 4294901760, %v4408_v33  ;;  %v7116_v13 = vand.u32 4294901760, %v4406_v46  ;;  %7118 = vst [vmem:[#allocation71_spill] sm:$0xff] %v4453_v58 }
  0x4a   :  { %1105 = vmatprep.subr.mxu1 %v1104_v38  ;;  %v1116_v44 = vand.u32 4294901760, %v1115_v34  ;;  %v4450_v34 = vsub.f32 %v4294_v37, %v4326_v62  ;;  %v1133_v43 = vsub.f32 %v4419_v21, %v6660_v12  ;;  %v4467_v37 = vld [vmem:[#allocation6 + $0x190] sm:$0xff]  ;;  %v4473_v12 = vsub.f32 %v4317_v1, %v4351_v61 }
  0x4b   :  { %7115 = vst [vmem:[#allocation69_spill] sm:$0xff] %v4440_v53  ;;  %1111 = vmatpush1.msra.mxu1 %v1110_v56  ;;  %v1122_v63 = vand.u32 4294901760, %v1121_v26  ;;  %v1127_v38 = vsub.f32 %v4406_v46, %v7116_v13  ;;  %386 = vmatpush2.msra.mxu0 %v4440_v53  ;;  %v4462_v13 = vsub.f32 %v4307_v29, %v4339_v47  ;;  %v4465_v26 = vand.u32 4294901760, %v4431_v60  ;;  %v4478_v29 = vld [vmem:[#allocation6 + $0x188] sm:$0xff] }
  0x4c   :  { %7117 = vst [vmem:[#allocation70_spill] sm:$0xff] %v4450_v34  ;;  %1117 = vmatprep.subr.mxu1 %v1116_v44  ;;  %v6671_v44 = vand.u32 4294901760, %v4450_v34  ;;  %388 = vmatprep.subr.mxu0 %v4453_v58  ;;  %7121 = vst [vmem:[#allocation74_spill] sm:$0xff] %v4473_v12  ;;  %v4476_v56 = vand.u32 4294901760, %v4442_v41  ;;  %v1134_v47 = vand.u32 4294901760, %v1133_v43  ;;  %v7123_v21 = vand.u32 4294901760, %v4437_v28 }
  0x4d   :  { %7119 = vst [vmem:[#allocation72_spill] sm:$0xff] %v4462_v13  ;;  %7120 = vst [vmem:[#allocation73_spill] sm:$0xff] %v4465_v26  ;;  %1123 = vmatpush1.msra.mxu1 %v1122_v63  ;;  %v1128_v62 = vand.u32 4294901760, %v1127_v38  ;;  %390 = vmatpush2.msra.mxu0 %v4465_v26  ;;  %v4487_v38 = vsub.f32 %v4328_v52, %v4362_v2  ;;  %v4495_v43 = vand.u32 4294901760, %v4467_v37  ;;  %v4501_v63 = vld [vmem:[#allocation6 + $0x180] sm:$0xff]  ;;  %v4508_v61 = vand.u32 4294901760, %v4478_v29 }
  0x4e   :  { %7122 = vst [vmem:[#allocation75_spill] sm:$0xff] %v4476_v56  ;;  %v1139_v46 = vsub.f32 %v4437_v28, %v7123_v21  ;;  %v1145_v1 = vsub.f32 %v4450_v34, %v6671_v44  ;;  %392 = vmatprep.subr.mxu0 %v4476_v56  ;;  %v4499_v21 = vsub.f32 %v4353_v49, %v4381_v14  ;;  %v4510_v34 = vld [vmem:[#allocation6 + $0x178] sm:$0xff]  ;;  %v7129_v27 = vand.u32 4294901760, %v4473_v12 }
  0x4f   :  { %7124 = vst [vmem:[#allocation76_spill] sm:$0xff] %v4487_v38  ;;  %1129 = vmatprep.subr.mxu1 %v1128_v62  ;;  %7125 = vst [vmem:[#allocation77_spill] sm:$0xff] %v4495_v43  ;;  %v7127_v62 = vand.u32 4294901760, %v4462_v13  ;;  %394 = vmatpush2.msra.mxu0 %v4495_v43  ;;  %v7131_v14 = vand.u32 4294901760, %v4487_v38 }
  0x50   :  { %7126 = vst [vmem:[#allocation78_spill] sm:$0xff] %v4499_v21  ;;  %1135 = vmatpush1.msra.mxu1 %v1134_v47  ;;  %v1140_v52 = vand.u32 4294901760, %v1139_v46  ;;  %7128 = vst [vmem:[#allocation79_spill] sm:$0xff] %v4508_v61  ;;  %v1146_v28 = vand.u32 4294901760, %v1145_v1  ;;  %v1157_v49 = vsub.f32 %v4473_v12, %v7129_v27  ;;  %v4519_v46 = vsub.f32 %v4364_v39, %v4395_v20  ;;  %v4534_v12 = vld [vmem:[#allocation6 + $0x168] sm:$0xff] }
  0x51   :  { %v1151_v2 = vsub.f32 %v4462_v13, %v7127_v62  ;;  %v4521_v62 = vld [vmem:[#allocation6 + $0x170] sm:$0xff]  ;;  %v1163_v1 = vsub.f32 %v4487_v38, %v7131_v14  ;;  %396 = vmatprep.subr.mxu0 %v4508_v61  ;;  %v4528_v27 = vand.u32 4294901760, %v4501_v63  ;;  %v4532_v47 = vsub.f32 %v4387_v7, %v4415_v51  ;;  %v4543_v38 = vld [vmem:[#allocation6 + $0x160] sm:$0xff] }
  0x52   :  { %7130 = vst [vmem:[#allocation80_spill] sm:$0xff] %v4519_v46  ;;  %1141 = vmatprep.subr.mxu1 %v1140_v52  ;;  %v1158_v39 = vand.u32 4294901760, %v1157_v49  ;;  %v7134_v52 = vand.u32 4294901760, %v4499_v21  ;;  %v4541_v14 = vand.u32 4294901760, %v4510_v34  ;;  %v4552_v49 = vand.u32 4294901760, %v4521_v62 }
  0x53   :  { %v1152_v44 = vand.u32 4294901760, %v1151_v2  ;;  %7132 = vst [vmem:[#allocation81_spill] sm:$0xff] %v4528_v27  ;;  %7133 = vst [vmem:[#allocation82_spill] sm:$0xff] %v4532_v47  ;;  %1147 = vmatpush2.msra.mxu1 %v1146_v28  ;;  %v1164_v13 = vand.u32 4294901760, %v1163_v1  ;;  %398 = vmatpush2.msra.mxu0 %v4528_v27  ;;  %v6694_v7 = vand.u32 4294901760, %v4532_v47  ;;  %v4549_v28 = vsub.f32 %v4397_v55, %v4429_v50 }
  0x54   :  { %v1169_v2 = vsub.f32 %v4499_v21, %v7134_v52  ;;  %7135 = vst [vmem:[#allocation83_spill] sm:$0xff] %v4541_v14  ;;  %7137 = vst [vmem:[#allocation85_spill] sm:$0xff] %v4552_v49  ;;  %v4554_v52 = vld [vmem:[#allocation6 + $0x158] sm:$0xff]  ;;  %v7138_v51 = vand.u32 4294901760, %v4519_v46  ;;  %400 = vmatprep.subr.mxu0 %v4541_v14  ;;  %v4562_v1 = vsub.f32 %v4408_v33, %v4440_v53  ;;  %v4565_v55 = vand.u32 4294901760, %v4534_v12  ;;  %v4579_v33 = vld [vmem:[#allocation6 + $0x150] sm:$0xff] }
  0x55   :  { %1153 = vmatprep.subr.mxu1 %v1152_v44  ;;  %7136 = vst [vmem:[#allocation84_spill] sm:$0xff] %v4549_v28  ;;  %v1181_v50 = vsub.f32 %v4532_v47, %v6694_v7  ;;  %402 = vmatpush2.msra.mxu0 %v4552_v49  ;;  %v4585_v7 = vsub.f32 %v4431_v60, %v4465_v26  ;;  %v7145_v47 = vand.u32 4294901760, %v4549_v28 }
  0x56   :  { %1159 = vmatpush2.msra.mxu1 %v1158_v39  ;;  %v1170_v20 = vand.u32 4294901760, %v1169_v2  ;;  %v1175_v44 = vsub.f32 %v4519_v46, %v7138_v51  ;;  %7139 = vst [vmem:[#allocation86_spill] sm:$0xff] %v4562_v1  ;;  %7140 = vst [vmem:[#allocation87_spill] sm:$0xff] %v4565_v55  ;;  %v4574_v51 = vsub.f32 %v4421_v19, %v4453_v58  ;;  %v4577_v2 = vand.u32 4294901760, %v4543_v38  ;;  %v4590_v19 = vld [vmem:[#allocation6 + $0x148] sm:$0xff] }
  0x57   :  { %1165 = vmatprep.subr.mxu1 %v1164_v13  ;;  %v6705_v13 = vand.u32 4294901760, %v4562_v1  ;;  %404 = vmatprep.subr.mxu0 %v4565_v55  ;;  %7143 = vst [vmem:[#allocation90_spill] sm:$0xff] %v4585_v7  ;;  %v4588_v39 = vand.u32 4294901760, %v4554_v52  ;;  %v1182_v58 = vand.u32 4294901760, %v1181_v50  ;;  %v1187_v46 = vsub.f32 %v4549_v28, %v7145_v47 }
  0x58   :  { %7141 = vst [vmem:[#allocation88_spill] sm:$0xff] %v4574_v51  ;;  %7142 = vst [vmem:[#allocation89_spill] sm:$0xff] %v4577_v2  ;;  %1171 = vmatpush2.msra.mxu1 %v1170_v20  ;;  %v1176_v53 = vand.u32 4294901760, %v1175_v44  ;;  %406 = vmatpush2.msra.mxu0 %v4577_v2  ;;  %v4599_v44 = vsub.f32 %v4442_v41, %v4476_v56  ;;  %v4607_v50 = vand.u32 4294901760, %v4579_v33  ;;  %v4613_v20 = vld [vmem:[#allocation6 + $0x140] sm:$0xff]  ;;  %v4620_v26 = vand.u32 4294901760, %v4590_v19 }
  0x59   :  { %7144 = vst [vmem:[#allocation91_spill] sm:$0xff] %v4588_v39  ;;  %v1193_v60 = vsub.f32 %v4562_v1, %v6705_v13  ;;  %408 = vmatprep.subr.mxu0 %v4588_v39  ;;  %v4611_v47 = vsub.f32 %v4467_v37, %v4495_v43  ;;  %v1188_v41 = vand.u32 4294901760, %v1187_v46  ;;  %v4622_v1 = vld [vmem:[#allocation6 + $0x138] sm:$0xff]  ;;  %v7151_v21 = vand.u32 4294901760, %v4585_v7 }
  0x5a   :  { %7146 = vst [vmem:[#allocation92_spill] sm:$0xff] %v4599_v44  ;;  %1177 = vmatprep.subr.mxu1 %v1176_v53  ;;  %7147 = vst [vmem:[#allocation93_spill] sm:$0xff] %v4607_v50  ;;  %v7149_v53 = vand.u32 4294901760, %v4574_v51  ;;  %410 = vmatpush2.msra.mxu0 %v4607_v50  ;;  %v4631_v46 = vsub.f32 %v4478_v29, %v4508_v61  ;;  %v7153_v43 = vand.u32 4294901760, %v4599_v44 }
  0x5b   :  { %7148 = vst [vmem:[#allocation94_spill] sm:$0xff] %v4611_v47  ;;  %1183 = vmatpush2.msra.mxu1 %v1182_v58  ;;  %7150 = vst [vmem:[#allocation95_spill] sm:$0xff] %v4620_v26  ;;  %v1194_v28 = vand.u32 4294901760, %v1193_v60  ;;  %v1205_v37 = vsub.f32 %v4585_v7, %v7151_v21  ;;  %412 = vmatprep.subr.mxu0 %v4620_v26  ;;  %v4640_v21 = vand.u32 4294901760, %v4613_v20  ;;  %v4646_v7 = vld [vmem:[#allocation6 + $0x128] sm:$0xff] }
  0x5c   :  { %v1199_v56 = vsub.f32 %v4574_v51, %v7149_v53  ;;  %7152 = vst [vmem:[#allocation96_spill] sm:$0xff] %v4631_v46  ;;  %v4633_v53 = vld [vmem:[#allocation6 + $0x130] sm:$0xff]  ;;  %1189 = vmatprep.subr.mxu1 %v1188_v41  ;;  %v1211_v60 = vsub.f32 %v4599_v44, %v7153_v43  ;;  %v4644_v58 = vsub.f32 %v4501_v63, %v4528_v27  ;;  %v7155_v41 = vand.u32 4294901760, %v4611_v47  ;;  %v4655_v44 = vld [vmem:[#allocation6 + $0x120] sm:$0xff] }
  0x5d   :  { %1195 = vmatpush2.msra.mxu1 %v1194_v28  ;;  %v1206_v29 = vand.u32 4294901760, %v1205_v37  ;;  %v4653_v43 = vand.u32 4294901760, %v4622_v1  ;;  %414 = vmatpush2.msra.mxu0 %v4640_v21  ;;  %v4661_v28 = vsub.f32 %v4510_v34, %v4541_v14  ;;  %v4664_v37 = vand.u32 4294901760, %v4633_v53 }
  0x5e   :  { %v1200_v13 = vand.u32 4294901760, %v1199_v56  ;;  %7154 = vst [vmem:[#allocation97_spill] sm:$0xff] %v4644_v58  ;;  %v1217_v56 = vsub.f32 %v4611_v47, %v7155_v41  ;;  %v1212_v51 = vand.u32 4294901760, %v1211_v60  ;;  %v6728_v63 = vand.u32 4294901760, %v4644_v58  ;;  %v4666_v41 = vld [vmem:[#allocation6 + $0x118] sm:$0xff] }
  0x5f   :  { %7156 = vst [vmem:[#allocation98_spill] sm:$0xff] %v4653_v43  ;;  %7157 = vst [vmem:[#allocation99_spill] sm:$0xff] %v4661_v28  ;;  %v7159_v27 = vand.u32 4294901760, %v4631_v46  ;;  %416 = vmatprep.subr.mxu0 %v4653_v43  ;;  %v4674_v60 = vsub.f32 %v4521_v62, %v4552_v49  ;;  %v4677_v34 = vand.u32 4294901760, %v4646_v7  ;;  %v4691_v62 = vld [vmem:[#allocation6 + $0x110] sm:$0xff] }
  0x60   :  { %1201 = vmatprep.subr.mxu1 %v1200_v13  ;;  %7158 = vst [vmem:[#allocation100_spill] sm:$0xff] %v4664_v37  ;;  %v1218_v61 = vand.u32 4294901760, %v1217_v56  ;;  %v1229_v14 = vsub.f32 %v4644_v58, %v6728_v63  ;;  %418 = vmatpush2.msra.mxu0 %v4664_v37  ;;  %v4689_v56 = vand.u32 4294901760, %v4655_v44  ;;  %v4697_v63 = vsub.f32 %v4543_v38, %v4577_v2 }
  0x61   :  { %1207 = vmatpush2.msra.mxu1 %v1206_v29  ;;  %v1223_v13 = vsub.f32 %v4631_v46, %v7159_v27  ;;  %7160 = vst [vmem:[#allocation101_spill] sm:$0xff] %v4674_v60  ;;  %7161 = vst [vmem:[#allocation102_spill] sm:$0xff] %v4677_v34  ;;  %v4686_v27 = vsub.f32 %v4534_v12, %v4565_v55  ;;  %420 = vmatprep.subr.mxu0 %v4677_v34  ;;  %v4700_v29 = vand.u32 4294901760, %v4666_v41  ;;  %v4702_v12 = vld [vmem:[#allocation6 + $0x108] sm:$0xff] }
  0x62   :  { %1213 = vmatprep.subr.mxu1 %v1212_v51  ;;  %7163 = vst [vmem:[#allocation104_spill] sm:$0xff] %v4689_v56  ;;  %v6739_v51 = vand.u32 4294901760, %v4674_v60  ;;  %7164 = vst [vmem:[#allocation105_spill] sm:$0xff] %v4697_v63  ;;  %v1230_v55 = vand.u32 4294901760, %v1229_v14  ;;  %v7165_v58 = vand.u32 4294901760, %v4661_v28  ;;  %422 = vmatpush2.msra.mxu0 %v4689_v56  ;;  %v4719_v14 = vand.u32 4294901760, %v4691_v62 }
  0x63   :  { %7162 = vst [vmem:[#allocation103_spill] sm:$0xff] %v4686_v27  ;;  %1219 = vmatpush2.msra.mxu1 %v1218_v61  ;;  %v1224_v49 = vand.u32 4294901760, %v1223_v13  ;;  %v4711_v13 = vsub.f32 %v4554_v52, %v4588_v39  ;;  %424 = vmatprep.subr.mxu0 %v4700_v29  ;;  %v4725_v61 = vld [vmem:[#allocation6 + $0x100] sm:$0xff]  ;;  %v176_v52 = vld [vmem:[#allocation3 + $0x8] sm:$0xff]  ;;  %v7167_v39 = vand.u32 4294901760, %v4686_v27  ;;  %v7169_v47 = vand.u32 4294901760, %v4697_v63 }
  0x64   :  { %v1235_v46 = vsub.f32 %v4661_v28, %v7165_v58  ;;  %v1241_v38 = vsub.f32 %v4674_v60, %v6739_v51  ;;  %v4723_v58 = vsub.f32 %v4579_v33, %v4607_v50  ;;  %v4732_v60 = vand.u32 4294901760, %v4702_v12  ;;  %426 = vmatpush2.msra.mxu0 %v4719_v14 }
  0x65   :  { %7166 = vst [vmem:[#allocation106_spill] sm:$0xff] %v4711_v13  ;;  %1225 = vmatprep.subr.mxu1 %v1224_v49  ;;  %v1247_v51 = vsub.f32 %v4686_v27, %v7167_v39  ;;  %v6752_v2 = vand.u32 4294901760, %v4711_v13  ;;  %v1253_v33 = vsub.f32 %v4697_v63, %v7169_v47  ;;  %v4750_v47 = vand.u32 4294901760, %v176_v52 }
  0x66   :  { %1231 = vmatpush2.msra.mxu1 %v1230_v55  ;;  %v1236_v49 = vand.u32 4294901760, %v1235_v46  ;;  %7168 = vst [vmem:[#allocation107_spill] sm:$0xff] %v4732_v60  ;;  %v1242_v28 = vand.u32 4294901760, %v1241_v38  ;;  %v4741_v55 = vsub.f32 %v4590_v19, %v4620_v26  ;;  %v175_v46 = vld [vmem:[#allocation3] sm:$0xff]  ;;  %428 = vmatprep.subr.mxu0 %v4732_v60  ;;  %v4748_v38 = vand.u32 4294901760, %v4725_v61 }
  0x67   :  { %v1248_v39 = vand.u32 4294901760, %v1247_v51  ;;  %v1259_v27 = vsub.f32 %v4711_v13, %v6752_v2  ;;  %7171 = vst [vmem:[#allocation109_spill] sm:$0xff] %v4750_v47  ;;  %v1254_v50 = vand.u32 4294901760, %v1253_v33  ;;  %v7172_v63 = vand.u32 4294901760, %v4723_v58  ;;  %1329 = vmatprep.mubr.f32.mxu1 %v4750_v47 }
  0x68   :  { %1237 = vmatprep.subr.mxu1 %v1236_v49  ;;  %7170 = vst [vmem:[#allocation108_spill] sm:$0xff] %v4748_v38  ;;  %v6757_v49 = vand.u32 4294901760, %v4741_v55  ;;  %v4758_v51 = vsub.f32 %v4613_v20, %v4640_v21  ;;  %430 = vmatpush2.msra.mxu0 %v4748_v38  ;;  %v4762_v26 = vsub.f32 %v176_v52, %v4750_v47  ;;  %v4764_v13 = vand.u32 4294901760, %v175_v46 }
  0x69   :  { %1243 = vmatpush2.msra.mxu1 %v1242_v28  ;;  %v1265_v19 = vsub.f32 %v4723_v58, %v7172_v63  ;;  %v1260_v2 = vand.u32 4294901760, %v1259_v27  ;;  %v4768_v28 = vsub.f32 %v4622_v1, %v4653_v43  ;;  %v178_v63 = vld [vmem:[#allocation3 + $0x18] sm:$0xff]  ;;  %1587 = vmatprep.subr.mxu0 %v3990_v18 }
  0x6a   :  { %1249 = vmatprep.subr.mxu1 %v1248_v39  ;;  %7173 = vst [vmem:[#allocation110_spill] sm:$0xff] %v4762_v26  ;;  %7174 = vst [vmem:[#allocation111_spill] sm:$0xff] %v4764_v13  ;;  %v1271_v20 = vsub.f32 %v4741_v55, %v6757_v49  ;;  %v6763_v27 = vand.u32 4294901760, %v4758_v51  ;;  %v4776_v39 = vsub.f32 %v4633_v53, %v4664_v37  ;;  %v4793_v52 = vand.u32 4294901760, %v178_v63 }
  0x6b   :  { %1255 = vmatpush2.msra.mxu1 %v1254_v50  ;;  %v1266_v33 = vand.u32 4294901760, %v1265_v19  ;;  %v4781_v1 = vsub.f32 %v175_v46, %v4764_v13  ;;  %v4786_v19 = vsub.f32 %v4646_v7, %v4677_v34  ;;  %v7178_v46 = vand.u32 4294901760, %v4762_v26 }
  0x6c   :  { %7175 = vst [vmem:[#allocation112_spill] sm:$0xff] %v4776_v39  ;;  %1261 = vmatprep.subr.mxu1 %v1260_v2  ;;  %v1272_v49 = vand.u32 4294901760, %v1271_v20  ;;  %v1277_v53 = vsub.f32 %v4758_v51, %v6763_v27  ;;  %v6770_v2 = vand.u32 4294901760, %v4776_v39  ;;  %7177 = vst [vmem:[#allocation114_spill] sm:$0xff] %v4793_v52  ;;  %v7179_v7 = vand.u32 4294901760, %v4768_v28  ;;  %v177_v20 = vld [vmem:[#allocation3 + $0x10] sm:$0xff] }
  0x6d   :  { %7176 = vst [vmem:[#allocation113_spill] sm:$0xff] %v4781_v1  ;;  %1267 = vmatpush2.msra.mxu1 %v1266_v33  ;;  %v434_v50 = vsub.f32 %v4762_v26, %v7178_v46  ;;  %v4807_v37 = vsub.f32 %v178_v63, %v4793_v52  ;;  %v4811_v46 = vsub.f32 %v4655_v44, %v4689_v56  ;;  %v7181_v26 = vand.u32 4294901760, %v4781_v1  ;;  %v180_v44 = vld [vmem:[#allocation3 + $0x28] sm:$0xff] }
  0x6e   :  { %v1283_v47 = vsub.f32 %v4768_v28, %v7179_v7  ;;  %1273 = vmatprep.subr.mxu1 %v1272_v49  ;;  %v1278_v34 = vand.u32 4294901760, %v1277_v53  ;;  %v1289_v27 = vsub.f32 %v4776_v39, %v6770_v2  ;;  %v7182_v49 = vand.u32 4294901760, %v4786_v19 }
  0x6f   :  { %7180 = vst [vmem:[#allocation115_spill] sm:$0xff] %v4807_v37  ;;  %v435_v18 = vand.u32 4294901760, %v434_v50  ;;  %v440_v7 = vsub.f32 %v4781_v1, %v7181_v26  ;;  %v6776_v2 = vand.u32 4294901760, %v4807_v37  ;;  %v6775_v63 = vand.u32 4294901760, %v4811_v46 }
  0x70   :  { %v1284_v33 = vand.u32 4294901760, %v1283_v47  ;;  %v1295_v53 = vsub.f32 %v4786_v19, %v7182_v49  ;;  %1279 = vmatpush2.msra.mxu1 %v1278_v34  ;;  %v1290_v43 = vand.u32 4294901760, %v1289_v27  ;;  %v4821_v39 = vand.u32 4294901760, %v177_v20  ;;  %v179_v49 = vld [vmem:[#allocation3 + $0x20] sm:$0xff] }
  0x71   :  { %436 = vmatprep.mubr.f32.mxu0 %v435_v18  ;;  %v441_v50 = vand.u32 4294901760, %v440_v7  ;;  %v4825_v26 = vsub.f32 %v4666_v41, %v4700_v29  ;;  %v4829_v47 = vsub.f32 %v4691_v62, %v4719_v14  ;;  %v450_v34 = vsub.f32 %v4807_v37, %v6776_v2  ;;  %v184_v37 = vld [vmem:[#allocation3 + $0x48] sm:$0xff] }
  0x72   :  { %7183 = vst [vmem:[#allocation116_spill] sm:$0xff] %v4821_v39  ;;  %1285 = vmatprep.subr.mxu1 %v1284_v33  ;;  %v1296_v56 = vand.u32 4294901760, %v1295_v53  ;;  %v1301_v18 = vsub.f32 %v4811_v46, %v6775_v63  ;;  %v4838_v27 = vsub.f32 %v177_v20, %v4821_v39  ;;  %v4842_v41 = vsub.f32 %v4702_v12, %v4732_v60  ;;  %v182_v53 = vld [vmem:[#allocation3 + $0x38] sm:$0xff] }
  0x73   :  { %1291 = vmatpush2.msra.mxu1 %v1290_v43  ;;  %442 = vmatmul.mubr.f32.vlgmr.msra.gmra.mxu0 %v441_v50  ;;  %v6777_v62 = vand.u32 4294901760, %v4825_v26  ;;  %v6779_v43 = vand.u32 4294901760, %v4829_v47  ;;  %v4846_v33 = vand.u32 4294901760, %v180_v44  ;;  %v4850_v7 = vsub.f32 %v4725_v61, %v4748_v38 }
  0x74   :  { %7184 = vst [vmem:[#allocation117_spill] sm:$0xff] %v4838_v27  ;;  %7185 = vst [vmem:[#allocation118_spill] sm:$0xff] %v4842_v41  ;;  %1297 = vmatprep.subr.mxu1 %v1296_v56  ;;  %v451_v20 = vand.u32 4294901760, %v450_v34  ;;  %v1302_v63 = vand.u32 4294901760, %v1301_v18  ;;  %v6785_v2 = vand.u32 4294901760, %v4838_v27  ;;  %v6790_v12 = vand.u32 4294901760, %v4842_v41  ;;  %1590 = vmatpush1.msra.mxu0 %v4003_v23 }
  0x75   :  { %7186 = vst [vmem:[#allocation119_spill] sm:$0xff] %v4846_v33  ;;  %7187 = vst [vmem:[#allocation120_spill] sm:$0xff] %v4850_v7  ;;  %v1307_v56 = vsub.f32 %v4825_v26, %v6777_v62  ;;  %v1313_v50 = vsub.f32 %v4829_v47, %v6779_v43  ;;  %v4862_v61 = vsub.f32 %v180_v44, %v4846_v33  ;;  %1593 = vmatprep.subr.mxu0 %v4009_v25  ;;  %v181_v44 = vld [vmem:[#allocation3 + $0x30] sm:$0xff] }
  0x76   :  { %452 = vmatprep.mubr.f32.mxu0 %v451_v20  ;;  %1303 = vmatpush2.msra.mxu1 %v1302_v63  ;;  %v456_v18 = vsub.f32 %v4838_v27, %v6785_v2  ;;  %v1319_v62 = vsub.f32 %v4842_v41, %v6790_v12  ;;  %v4872_v23 = vand.u32 4294901760, %v179_v49  ;;  %v4874_v43 = vand.u32 4294901760, %v182_v53  ;;  %v183_v2 = vld [vmem:[#allocation3 + $0x40] sm:$0xff]  ;;  %v186_v27 = vld [vmem:[#allocation3 + $0x58] sm:$0xff] }
  0x77   :  { %7188 = vst [vmem:[#allocation121_spill] sm:$0xff] %v4862_v61  ;;  %v1308_v1 = vand.u32 4294901760, %v1307_v56  ;;  %v1314_v34 = vand.u32 4294901760, %v1313_v50  ;;  %v6798_v25 = vand.u32 4294901760, %v4862_v61  ;;  %v7191_v63 = vand.u32 4294901760, %v4850_v7  ;;  %1596 = vmatpush1.msra.mxu0 %v4023_v31  ;;  %v185_v56 = vld [vmem:[#allocation3 + $0x50] sm:$0xff] }
  0x78   :  { %7189 = vst [vmem:[#allocation122_spill] sm:$0xff] %v4872_v23  ;;  %7190 = vst [vmem:[#allocation123_spill] sm:$0xff] %v4874_v43  ;;  %v457_v38 = vand.u32 4294901760, %v456_v18  ;;  %v1320_v12 = vand.u32 4294901760, %v1319_v62  ;;  %v4882_v60 = vsub.f32 %v179_v49, %v4872_v23  ;;  %v4885_v41 = vsub.f32 %v182_v53, %v4874_v43  ;;  %1599 = vmatprep.subr.mxu0 %v4032_v35  ;;  %v188_v18 = vld [vmem:[#allocation3 + $0x68] sm:$0xff] }
  0x79   :  { %v1325_v20 = vsub.f32 %v4850_v7, %v7191_v63  ;;  %1309 = vmatprep.subr.mxu1 %v1308_v1  ;;  %v466_v50 = vsub.f32 %v4862_v61, %v6798_v25  ;;  %v4891_v31 = vand.u32 4294901760, %v181_v44  ;;  %v4893_v7 = vand.u32 4294901760, %v184_v37  ;;  %1602 = vmatpush1.msra.mxu0 %v4045_v40 }
  0x7a   :  { %7192 = vst [vmem:[#allocation124_spill] sm:$0xff] %v4882_v60  ;;  %7193 = vst [vmem:[#allocation125_spill] sm:$0xff] %v4885_v41  ;;  %458 = vmatmul.mubr.f32.gmra.mxu0 %v457_v38  ;;  %1315 = vmatpush2.msra.mxu1 %v1314_v34  ;;  %v6802_v62 = vand.u32 4294901760, %v4882_v60  ;;  %v6805_v49 = vand.u32 4294901760, %v4885_v41  ;;  %v4898_v53 = vand.u32 4294901760, %v183_v2  ;;  %v4900_v1 = vand.u32 4294901760, %v186_v27 }
  0x7b   :  { %v1326_v63 = vand.u32 4294901760, %v1325_v20  ;;  %7194 = vst [vmem:[#allocation126_spill] sm:$0xff] %v4891_v31  ;;  %7195 = vst [vmem:[#allocation127_spill] sm:$0xff] %v4893_v7  ;;  %1321 = vmatprep.subr.mxu1 %v1320_v12  ;;  %v467_v25 = vand.u32 4294901760, %v466_v50  ;;  %v4903_v20 = vsub.f32 %v181_v44, %v4891_v31  ;;  %v4906_v61 = vsub.f32 %v184_v37, %v4893_v7 }
  0x7c   :  { %7196 = vst [vmem:[#allocation128_spill] sm:$0xff] %v4898_v53  ;;  %7197 = vst [vmem:[#allocation129_spill] sm:$0xff] %v4900_v1  ;;  %1605 = vmatprep.subr.mxu0 %v4059_v45  ;;  %v4909_v38 = vand.u32 4294901760, %v185_v56  ;;  %v472_v34 = vsub.f32 %v4882_v60, %v6802_v62  ;;  %v482_v12 = vsub.f32 %v4885_v41, %v6805_v49  ;;  %v4929_v62 = vand.u32 4294901760, %v188_v18  ;;  %v187_v60 = vld [vmem:[#allocation3 + $0x60] sm:$0xff]  ;;  %v190_v49 = vld [vmem:[#allocation3 + $0x78] sm:$0xff] }
  0x7d   :  { %7198 = vst [vmem:[#allocation130_spill] sm:$0xff] %v4903_v20  ;;  %7199 = vst [vmem:[#allocation131_spill] sm:$0xff] %v4906_v61  ;;  %1327 = vmatpush2.msra.mxu1 %v1326_v63  ;;  %v4918_v50 = vsub.f32 %v183_v2, %v4898_v53  ;;  %v4921_v44 = vsub.f32 %v186_v27, %v4900_v1  ;;  %468 = vmatprep.mubr.f32.mxu0 %v467_v25  ;;  %v6810_v37 = vand.u32 4294901760, %v4903_v20 }
  0x7e   :  { %7200 = vst [vmem:[#allocation132_spill] sm:$0xff] %v4909_v38  ;;  %1331 = vmatmul.mubr.f32.vlgmr.msra.gmra.mxu1 %v4764_v13  ;;  %v6815_v63 = vand.u32 4294901760, %v4906_v61  ;;  %v4927_v45 = vsub.f32 %v185_v56, %v4909_v38  ;;  %7204 = vst [vmem:[#allocation136_spill] sm:$0xff] %v4929_v62  ;;  %v473_v41 = vand.u32 4294901760, %v472_v34  ;;  %2099 = vmatprep.subr.mxu1 %v3970_v3  ;;  %v483_v2 = vand.u32 4294901760, %v482_v12  ;;  %v192_v34 = vld [vmem:[#allocation3 + $0x88] sm:$0xff] }
  0x7f   :  { %7201 = vst [vmem:[#allocation133_spill] sm:$0xff] %v4918_v50  ;;  %7202 = vst [vmem:[#allocation134_spill] sm:$0xff] %v4921_v44  ;;  %1337 = vmatprep.mubr.f32.mxu1 %v4793_v52  ;;  %v6820_v25 = vand.u32 4294901760, %v4918_v50  ;;  %2101 = vmatpush1.msra.mxu1 %v3972_v4  ;;  %v488_v56 = vsub.f32 %v4903_v20, %v6810_v37  ;;  %v4945_v12 = vsub.f32 %v188_v18, %v4929_v62 }
  0x80   :  { %7203 = vst [vmem:[#allocation135_spill] sm:$0xff] %v4927_v45  ;;  %v498_v13 = vsub.f32 %v4906_v61, %v6815_v63  ;;  %1608 = vmatpush1.msra.mxu0 %v4085_v59  ;;  %2103 = vmatprep.subr.mxu1 %v3974_v5  ;;  %v7206_v37 = vand.u32 4294901760, %v4921_v44  ;;  %v4954_v20 = vand.u32 4294901760, %v187_v60  ;;  %v4956_v63 = vand.u32 4294901760, %v190_v49  ;;  %v189_v59 = vld [vmem:[#allocation3 + $0x70] sm:$0xff]  ;;  %v191_v5 = vld [vmem:[#allocation3 + $0x80] sm:$0xff] }
  0x81   :  { %7205 = vst [vmem:[#allocation137_spill] sm:$0xff] %v4945_v12  ;;  %474 = vmatmul.mubr.f32.gmra.mxu0 %v473_v41  ;;  %v504_v27 = vsub.f32 %v4918_v50, %v6820_v25  ;;  %v489_v18 = vand.u32 4294901760, %v488_v56  ;;  %2105 = vmatpush1.msra.mxu1 %v3976_v9  ;;  %v4973_v56 = vand.u32 4294901760, %v189_v59  ;;  %v4975_v61 = vand.u32 4294901760, %v192_v34 }
  0x82   :  { %v514_v52 = vsub.f32 %v4921_v44, %v7206_v37  ;;  %7207 = vst [vmem:[#allocation138_spill] sm:$0xff] %v4954_v20  ;;  %7208 = vst [vmem:[#allocation139_spill] sm:$0xff] %v4956_v63  ;;  %484 = vmatprep.mubr.f32.mxu0 %v483_v2  ;;  %1339 = vmatmul.mubr.f32.gmra.mxu1 %v4821_v39  ;;  %v499_v41 = vand.u32 4294901760, %v498_v13  ;;  %v4963_v37 = vsub.f32 %v187_v60, %v4954_v20  ;;  %v194_v44 = vld [vmem:[#allocation3 + $0x98] sm:$0xff] }
  0x83   :  { %1345 = vmatprep.mubr.f32.mxu1 %v4846_v33  ;;  %v4966_v25 = vsub.f32 %v190_v49, %v4956_v63  ;;  %v505_v50 = vand.u32 4294901760, %v504_v27  ;;  %2107 = vmatprep.subr.mxu1 %v3978_v10  ;;  %v7210_v2 = vand.u32 4294901760, %v4927_v45  ;;  %7211 = vst [vmem:[#allocation141_spill] sm:$0xff] %v4973_v56  ;;  %7212 = vst [vmem:[#allocation142_spill] sm:$0xff] %v4975_v61  ;;  %v7213_v49 = vand.u32 4294901760, %v4945_v12  ;;  %v193_v10 = vld [vmem:[#allocation3 + $0x90] sm:$0xff] }
  0x84   :  { %1611 = vmatprep.subr.mxu0 %v4097_v0  ;;  %2109 = vmatpush1.msra.mxu1 %v3980_v11  ;;  %v515_v60 = vand.u32 4294901760, %v514_v52  ;;  %v6839_v33 = vand.u32 4294901760, %v4963_v37  ;;  %v4982_v39 = vand.u32 4294901760, %v191_v5  ;;  %v4992_v52 = vand.u32 4294901760, %v194_v44  ;;  %v196_v0 = vld [vmem:[#allocation3 + $0xa8] sm:$0xff] }
  0x85   :  { %7209 = vst [vmem:[#allocation140_spill] sm:$0xff] %v4966_v25  ;;  %v520_v13 = vsub.f32 %v4927_v45, %v7210_v2  ;;  %490 = vmatmul.mubr.f32.gmra.mxu0 %v489_v18  ;;  %v530_v27 = vsub.f32 %v4945_v12, %v7213_v49  ;;  %v4987_v45 = vsub.f32 %v189_v59, %v4973_v56  ;;  %v5001_v49 = vand.u32 4294901760, %v193_v10  ;;  %v198_v2 = vld [vmem:[#allocation3 + $0xb8] sm:$0xff] }
  0x86   :  { %7214 = vst [vmem:[#allocation143_spill] sm:$0xff] %v4982_v39  ;;  %500 = vmatprep.mubr.f32.mxu0 %v499_v41  ;;  %1347 = vmatmul.mubr.f32.gmra.mxu1 %v4872_v23  ;;  %v4990_v18 = vsub.f32 %v192_v34, %v4975_v61  ;;  %7217 = vst [vmem:[#allocation146_spill] sm:$0xff] %v4992_v52  ;;  %v4999_v41 = vsub.f32 %v191_v5, %v4982_v39  ;;  %v7221_v5 = vand.u32 4294901760, %v4966_v25 }
  0x87   :  { %7215 = vst [vmem:[#allocation144_spill] sm:$0xff] %v4987_v45  ;;  %1353 = vmatprep.mubr.f32.mxu1 %v4874_v43  ;;  %2111 = vmatprep.subr.mxu1 %v3983_v15  ;;  %7219 = vst [vmem:[#allocation148_spill] sm:$0xff] %v5001_v49  ;;  %v521_v59 = vand.u32 4294901760, %v520_v13  ;;  %v536_v34 = vsub.f32 %v4963_v37, %v6839_v33  ;;  %v5008_v43 = vand.u32 4294901760, %v196_v0  ;;  %v531_v23 = vand.u32 4294901760, %v530_v27  ;;  %v195_v33 = vld [vmem:[#allocation3 + $0xa0] sm:$0xff] }
  0x88   :  { %7216 = vst [vmem:[#allocation145_spill] sm:$0xff] %v4990_v18  ;;  %2113 = vmatpush1.msra.mxu1 %v3985_v16  ;;  %1614 = vmatpush1.msra.mxu0 %v4108_v8  ;;  %7218 = vst [vmem:[#allocation147_spill] sm:$0xff] %v4999_v41  ;;  %v546_v12 = vsub.f32 %v4966_v25, %v7221_v5  ;;  %v5016_v13 = vsub.f32 %v194_v44, %v4992_v52  ;;  %v7224_v44 = vand.u32 4294901760, %v4987_v45 }
  0x89   :  { %506 = vmatmul.mubr.f32.gmra.mxu0 %v505_v50  ;;  %2115 = vmatprep.subr.mxu1 %v3987_v17  ;;  %7220 = vst [vmem:[#allocation149_spill] sm:$0xff] %v5008_v43  ;;  %v5024_v27 = vsub.f32 %v193_v10, %v5001_v49  ;;  %v537_v5 = vand.u32 4294901760, %v536_v34  ;;  %v7227_v10 = vand.u32 4294901760, %v4990_v18  ;;  %v5040_v25 = vand.u32 4294901760, %v198_v2 }
  0x8a   :  { %516 = vmatprep.mubr.f32.mxu0 %v515_v60  ;;  %1355 = vmatmul.mubr.f32.gmra.mxu1 %v4891_v31  ;;  %7222 = vst [vmem:[#allocation150_spill] sm:$0xff] %v5016_v13  ;;  %v552_v50 = vsub.f32 %v4987_v45, %v7224_v44  ;;  %v5033_v31 = vand.u32 4294901760, %v195_v33  ;;  %v547_v60 = vand.u32 4294901760, %v546_v12  ;;  %v197_v44 = vld [vmem:[#allocation3 + $0xb0] sm:$0xff]  ;;  %v199_v45 = vld [vmem:[#allocation3 + $0xc0] sm:$0xff] }
  0x8b   :  { %1361 = vmatprep.mubr.f32.mxu1 %v4893_v7  ;;  %2117 = vmatpush1.msra.mxu1 %v4000_v22  ;;  %7223 = vst [vmem:[#allocation151_spill] sm:$0xff] %v5024_v27  ;;  %v5031_v7 = vsub.f32 %v196_v0, %v5008_v43  ;;  %7228 = vst [vmem:[#allocation154_spill] sm:$0xff] %v5040_v25  ;;  %v200_v0 = vld [vmem:[#allocation3 + $0xc8] sm:$0xff] }
  0x8c   :  { %1617 = vmatprep.subr.mxu0 %v4119_v42  ;;  %2119 = vmatprep.subr.mxu1 %v4006_v24  ;;  %7226 = vst [vmem:[#allocation153_spill] sm:$0xff] %v5033_v31  ;;  %v553_v34 = vand.u32 4294901760, %v552_v50  ;;  %v5062_v50 = vsub.f32 %v198_v2, %v5040_v25 }
  0x8d   :  { %522 = vmatmul.mubr.f32.gmra.mxu0 %v521_v59  ;;  %2121 = vmatpush1.msra.mxu1 %v4020_v30  ;;  %7225 = vst [vmem:[#allocation152_spill] sm:$0xff] %v5031_v7  ;;  %v562_v59 = vsub.f32 %v4990_v18, %v7227_v10  ;;  %v5055_v18 = vand.u32 4294901760, %v197_v44 }
  0x8e   :  { %532 = vmatprep.mubr.f32.mxu0 %v531_v23  ;;  %1363 = vmatmul.mubr.f32.gmra.mxu1 %v4898_v53  ;;  %v7229_v23 = vand.u32 4294901760, %v4999_v41  ;;  %7233 = vst [vmem:[#allocation157_spill] sm:$0xff] %v5062_v50  ;;  %v7236_v53 = vld [vmem:[#allocation19_spill] sm:$0xff] }
  0x8f   :  { %1369 = vmatprep.mubr.f32.mxu1 %v4900_v1  ;;  %1620 = vmatpush1.msra.mxu0 %v4131_v48  ;;  %v5053_v1 = vsub.f32 %v195_v33, %v5033_v31  ;;  %7231 = vst [vmem:[#allocation156_spill] sm:$0xff] %v5055_v18  ;;  %v202_v33 = vld [vmem:[#allocation3 + $0xd8] sm:$0xff] }
  0x90   :  { %1623 = vmatprep.subr.mxu0 %v4145_v57  ;;  %v568_v12 = vsub.f32 %v4999_v41, %v7229_v23  ;;  %2123 = vmatprep.subr.mxu1 %v4026_v32  ;;  %v563_v23 = vand.u32 4294901760, %v562_v59  ;;  %v7232_v41 = vand.u32 4294901760, %v5016_v13 }
  0x91   :  { %538 = vmatmul.mubr.f32.gmra.mxu0 %v537_v5  ;;  %2125 = vmatpush1.msra.mxu1 %v4035_v36  ;;  %7230 = vst [vmem:[#allocation155_spill] sm:$0xff] %v5053_v1  ;;  %v5064_v5 = vand.u32 4294901760, %v200_v0  ;;  %v7244_v36 = vld [vmem:[#allocation36_spill] sm:$0xff] }
  0x92   :  { %548 = vmatprep.mubr.f32.mxu0 %v547_v60  ;;  %1371 = vmatmul.mubr.f32.gmra.mxu1 %v4909_v38  ;;  %v578_v10 = vsub.f32 %v5016_v13, %v7232_v41  ;;  %v7235_v60 = vand.u32 4294901760, %v5024_v27  ;;  %v5073_v38 = vand.u32 4294901760, %v199_v45  ;;  %v569_v2 = vand.u32 4294901760, %v568_v12  ;;  %v7238_v41 = vld [vmem:[#allocation21_spill] sm:$0xff] }
  0x93   :  { %7234 = vst [vmem:[#allocation158_spill] sm:$0xff] %v5064_v5  ;;  %1377 = vmatprep.mubr.f32.mxu1 %v4929_v62  ;;  %1626 = vmatpush1.msra.mxu0 %v4157_v6  ;;  %v7239_v13 = vand.u32 4294901760, %v5031_v7  ;;  %v201_v6 = vld [vmem:[#allocation3 + $0xd0] sm:$0xff]  ;;  %v5088_v12 = vand.u32 4294901760, %v202_v33 }
  0x94   :  { %1629 = vmatprep.subr.mxu0 %v4178_v54  ;;  %v584_v59 = vsub.f32 %v5024_v27, %v7235_v60  ;;  %2127 = vmatprep.subr.mxu1 %v7236_v53  ;;  %7237 = vst [vmem:[#allocation159_spill] sm:$0xff] %v5073_v38  ;;  %v5081_v54 = vsub.f32 %v197_v44, %v5055_v18  ;;  %v579_v60 = vand.u32 4294901760, %v578_v10  ;;  %v7245_v44 = vld [vmem:[#allocation23_spill] sm:$0xff]  ;;  %v5097_v10 = vand.u32 4294901760, %v201_v6  ;;  %v209_v53 = vld [vmem:[#allocation3 + $0x110] sm:$0xff] }
  0x95   :  { %554 = vmatmul.mubr.f32.gmra.mxu0 %v553_v34  ;;  %2129 = vmatpush1.msra.mxu1 %v7238_v41  ;;  %v594_v62 = vsub.f32 %v5031_v7, %v7239_v13  ;;  %v5086_v34 = vsub.f32 %v200_v0, %v5064_v5  ;;  %7242 = vst [vmem:[#allocation162_spill] sm:$0xff] %v5088_v12  ;;  %v204_v41 = vld [vmem:[#allocation3 + $0xe8] sm:$0xff]  ;;  %v7243_v13 = vld [vmem:[#allocation34_spill] sm:$0xff]  ;;  %v7248_v0 = vand.u32 4294901760, %v5053_v1 }
  0x96   :  { %7240 = vst [vmem:[#allocation160_spill] sm:$0xff] %v5081_v54  ;;  %564 = vmatprep.mubr.f32.mxu0 %v563_v23  ;;  %1379 = vmatmul.mubr.f32.gmra.mxu1 %v4954_v20  ;;  %v5095_v23 = vsub.f32 %v199_v45, %v5073_v38  ;;  %7247 = vst [vmem:[#allocation164_spill] sm:$0xff] %v5097_v10  ;;  %v585_v27 = vand.u32 4294901760, %v584_v59  ;;  %v7249_v7 = vld [vmem:[#allocation25_spill] sm:$0xff]  ;;  %v7251_v45 = vand.u32 4294901760, %v5062_v50 }
  0x97   :  { %7241 = vst [vmem:[#allocation161_spill] sm:$0xff] %v5086_v34  ;;  %1385 = vmatprep.mubr.f32.mxu1 %v4956_v63  ;;  %1632 = vmatpush1.msra.mxu0 %v7243_v13  ;;  %v600_v20 = vsub.f32 %v5053_v1, %v7248_v0  ;;  %v5104_v13 = vand.u32 4294901760, %v204_v41  ;;  %v203_v0 = vld [vmem:[#allocation3 + $0xe0] sm:$0xff]  ;;  %v7253_v1 = vld [vmem:[#allocation38_spill] sm:$0xff]  ;;  %v206_v63 = vld [vmem:[#allocation3 + $0xf8] sm:$0xff] }
  0x98   :  { %1635 = vmatprep.subr.mxu0 %v7244_v36  ;;  %2131 = vmatprep.subr.mxu1 %v7245_v44  ;;  %7246 = vst [vmem:[#allocation163_spill] sm:$0xff] %v5095_v23  ;;  %v595_v44 = vand.u32 4294901760, %v594_v62  ;;  %v610_v36 = vsub.f32 %v5062_v50, %v7251_v45  ;;  %v7258_v50 = vld [vmem:[#allocation27_spill] sm:$0xff] }
  0x99   :  { %570 = vmatmul.mubr.f32.gmra.mxu0 %v569_v2  ;;  %2133 = vmatpush1.msra.mxu1 %v7249_v7  ;;  %7250 = vst [vmem:[#allocation165_spill] sm:$0xff] %v5104_v13  ;;  %v5112_v2 = vsub.f32 %v202_v33, %v5088_v12  ;;  %v7254_v7 = vld [vmem:[#allocation40_spill] sm:$0xff]  ;;  %v601_v45 = vand.u32 4294901760, %v600_v20  ;;  %v7257_v33 = vand.u32 4294901760, %v5081_v54 }
  0x9a   :  { %580 = vmatprep.mubr.f32.mxu0 %v579_v60  ;;  %1387 = vmatmul.mubr.f32.gmra.mxu1 %v4973_v56  ;;  %v7255_v60 = vld [vmem:[#allocation26_spill] sm:$0xff]  ;;  %v5120_v56 = vsub.f32 %v201_v6, %v5097_v10  ;;  %v611_v62 = vand.u32 4294901760, %v610_v36  ;;  %v7261_v6 = vand.u32 4294901760, %v5086_v34 }
  0x9b   :  { %7252 = vst [vmem:[#allocation166_spill] sm:$0xff] %v5112_v2  ;;  %1393 = vmatprep.mubr.f32.mxu1 %v4975_v61  ;;  %1638 = vmatpush1.msra.mxu0 %v7253_v1  ;;  %v616_v59 = vsub.f32 %v5081_v54, %v7257_v33  ;;  %v5127_v61 = vsub.f32 %v204_v41, %v5104_v13  ;;  %v5129_v1 = vand.u32 4294901760, %v203_v0  ;;  %v205_v33 = vld [vmem:[#allocation3 + $0xf0] sm:$0xff]  ;;  %v208_v41 = vld [vmem:[#allocation3 + $0x108] sm:$0xff] }
  0x9c   :  { %1641 = vmatprep.subr.mxu0 %v7254_v7  ;;  %2135 = vmatprep.subr.mxu1 %v7255_v60  ;;  %7256 = vst [vmem:[#allocation167_spill] sm:$0xff] %v5120_v56  ;;  %v5136_v60 = vand.u32 4294901760, %v206_v63  ;;  %v7263_v54 = vld [vmem:[#allocation42_spill] sm:$0xff]  ;;  %v210_v7 = vld [vmem:[#allocation3 + $0x118] sm:$0xff] }
  0x9d   :  { %586 = vmatmul.mubr.f32.gmra.mxu0 %v585_v27  ;;  %2137 = vmatpush1.msra.mxu1 %v7258_v50  ;;  %7259 = vst [vmem:[#allocation168_spill] sm:$0xff] %v5127_v61  ;;  %7260 = vst [vmem:[#allocation169_spill] sm:$0xff] %v5129_v1  ;;  %v626_v27 = vsub.f32 %v5086_v34, %v7261_v6  ;;  %v7264_v50 = vld [vmem:[#allocation44_spill] sm:$0xff]  ;;  %v617_v20 = vand.u32 4294901760, %v616_v59  ;;  %v7267_v34 = vld [vmem:[#allocation29_spill] sm:$0xff] }
  0x9e   :  { %596 = vmatprep.mubr.f32.mxu0 %v595_v44  ;;  %1395 = vmatmul.mubr.f32.gmra.mxu1 %v4982_v39  ;;  %7262 = vst [vmem:[#allocation170_spill] sm:$0xff] %v5136_v60  ;;  %v7265_v44 = vand.u32 4294901760, %v5095_v23  ;;  %v7266_v39 = vld [vmem:[#allocation28_spill] sm:$0xff]  ;;  %v5158_v59 = vsub.f32 %v206_v63, %v5136_v60 }
  0x9f   :  { %1401 = vmatprep.mubr.f32.mxu1 %v4992_v52  ;;  %1644 = vmatpush1.msra.mxu0 %v7263_v54  ;;  %v5149_v52 = vsub.f32 %v203_v0, %v5129_v1  ;;  %v5151_v54 = vand.u32 4294901760, %v205_v33  ;;  %v7273_v0 = vld [vmem:[#allocation46_spill] sm:$0xff] }
  0xa0   :  { %1647 = vmatprep.subr.mxu0 %v7264_v50  ;;  %v632_v36 = vsub.f32 %v5095_v23, %v7265_v44  ;;  %2139 = vmatprep.subr.mxu1 %v7266_v39  ;;  %v207_v50 = vld [vmem:[#allocation3 + $0x100] sm:$0xff]  ;;  %v627_v44 = vand.u32 4294901760, %v626_v27  ;;  %v7270_v23 = vand.u32 4294901760, %v5112_v2  ;;  %7271 = vst [vmem:[#allocation173_spill] sm:$0xff] %v5158_v59 }
  0xa1   :  { %602 = vmatmul.mubr.f32.gmra.mxu0 %v601_v45  ;;  %2141 = vmatpush1.msra.mxu1 %v7267_v34  ;;  %7268 = vst [vmem:[#allocation171_spill] sm:$0xff] %v5149_v52  ;;  %7269 = vst [vmem:[#allocation172_spill] sm:$0xff] %v5151_v54  ;;  %v5160_v45 = vand.u32 4294901760, %v208_v41  ;;  %v7274_v34 = vld [vmem:[#allocation48_spill] sm:$0xff]  ;;  %v5169_v39 = vand.u32 4294901760, %v207_v50 }
  0xa2   :  { %612 = vmatprep.mubr.f32.mxu0 %v611_v62  ;;  %1403 = vmatmul.mubr.f32.gmra.mxu1 %v5001_v49  ;;  %v642_v6 = vsub.f32 %v5112_v2, %v7270_v23  ;;  %v7275_v62 = vand.u32 4294901760, %v5120_v56  ;;  %v7276_v49 = vld [vmem:[#allocation31_spill] sm:$0xff]  ;;  %v633_v63 = vand.u32 4294901760, %v632_v36  ;;  %v7278_v23 = vld [vmem:[#allocation33_spill] sm:$0xff]  ;;  %v7279_v2 = vand.u32 4294901760, %v5127_v61 }
  0xa3   :  { %7272 = vst [vmem:[#allocation174_spill] sm:$0xff] %v5160_v45  ;;  %1409 = vmatprep.mubr.f32.mxu1 %v5008_v43  ;;  %1650 = vmatpush1.msra.mxu0 %v7273_v0  ;;  %7277 = vst [vmem:[#allocation175_spill] sm:$0xff] %v5169_v39  ;;  %v5184_v36 = vand.u32 4294901760, %v210_v7  ;;  %v7284_v0 = vld [vmem:[#allocation52_spill] sm:$0xff] }
  0xa4   :  { %1653 = vmatprep.subr.mxu0 %v7274_v34  ;;  %v648_v27 = vsub.f32 %v5120_v56, %v7275_v62  ;;  %2143 = vmatprep.subr.mxu1 %v7276_v49  ;;  %v658_v43 = vsub.f32 %v5127_v61, %v7279_v2  ;;  %v5177_v34 = vsub.f32 %v205_v33, %v5151_v54  ;;  %v643_v62 = vand.u32 4294901760, %v642_v6  ;;  %v7283_v2 = vld [vmem:[#allocation50_spill] sm:$0xff]  ;;  %v7285_v33 = vld [vmem:[#allocation35_spill] sm:$0xff]  ;;  %v7289_v61 = vld [vmem:[#allocation37_spill] sm:$0xff] }
  0xa5   :  { %618 = vmatmul.mubr.f32.gmra.mxu0 %v617_v20  ;;  %2145 = vmatpush1.msra.mxu1 %v7278_v23  ;;  %v5182_v20 = vsub.f32 %v208_v41, %v5160_v45  ;;  %7282 = vst [vmem:[#allocation178_spill] sm:$0xff] %v5184_v36  ;;  %v212_v23 = vld [vmem:[#allocation3 + $0x128] sm:$0xff]  ;;  %v5193_v6 = vand.u32 4294901760, %v209_v53  ;;  %v7288_v41 = vand.u32 4294901760, %v5149_v52  ;;  %v217_v49 = vld [vmem:[#allocation3 + $0x150] sm:$0xff] }
  0xa6   :  { %7280 = vst [vmem:[#allocation176_spill] sm:$0xff] %v5177_v34  ;;  %628 = vmatprep.mubr.f32.mxu0 %v627_v44  ;;  %1411 = vmatmul.mubr.f32.gmra.mxu1 %v5033_v31  ;;  %v5191_v44 = vsub.f32 %v207_v50, %v5169_v39  ;;  %v649_v56 = vand.u32 4294901760, %v648_v27  ;;  %v7291_v50 = vand.u32 4294901760, %v5158_v59 }
  0xa7   :  { %7281 = vst [vmem:[#allocation177_spill] sm:$0xff] %v5182_v20  ;;  %1417 = vmatprep.mubr.f32.mxu1 %v5040_v25  ;;  %1656 = vmatpush1.msra.mxu0 %v7283_v2  ;;  %7287 = vst [vmem:[#allocation180_spill] sm:$0xff] %v5193_v6  ;;  %v664_v31 = vsub.f32 %v5149_v52, %v7288_v41  ;;  %v5200_v2 = vand.u32 4294901760, %v212_v23  ;;  %v211_v41 = vld [vmem:[#allocation3 + $0x120] sm:$0xff]  ;;  %v7293_v52 = vld [vmem:[#allocation54_spill] sm:$0xff] }
  0xa8   :  { %1659 = vmatprep.subr.mxu0 %v7284_v0  ;;  %2147 = vmatprep.subr.mxu1 %v7285_v33  ;;  %7286 = vst [vmem:[#allocation179_spill] sm:$0xff] %v5191_v44  ;;  %v659_v33 = vand.u32 4294901760, %v658_v43  ;;  %v674_v0 = vsub.f32 %v5158_v59, %v7291_v50  ;;  %v214_v25 = vld [vmem:[#allocation3 + $0x138] sm:$0xff]  ;;  %v7298_v59 = vld [vmem:[#allocation41_spill] sm:$0xff] }
  0xa9   :  { %634 = vmatmul.mubr.f32.gmra.mxu0 %v633_v63  ;;  %2149 = vmatpush1.msra.mxu1 %v7289_v61  ;;  %7290 = vst [vmem:[#allocation181_spill] sm:$0xff] %v5200_v2  ;;  %v5208_v63 = vsub.f32 %v210_v7, %v5184_v36  ;;  %v7294_v61 = vld [vmem:[#allocation56_spill] sm:$0xff]  ;;  %v665_v50 = vand.u32 4294901760, %v664_v31  ;;  %v7297_v7 = vand.u32 4294901760, %v5177_v34 }
  0xaa   :  { %644 = vmatprep.mubr.f32.mxu0 %v643_v62  ;;  %1419 = vmatmul.mubr.f32.gmra.mxu1 %v5055_v18  ;;  %v7295_v62 = vld [vmem:[#allocation39_spill] sm:$0xff]  ;;  %v5216_v18 = vsub.f32 %v209_v53, %v5193_v6  ;;  %v675_v43 = vand.u32 4294901760, %v674_v0  ;;  %v7301_v53 = vand.u32 4294901760, %v5182_v20 }
  0xab   :  { %7292 = vst [vmem:[#allocation182_spill] sm:$0xff] %v5208_v63  ;;  %1425 = vmatprep.mubr.f32.mxu1 %v5064_v5  ;;  %1662 = vmatpush1.msra.mxu0 %v7293_v52  ;;  %v680_v27 = vsub.f32 %v5177_v34, %v7297_v7  ;;  %v5223_v5 = vsub.f32 %v212_v23, %v5200_v2  ;;  %v5225_v52 = vand.u32 4294901760, %v211_v41  ;;  %v213_v7 = vld [vmem:[#allocation3 + $0x130] sm:$0xff]  ;;  %v216_v23 = vld [vmem:[#allocation3 + $0x148] sm:$0xff] }
  0xac   :  { %1665 = vmatprep.subr.mxu0 %v7294_v61  ;;  %2151 = vmatprep.subr.mxu1 %v7295_v62  ;;  %7296 = vst [vmem:[#allocation183_spill] sm:$0xff] %v5216_v18  ;;  %v5232_v62 = vand.u32 4294901760, %v214_v25  ;;  %v7303_v34 = vld [vmem:[#allocation58_spill] sm:$0xff]  ;;  %v218_v61 = vld [vmem:[#allocation3 + $0x158] sm:$0xff] }
  0xad   :  { %650 = vmatmul.mubr.f32.gmra.mxu0 %v649_v56  ;;  %2153 = vmatpush1.msra.mxu1 %v7298_v59  ;;  %7299 = vst [vmem:[#allocation184_spill] sm:$0xff] %v5223_v5  ;;  %7300 = vst [vmem:[#allocation185_spill] sm:$0xff] %v5225_v52  ;;  %v690_v56 = vsub.f32 %v5182_v20, %v7301_v53  ;;  %v7304_v59 = vld [vmem:[#allocation60_spill] sm:$0xff]  ;;  %v681_v31 = vand.u32 4294901760, %v680_v27  ;;  %v7307_v20 = vld [vmem:[#allocation45_spill] sm:$0xff] }
  0xae   :  { %660 = vmatprep.mubr.f32.mxu0 %v659_v33  ;;  %1427 = vmatmul.mubr.f32.gmra.mxu1 %v5073_v38  ;;  %7302 = vst [vmem:[#allocation186_spill] sm:$0xff] %v5232_v62  ;;  %v7305_v33 = vand.u32 4294901760, %v5191_v44  ;;  %v7306_v38 = vld [vmem:[#allocation43_spill] sm:$0xff]  ;;  %v5254_v27 = vsub.f32 %v214_v25, %v5232_v62 }
  0xaf   :  { %1433 = vmatprep.mubr.f32.mxu1 %v5088_v12  ;;  %1668 = vmatpush1.msra.mxu0 %v7303_v34  ;;  %v5245_v12 = vsub.f32 %v211_v41, %v5225_v52  ;;  %v5247_v34 = vand.u32 4294901760, %v213_v7  ;;  %v7313_v41 = vld [vmem:[#allocation62_spill] sm:$0xff] }
  0xb0   :  { %1671 = vmatprep.subr.mxu0 %v7304_v59  ;;  %v696_v0 = vsub.f32 %v5191_v44, %v7305_v33  ;;  %2155 = vmatprep.subr.mxu1 %v7306_v38  ;;  %v215_v59 = vld [vmem:[#allocation3 + $0x140] sm:$0xff]  ;;  %v691_v33 = vand.u32 4294901760, %v690_v56  ;;  %v7310_v44 = vand.u32 4294901760, %v5208_v63  ;;  %7311 = vst [vmem:[#allocation189_spill] sm:$0xff] %v5254_v27 }
  0xb1   :  { %666 = vmatmul.mubr.f32.gmra.mxu0 %v665_v50  ;;  %2157 = vmatpush1.msra.mxu1 %v7307_v20  ;;  %7308 = vst [vmem:[#allocation187_spill] sm:$0xff] %v5245_v12  ;;  %7309 = vst [vmem:[#allocation188_spill] sm:$0xff] %v5247_v34  ;;  %v5256_v50 = vand.u32 4294901760, %v216_v23  ;;  %v7314_v20 = vld [vmem:[#allocation64_spill] sm:$0xff]  ;;  %v5265_v38 = vand.u32 4294901760, %v215_v59 }
  0xb2   :  { %676 = vmatprep.mubr.f32.mxu0 %v675_v43  ;;  %1435 = vmatmul.mubr.f32.gmra.mxu1 %v5097_v10  ;;  %v706_v53 = vsub.f32 %v5208_v63, %v7310_v44  ;;  %v7315_v43 = vand.u32 4294901760, %v5216_v18  ;;  %v7316_v10 = vld [vmem:[#allocation47_spill] sm:$0xff]  ;;  %v697_v25 = vand.u32 4294901760, %v696_v0  ;;  %v7318_v44 = vld [vmem:[#allocation49_spill] sm:$0xff]  ;;  %v7319_v63 = vand.u32 4294901760, %v5223_v5 }
  0xb3   :  { %7312 = vst [vmem:[#allocation190_spill] sm:$0xff] %v5256_v50  ;;  %1441 = vmatprep.mubr.f32.mxu1 %v5104_v13  ;;  %1674 = vmatpush1.msra.mxu0 %v7313_v41  ;;  %7317 = vst [vmem:[#allocation47_spill] sm:$0xff] %v5265_v38  ;;  %v5280_v0 = vand.u32 4294901760, %v218_v61  ;;  %v7324_v41 = vld [vmem:[#allocation68_spill] sm:$0xff] }
  0xb4   :  { %1677 = vmatprep.subr.mxu0 %v7314_v20  ;;  %v712_v56 = vsub.f32 %v5216_v18, %v7315_v43  ;;  %2159 = vmatprep.subr.mxu1 %v7316_v10  ;;  %v722_v13 = vsub.f32 %v5223_v5, %v7319_v63  ;;  %v5273_v20 = vsub.f32 %v213_v7, %v5247_v34  ;;  %v707_v43 = vand.u32 4294901760, %v706_v53  ;;  %v7323_v63 = vld [vmem:[#allocation66_spill] sm:$0xff]  ;;  %v7325_v7 = vld [vmem:[#allocation51_spill] sm:$0xff]  ;;  %v7329_v5 = vld [vmem:[#allocation53_spill] sm:$0xff] }
  0xb5   :  { %682 = vmatmul.mubr.f32.gmra.mxu0 %v681_v31  ;;  %2161 = vmatpush1.msra.mxu1 %v7318_v44  ;;  %v5278_v31 = vsub.f32 %v216_v23, %v5256_v50  ;;  %7322 = vst [vmem:[#allocation193_spill] sm:$0xff] %v5280_v0  ;;  %v220_v44 = vld [vmem:[#allocation3 + $0x168] sm:$0xff]  ;;  %v5289_v53 = vand.u32 4294901760, %v217_v49  ;;  %v7328_v23 = vand.u32 4294901760, %v5245_v12 }
  0xb6   :  { %7320 = vst [vmem:[#allocation191_spill] sm:$0xff] %v5273_v20  ;;  %692 = vmatprep.mubr.f32.mxu0 %v691_v33  ;;  %1443 = vmatmul.mubr.f32.gmra.mxu1 %v5129_v1  ;;  %v5287_v33 = vsub.f32 %v215_v59, %v5265_v38  ;;  %v713_v18 = vand.u32 4294901760, %v712_v56  ;;  %v7331_v59 = vand.u32 4294901760, %v5254_v27 }
  0xb7   :  { %7321 = vst [vmem:[#allocation192_spill] sm:$0xff] %v5278_v31  ;;  %1449 = vmatprep.mubr.f32.mxu1 %v5136_v60  ;;  %1680 = vmatpush1.msra.mxu0 %v7323_v63  ;;  %7327 = vst [vmem:[#allocation195_spill] sm:$0xff] %v5289_v53  ;;  %v728_v1 = vsub.f32 %v5245_v12, %v7328_v23  ;;  %v5296_v63 = vand.u32 4294901760, %v220_v44  ;;  %v219_v23 = vld [vmem:[#allocation3 + $0x160] sm:$0xff]  ;;  %v7333_v12 = vld [vmem:[#allocation70_spill] sm:$0xff] }
  0xb8   :  { %1683 = vmatprep.subr.mxu0 %v7324_v41  ;;  %2163 = vmatprep.subr.mxu1 %v7325_v7  ;;  %7326 = vst [vmem:[#allocation194_spill] sm:$0xff] %v5287_v33  ;;  %v723_v7 = vand.u32 4294901760, %v722_v13  ;;  %v738_v41 = vsub.f32 %v5254_v27, %v7331_v59  ;;  %v222_v60 = vld [vmem:[#allocation3 + $0x178] sm:$0xff]  ;;  %v7338_v27 = vld [vmem:[#allocation57_spill] sm:$0xff] }
  0xb9   :  { %698 = vmatmul.mubr.f32.gmra.mxu0 %v697_v25  ;;  %2165 = vmatpush2.msra.mxu1 %v7329_v5  ;;  %7330 = vst [vmem:[#allocation196_spill] sm:$0xff] %v5296_v63  ;;  %v5304_v25 = vsub.f32 %v218_v61, %v5280_v0  ;;  %v7334_v5 = vld [vmem:[#allocation72_spill] sm:$0xff]  ;;  %v729_v59 = vand.u32 4294901760, %v728_v1  ;;  %v7337_v61 = vand.u32 4294901760, %v5273_v20 }
  0xba   :  { %708 = vmatprep.mubr.f32.mxu0 %v707_v43  ;;  %1451 = vmatmul.mubr.f32.gmra.mxu1 %v5151_v54  ;;  %v7335_v43 = vld [vmem:[#allocation55_spill] sm:$0xff]  ;;  %v5312_v54 = vsub.f32 %v217_v49, %v5289_v53  ;;  %v739_v13 = vand.u32 4294901760, %v738_v41  ;;  %v7341_v49 = vand.u32 4294901760, %v5278_v31 }
  0xbb   :  { %7332 = vst [vmem:[#allocation197_spill] sm:$0xff] %v5304_v25  ;;  %1457 = vmatprep.mubr.f32.mxu1 %v5160_v45  ;;  %1686 = vmatpush2.msra.mxu0 %v7333_v12  ;;  %v744_v56 = vsub.f32 %v5273_v20, %v7337_v61  ;;  %v5319_v45 = vsub.f32 %v220_v44, %v5296_v63  ;;  %v5321_v12 = vand.u32 4294901760, %v219_v23  ;;  %v221_v61 = vld [vmem:[#allocation3 + $0x170] sm:$0xff]  ;;  %v224_v44 = vld [vmem:[#allocation3 + $0x188] sm:$0xff] }
  0xbc   :  { %1689 = vmatprep.subr.mxu0 %v7334_v5  ;;  %2167 = vmatprep.subr.mxu1 %v7335_v43  ;;  %7336 = vst [vmem:[#allocation198_spill] sm:$0xff] %v5312_v54  ;;  %v5328_v43 = vand.u32 4294901760, %v222_v60  ;;  %v7343_v20 = vld [vmem:[#allocation74_spill] sm:$0xff]  ;;  %v226_v5 = vld [vmem:[#allocation3 + $0x198] sm:$0xff] }
  0xbd   :  { %714 = vmatmul.mubr.f32.gmra.mxu0 %v713_v18  ;;  %2169 = vmatpush2.msra.mxu1 %v7338_v27  ;;  %7339 = vst [vmem:[#allocation199_spill] sm:$0xff] %v5319_v45  ;;  %7340 = vst [vmem:[#allocation200_spill] sm:$0xff] %v5321_v12  ;;  %v754_v18 = vsub.f32 %v5278_v31, %v7341_v49  ;;  %v7344_v27 = vld [vmem:[#allocation76_spill] sm:$0xff]  ;;  %v745_v1 = vand.u32 4294901760, %v744_v56  ;;  %v7347_v31 = vld [vmem:[#allocation61_spill] sm:$0xff]  ;;  %v5352_v56 = vand.u32 4294901760, %v224_v44 }
  0xbe   :  { %724 = vmatprep.mubr.f32.mxu0 %v723_v7  ;;  %1459 = vmatmul.mubr.f32.gmra.mxu1 %v5169_v39  ;;  %7342 = vst [vmem:[#allocation201_spill] sm:$0xff] %v5328_v43  ;;  %v7345_v7 = vand.u32 4294901760, %v5287_v33  ;;  %v7346_v39 = vld [vmem:[#allocation59_spill] sm:$0xff]  ;;  %v223_v49 = vld [vmem:[#allocation3 + $0x180] sm:$0xff] }
  0xbf   :  { %1465 = vmatprep.mubr.f32.mxu1 %v5184_v36  ;;  %1692 = vmatpush2.msra.mxu0 %v7343_v20  ;;  %v5341_v36 = vsub.f32 %v219_v23, %v5321_v12  ;;  %v5343_v20 = vand.u32 4294901760, %v221_v61  ;;  %7352 = vst [vmem:[#allocation205_spill] sm:$0xff] %v5352_v56  ;;  %v7353_v23 = vld [vmem:[#allocation78_spill] sm:$0xff] }
  0xc0   :  { %1695 = vmatprep.subr.mxu0 %v7344_v27  ;;  %v760_v41 = vsub.f32 %v5287_v33, %v7345_v7  ;;  %2171 = vmatprep.subr.mxu1 %v7346_v39  ;;  %v755_v27 = vand.u32 4294901760, %v754_v18  ;;  %v7350_v7 = vand.u32 4294901760, %v5304_v25  ;;  %v7355_v18 = vand.u32 4294901760, %v5312_v54  ;;  %v7356_v39 = vld [vmem:[#allocation63_spill] sm:$0xff] }
  0xc1   :  { %730 = vmatmul.mubr.f32.gmra.mxu0 %v729_v59  ;;  %2173 = vmatpush2.msra.mxu1 %v7347_v31  ;;  %7348 = vst [vmem:[#allocation202_spill] sm:$0xff] %v5341_v36  ;;  %7349 = vst [vmem:[#allocation203_spill] sm:$0xff] %v5343_v20  ;;  %v5350_v59 = vsub.f32 %v222_v60, %v5328_v43  ;;  %v7357_v60 = vld [vmem:[#allocation65_spill] sm:$0xff] }
  0xc2   :  { %740 = vmatprep.mubr.f32.mxu0 %v739_v13  ;;  %1467 = vmatmul.mubr.f32.gmra.mxu1 %v5193_v6  ;;  %v770_v33 = vsub.f32 %v5304_v25, %v7350_v7  ;;  %v761_v31 = vand.u32 4294901760, %v760_v41  ;;  %v7354_v13 = vld [vmem:[#allocation80_spill] sm:$0xff]  ;;  %v776_v6 = vsub.f32 %v5312_v54, %v7355_v18  ;;  %v7358_v7 = vand.u32 4294901760, %v5319_v45 }
  0xc3   :  { %7351 = vst [vmem:[#allocation204_spill] sm:$0xff] %v5350_v59  ;;  %1473 = vmatprep.mubr.f32.mxu1 %v5200_v2  ;;  %1698 = vmatpush2.msra.mxu0 %v7353_v23  ;;  %v5367_v23 = vsub.f32 %v221_v61, %v5343_v20  ;;  %v5369_v41 = vand.u32 4294901760, %v223_v49  ;;  %v5374_v54 = vsub.f32 %v224_v44, %v5352_v56  ;;  %v228_v61 = vld [vmem:[#allocation3 + $0x1a8] sm:$0xff] }
  0xc4   :  { %1701 = vmatprep.subr.mxu0 %v7354_v13  ;;  %2175 = vmatprep.subr.mxu1 %v7356_v39  ;;  %v786_v25 = vsub.f32 %v5319_v45, %v7358_v7  ;;  %v225_v13 = vld [vmem:[#allocation3 + $0x190] sm:$0xff]  ;;  %v771_v18 = vand.u32 4294901760, %v770_v33  ;;  %v777_v2 = vand.u32 4294901760, %v776_v6  ;;  %v7364_v45 = vld [vmem:[#allocation84_spill] sm:$0xff]  ;;  %v7365_v39 = vld [vmem:[#allocation67_spill] sm:$0xff] }
  0xc5   :  { %746 = vmatmul.mubr.f32.gmra.mxu0 %v745_v1  ;;  %2177 = vmatpush2.msra.mxu1 %v7357_v60  ;;  %7359 = vst [vmem:[#allocation206_spill] sm:$0xff] %v5367_v23  ;;  %7360 = vst [vmem:[#allocation207_spill] sm:$0xff] %v5369_v41  ;;  %v5376_v60 = vand.u32 4294901760, %v226_v5  ;;  %v7363_v7 = vld [vmem:[#allocation82_spill] sm:$0xff]  ;;  %v7367_v1 = vand.u32 4294901760, %v5341_v36  ;;  %v227_v6 = vld [vmem:[#allocation3 + $0x1a0] sm:$0xff] }
  0xc6   :  { %756 = vmatprep.mubr.f32.mxu0 %v755_v27  ;;  %1475 = vmatmul.mubr.f32.gmra.mxu1 %v5225_v52  ;;  %7361 = vst [vmem:[#allocation208_spill] sm:$0xff] %v5374_v54  ;;  %v5382_v27 = vand.u32 4294901760, %v225_v13  ;;  %v787_v33 = vand.u32 4294901760, %v786_v25  ;;  %v7368_v52 = vld [vmem:[#allocation69_spill] sm:$0xff] }
  0xc7   :  { %7362 = vst [vmem:[#allocation209_spill] sm:$0xff] %v5376_v60  ;;  %1481 = vmatprep.mubr.f32.mxu1 %v5232_v62  ;;  %1704 = vmatpush2.msra.mxu0 %v7363_v7  ;;  %v792_v44 = vsub.f32 %v5341_v36, %v7367_v1  ;;  %v5390_v7 = vsub.f32 %v223_v49, %v5369_v41  ;;  %v5400_v1 = vand.u32 4294901760, %v228_v61  ;;  %v230_v36 = vld [vmem:[#allocation3 + $0x1b8] sm:$0xff]  ;;  %v7373_v49 = vld [vmem:[#allocation86_spill] sm:$0xff]  ;;  %v7374_v62 = vld [vmem:[#allocation88_spill] sm:$0xff] }
  0xc8   :  { %1707 = vmatprep.subr.mxu0 %v7364_v45  ;;  %2179 = vmatprep.subr.mxu1 %v7365_v39  ;;  %7366 = vst [vmem:[#allocation210_spill] sm:$0xff] %v5382_v27  ;;  %v7370_v39 = vand.u32 4294901760, %v5350_v59  ;;  %v5398_v45 = vsub.f32 %v226_v5, %v5376_v60  ;;  %v7378_v5 = vand.u32 4294901760, %v5367_v23 }
  0xc9   :  { %762 = vmatmul.mubr.f32.gmra.mxu0 %v761_v31  ;;  %2181 = vmatpush2.msra.mxu1 %v7368_v52  ;;  %7369 = vst [vmem:[#allocation211_spill] sm:$0xff] %v5390_v7  ;;  %7372 = vst [vmem:[#allocation213_spill] sm:$0xff] %v5400_v1  ;;  %v793_v25 = vand.u32 4294901760, %v792_v44  ;;  %v7379_v52 = vld [vmem:[#allocation73_spill] sm:$0xff]  ;;  %v5424_v44 = vsub.f32 %v228_v61, %v5400_v1  ;;  %v7387_v61 = vand.u32 4294901760, %v5390_v7 }
  0xca   :  { %772 = vmatprep.mubr.f32.mxu0 %v771_v18  ;;  %1483 = vmatmul.mubr.f32.gmra.mxu1 %v5247_v34  ;;  %v802_v31 = vsub.f32 %v5350_v59, %v7370_v39  ;;  %7371 = vst [vmem:[#allocation212_spill] sm:$0xff] %v5398_v45  ;;  %v7375_v18 = vld [vmem:[#allocation71_spill] sm:$0xff]  ;;  %v5407_v34 = vsub.f32 %v225_v13, %v5382_v27  ;;  %v5409_v39 = vand.u32 4294901760, %v227_v6  ;;  %v7381_v13 = vand.u32 4294901760, %v5374_v54 }
  0xcb   :  { %1489 = vmatprep.mubr.f32.mxu1 %v5256_v50  ;;  %1710 = vmatpush2.msra.mxu0 %v7373_v49  ;;  %v808_v59 = vsub.f32 %v5367_v23, %v7378_v5  ;;  %v5416_v49 = vand.u32 4294901760, %v230_v36  ;;  %7382 = vst [vmem:[#allocation217_spill] sm:$0xff] %v5424_v44  ;;  %v229_v5 = vld [vmem:[#allocation3 + $0x1b0] sm:$0xff]  ;;  %v232_v50 = vld [vmem:[#allocation3 + $0x1c8] sm:$0xff] }
  0xcc   :  { %1713 = vmatprep.subr.mxu0 %v7374_v62  ;;  %2183 = vmatprep.subr.mxu1 %v7375_v18  ;;  %7376 = vst [vmem:[#allocation214_spill] sm:$0xff] %v5407_v34  ;;  %7377 = vst [vmem:[#allocation215_spill] sm:$0xff] %v5409_v39  ;;  %v803_v18 = vand.u32 4294901760, %v802_v31  ;;  %v818_v62 = vsub.f32 %v5374_v54, %v7381_v13  ;;  %v7383_v23 = vld [vmem:[#allocation90_spill] sm:$0xff]  ;;  %v7388_v54 = vld [vmem:[#allocation77_spill] sm:$0xff] }
  0xcd   :  { %778 = vmatmul.mubr.f32.gmra.mxu0 %v777_v2  ;;  %2185 = vmatpush2.msra.mxu1 %v7379_v52  ;;  %7380 = vst [vmem:[#allocation216_spill] sm:$0xff] %v5416_v49  ;;  %v7384_v52 = vld [vmem:[#allocation92_spill] sm:$0xff]  ;;  %v809_v13 = vand.u32 4294901760, %v808_v59  ;;  %v824_v2 = vsub.f32 %v5390_v7, %v7387_v61  ;;  %v7393_v7 = vld [vmem:[#allocation94_spill] sm:$0xff] }
  0xce   :  { %788 = vmatprep.mubr.f32.mxu0 %v787_v33  ;;  %1491 = vmatmul.mubr.f32.gmra.mxu1 %v5265_v38  ;;  %v7385_v33 = vld [vmem:[#allocation75_spill] sm:$0xff]  ;;  %v5432_v38 = vsub.f32 %v227_v6, %v5409_v39  ;;  %v819_v31 = vand.u32 4294901760, %v818_v62  ;;  %v7391_v6 = vand.u32 4294901760, %v5398_v45  ;;  %v231_v61 = vld [vmem:[#allocation3 + $0x1c0] sm:$0xff] }
  0xcf   :  { %1497 = vmatprep.mubr.f32.mxu1 %v5280_v0  ;;  %1716 = vmatpush2.msra.mxu0 %v7383_v23  ;;  %v5439_v0 = vsub.f32 %v230_v36, %v5416_v49  ;;  %v5441_v23 = vand.u32 4294901760, %v229_v5  ;;  %v234_v36 = vld [vmem:[#allocation3 + $0x1d8] sm:$0xff]  ;;  %v825_v59 = vand.u32 4294901760, %v824_v2 }
  0xd0   :  { %1719 = vmatprep.subr.mxu0 %v7384_v52  ;;  %2187 = vmatprep.subr.mxu1 %v7385_v33  ;;  %7386 = vst [vmem:[#allocation218_spill] sm:$0xff] %v5432_v38  ;;  %v5448_v33 = vand.u32 4294901760, %v232_v50  ;;  %v236_v52 = vld [vmem:[#allocation3 + $0x1e8] sm:$0xff] }
  0xd1   :  { %794 = vmatmul.mubr.f32.gmra.mxu0 %v793_v25  ;;  %2189 = vmatpush2.msra.mxu1 %v7388_v54  ;;  %7389 = vst [vmem:[#allocation219_spill] sm:$0xff] %v5439_v0  ;;  %7390 = vst [vmem:[#allocation220_spill] sm:$0xff] %v5441_v23  ;;  %v834_v25 = vsub.f32 %v5398_v45, %v7391_v6  ;;  %v7394_v54 = vld [vmem:[#allocation96_spill] sm:$0xff]  ;;  %v7397_v45 = vld [vmem:[#allocation81_spill] sm:$0xff] }
  0xd2   :  { %804 = vmatprep.mubr.f32.mxu0 %v803_v18  ;;  %1499 = vmatmul.mubr.f32.gmra.mxu1 %v5289_v53  ;;  %7392 = vst [vmem:[#allocation221_spill] sm:$0xff] %v5448_v33  ;;  %v7395_v18 = vand.u32 4294901760, %v5407_v34  ;;  %v7396_v53 = vld [vmem:[#allocation79_spill] sm:$0xff]  ;;  %v5470_v2 = vsub.f32 %v232_v50, %v5448_v33  ;;  %v7408_v50 = vld [vmem:[#allocation85_spill] sm:$0xff] }
  0xd3   :  { %1505 = vmatprep.mubr.f32.mxu1 %v5296_v63  ;;  %1722 = vmatpush2.msra.mxu0 %v7393_v7  ;;  %v5461_v63 = vsub.f32 %v229_v5, %v5441_v23  ;;  %v5463_v7 = vand.u32 4294901760, %v231_v61  ;;  %v7403_v5 = vld [vmem:[#allocation97_spill] sm:$0xff] }
  0xd4   :  { %1725 = vmatprep.subr.mxu0 %v7394_v54  ;;  %v840_v62 = vsub.f32 %v5407_v34, %v7395_v18  ;;  %2191 = vmatprep.subr.mxu1 %v7396_v53  ;;  %v233_v54 = vld [vmem:[#allocation3 + $0x1d0] sm:$0xff]  ;;  %v835_v18 = vand.u32 4294901760, %v834_v25  ;;  %v7400_v34 = vand.u32 4294901760, %v5424_v44  ;;  %7401 = vst [vmem:[#allocation224_spill] sm:$0xff] %v5470_v2 }
  0xd5   :  { %810 = vmatmul.mubr.f32.gmra.mxu0 %v809_v13  ;;  %2193 = vmatpush2.msra.mxu1 %v7397_v45  ;;  %7398 = vst [vmem:[#allocation222_spill] sm:$0xff] %v5461_v63  ;;  %7399 = vst [vmem:[#allocation223_spill] sm:$0xff] %v5463_v7  ;;  %v5472_v13 = vand.u32 4294901760, %v234_v36  ;;  %v7404_v45 = vld [vmem:[#allocation99_spill] sm:$0xff]  ;;  %v5481_v53 = vand.u32 4294901760, %v233_v54 }
  0xd6   :  { %820 = vmatprep.mubr.f32.mxu0 %v819_v31  ;;  %1507 = vmatmul.mubr.f32.gmra.mxu1 %v5321_v12  ;;  %v850_v6 = vsub.f32 %v5424_v44, %v7400_v34  ;;  %v7405_v31 = vand.u32 4294901760, %v5432_v38  ;;  %v7406_v12 = vld [vmem:[#allocation83_spill] sm:$0xff]  ;;  %v841_v34 = vand.u32 4294901760, %v840_v62  ;;  %v7409_v44 = vand.u32 4294901760, %v5439_v0 }
  0xd7   :  { %7402 = vst [vmem:[#allocation225_spill] sm:$0xff] %v5472_v13  ;;  %1513 = vmatprep.mubr.f32.mxu1 %v5328_v43  ;;  %1728 = vmatpush2.msra.mxu0 %v7403_v5  ;;  %7407 = vst [vmem:[#allocation226_spill] sm:$0xff] %v5481_v53  ;;  %v5496_v62 = vand.u32 4294901760, %v236_v52  ;;  %v238_v5 = vld [vmem:[#allocation3 + $0x1f8] sm:$0xff] }
  0xd8   :  { %1731 = vmatprep.subr.mxu0 %v7404_v45  ;;  %v856_v25 = vsub.f32 %v5432_v38, %v7405_v31  ;;  %2195 = vmatprep.subr.mxu1 %v7406_v12  ;;  %v866_v43 = vsub.f32 %v5439_v0, %v7409_v44  ;;  %v5489_v45 = vsub.f32 %v231_v61, %v5463_v7  ;;  %v851_v31 = vand.u32 4294901760, %v850_v6  ;;  %v7411_v44 = vld [vmem:[#allocation101_spill] sm:$0xff]  ;;  %v7412_v61 = vld [vmem:[#allocation103_spill] sm:$0xff] }
  0xd9   :  { %826 = vmatmul.mubr.f32.gmra.mxu0 %v825_v59  ;;  %2197 = vmatpush2.msra.mxu1 %v7408_v50  ;;  %v5494_v59 = vsub.f32 %v234_v36, %v5472_v13  ;;  %7410 = vst [vmem:[#allocation227_spill] sm:$0xff] %v5496_v62  ;;  %v235_v50 = vld [vmem:[#allocation3 + $0x1e0] sm:$0xff]  ;;  %v5503_v6 = vsub.f32 %v233_v54, %v5481_v53  ;;  %v7414_v36 = vand.u32 4294901760, %v5461_v63  ;;  %v7415_v12 = vld [vmem:[#allocation89_spill] sm:$0xff] }
  0xda   :  { %836 = vmatprep.mubr.f32.mxu0 %v835_v18  ;;  %1515 = vmatmul.mubr.f32.gmra.mxu1 %v5343_v20  ;;  %v857_v0 = vand.u32 4294901760, %v856_v25  ;;  %v7413_v18 = vld [vmem:[#allocation87_spill] sm:$0xff]  ;;  %v867_v38 = vand.u32 4294901760, %v866_v43  ;;  %v7417_v25 = vand.u32 4294901760, %v5470_v2  ;;  %v5518_v43 = vsub.f32 %v236_v52, %v5496_v62 }
  0xdb   :  { %1521 = vmatprep.mubr.f32.mxu1 %v5352_v56  ;;  %1734 = vmatpush2.msra.mxu0 %v7411_v44  ;;  %v872_v20 = vsub.f32 %v5461_v63, %v7414_v36  ;;  %v5510_v44 = vand.u32 4294901760, %v235_v50  ;;  %v237_v36 = vld [vmem:[#allocation3 + $0x1f0] sm:$0xff]  ;;  %v7419_v56 = vld [vmem:[#allocation105_spill] sm:$0xff] }
  0xdc   :  { %1737 = vmatprep.subr.mxu0 %v7412_v61  ;;  %2199 = vmatprep.subr.mxu1 %v7413_v18  ;;  %v882_v54 = vsub.f32 %v5470_v2, %v7417_v25  ;;  %v5520_v18 = vand.u32 4294901760, %v238_v5  ;;  %v7420_v63 = vld [vmem:[#allocation106_spill] sm:$0xff]  ;;  %v7423_v2 = vld [vmem:[#allocation93_spill] sm:$0xff] }
  0xdd   :  { %842 = vmatmul.mubr.f32.gmra.mxu0 %v841_v34  ;;  %2201 = vmatpush2.msra.mxu1 %v7415_v12  ;;  %7416 = vst [vmem:[#allocation103_spill] sm:$0xff] %v5510_v44  ;;  %v873_v25 = vand.u32 4294901760, %v872_v20  ;;  %v7422_v34 = vand.u32 4294901760, %v5489_v45  ;;  %v5532_v12 = vsub.f32 %v235_v50, %v5510_v44  ;;  %v7426_v50 = vld [vmem:[#allocation95_spill] sm:$0xff] }
  0xde   :  { %852 = vmatprep.mubr.f32.mxu0 %v851_v31  ;;  %1523 = vmatmul.mubr.f32.gmra.mxu1 %v5369_v41  ;;  %7418 = vst [vmem:[#allocation228_spill] sm:$0xff] %v5520_v18  ;;  %v7421_v31 = vld [vmem:[#allocation91_spill] sm:$0xff]  ;;  %v5542_v41 = vsub.f32 %v238_v5, %v5520_v18 }
  0xdf   :  { %1529 = vmatprep.mubr.f32.mxu1 %v5376_v60  ;;  %1740 = vmatpush2.msra.mxu0 %v7419_v56  ;;  %v888_v52 = vsub.f32 %v5489_v45, %v7422_v34  ;;  %v5534_v60 = vand.u32 4294901760, %v237_v36 }
  0xe0   :  { %1743 = vmatprep.subr.mxu0 %v7420_v63  ;;  %2203 = vmatprep.subr.mxu1 %v7421_v31  ;;  %v883_v63 = vand.u32 4294901760, %v882_v54  ;;  %v7425_v31 = vand.u32 4294901760, %v5494_v59  ;;  %v7427_v54 = vand.u32 4294901760, %v5503_v6 }
  0xe1   :  { %858 = vmatmul.mubr.f32.gmra.mxu0 %v857_v0  ;;  %2205 = vmatpush2.msra.mxu1 %v7423_v2  ;;  %7424 = vst [vmem:[#allocation105_spill] sm:$0xff] %v5534_v60  ;;  %v5554_v5 = vsub.f32 %v237_v36, %v5534_v60 }
  0xe2   :  { %868 = vmatprep.mubr.f32.mxu0 %v867_v38  ;;  %1531 = vmatmul.mubr.f32.gmra.mxu1 %v5382_v27  ;;  %v898_v0 = vsub.f32 %v5494_v59, %v7425_v31  ;;  %v889_v38 = vand.u32 4294901760, %v888_v52  ;;  %v904_v34 = vsub.f32 %v5503_v6, %v7427_v54  ;;  %v7023_v31 = vand.u32 4294901760, %v5532_v12  ;;  %v7429_v54 = vld [vmem:[#allocation98_spill] sm:$0xff] }
  0xe3   :  { %1537 = vmatprep.mubr.f32.mxu1 %v5400_v1  ;;  %1746 = vmatpush2.msra.mxu0 %v4723_v58  ;;  %v7428_v1 = vand.u32 4294901760, %v5518_v43  ;;  %v7671_v27 = vld [vmem:[#allocation214_spill] sm:$0xff] }
  0xe4   :  { %1749 = vmatprep.subr.mxu0 %v4741_v55  ;;  %2207 = vmatprep.subr.mxu1 %v7426_v50  ;;  %v899_v20 = vand.u32 4294901760, %v898_v0  ;;  %v905_v36 = vand.u32 4294901760, %v904_v34  ;;  %v7430_v0 = vld [vmem:[#allocation100_spill] sm:$0xff]  ;;  %v7433_v34 = vld [vmem:[#allocation102_spill] sm:$0xff] }
  0xe5   :  { %874 = vmatmul.mubr.f32.gmra.mxu0 %v873_v25  ;;  %2209 = vmatpush2.msra.mxu1 %v4640_v21  ;;  %v914_v25 = vsub.f32 %v5518_v43, %v7428_v1  ;;  %v7026_v1 = vand.u32 4294901760, %v5554_v5 }
  0xe6   :  { %884 = vmatprep.mubr.f32.mxu0 %v883_v63  ;;  %1539 = vmatmul.mubr.f32.gmra.mxu1 %v5409_v39  ;;  %v920_v63 = vsub.f32 %v5532_v12, %v7023_v31 }
  0xe7   :  { %1545 = vmatprep.mubr.f32.mxu1 %v5416_v49  ;;  %1752 = vmatpush2.msra.mxu0 %v4758_v51  ;;  %v915_v52 = vand.u32 4294901760, %v914_v25  ;;  %v7431_v49 = vand.u32 4294901760, %v5542_v41 }
  0xe8   :  { %1755 = vmatprep.subr.mxu0 %v4768_v28  ;;  %2211 = vmatprep.subr.mxu1 %v7429_v54  ;;  %v921_v31 = vand.u32 4294901760, %v920_v63  ;;  %v7438_v63 = vld [vmem:[#allocation120_spill] sm:$0xff] }
  0xe9   :  { %890 = vmatmul.mubr.f32.gmra.mxu0 %v889_v38  ;;  %2213 = vmatpush2.msra.mxu1 %v7430_v0  ;;  %v930_v39 = vsub.f32 %v5542_v41, %v7431_v49  ;;  %v7432_v38 = vld [vmem:[#allocation112_spill] sm:$0xff] }
  0xea   :  { %900 = vmatprep.mubr.f32.mxu0 %v899_v20  ;;  %1547 = vmatmul.mubr.f32.gmra.mxu1 %v5441_v23  ;;  %v936_v20 = vsub.f32 %v5554_v5, %v7026_v1  ;;  %v7434_v23 = vld [vmem:[#allocation104_spill] sm:$0xff]  ;;  %v7442_v1 = vld [vmem:[#allocation113_spill] sm:$0xff] }
  0xeb   :  { %1553 = vmatprep.mubr.f32.mxu1 %v5448_v33  ;;  %1758 = vmatpush2.msra.mxu0 %v7432_v38  ;;  %v931_v49 = vand.u32 4294901760, %v930_v39  ;;  %v7435_v39 = vld [vmem:[#allocation118_spill] sm:$0xff]  ;;  %v7453_v33 = vld [vmem:[#allocation121_spill] sm:$0xff] }
  0xec   :  { %1761 = vmatprep.subr.mxu0 %v4786_v19  ;;  %2215 = vmatprep.subr.mxu1 %v7433_v34  ;;  %v937_v25 = vand.u32 4294901760, %v936_v20  ;;  %v7440_v20 = vld [vmem:[#allocation14_spill] sm:$0xff] }
  0xed   :  { %906 = vmatmul.mubr.f32.gmra.mxu0 %v905_v36  ;;  %2217 = vmatpush2.msra.mxu1 %v7434_v23  ;;  %v7437_v36 = vld [vmem:[#allocation108_spill] sm:$0xff] }
  0xee   :  { %916 = vmatprep.mubr.f32.mxu0 %v915_v52  ;;  %1555 = vmatmul.mubr.f32.gmra.mxu1 %v5463_v7  ;;  %v7436_v52 = vld [vmem:[#allocation107_spill] sm:$0xff] }
  0xef   :  { %1561 = vmatprep.mubr.f32.mxu1 %v5472_v13  ;;  %1764 = vmatpush2.msra.mxu0 %v4811_v46  ;;  %v7446_v13 = vld [vmem:[#allocation16_spill] sm:$0xff] }
  0xf0   :  { %1767 = vmatprep.subr.mxu0 %v4825_v26  ;;  %2219 = vmatprep.subr.mxu1 %v4700_v29  ;;  %v7447_v7 = vand.u32 4294901760, %v7446_v13 }
  0xf1   :  { %922 = vmatmul.mubr.f32.gmra.mxu0 %v921_v31  ;;  %2221 = vmatpush2.msra.mxu1 %v4719_v14  ;;  %v7439_v31 = vld [vmem:[#allocation110_spill] sm:$0xff] }
  0xf2   :  { %932 = vmatprep.mubr.f32.mxu0 %v931_v49  ;;  %1563 = vmatmul.mubr.f32.gmra.mxu1 %v5481_v53  ;;  %v7441_v49 = vand.u32 4294901760, %v7440_v20  ;;  %v7449_v20 = vld [vmem:[#allocation17_spill] sm:$0xff] }
  0xf3   :  { %1770 = vmatpush2.msra.mxu0 %v4829_v47  ;;  %1569 = vmatprep.mubr.f32.mxu1 %v5496_v62  ;;  %v7443_v62 = vld [vmem:[#allocation115_spill] sm:$0xff] }
  0xf4   :  { %1773 = vmatprep.subr.mxu0 %v7435_v39  ;;  %2223 = vmatprep.subr.mxu1 %v7436_v52 }
  0xf5   :  { %938 = vmatmul.mubr.f32.gmra.mxu0 %v937_v25  ;;  %2225 = vmatpush2.msra.mxu1 %v7437_v36  ;;  %v7444_v25 = vld [vmem:[#allocation15_spill] sm:$0xff] }
  0xf6   :  { %1776 = vmatpush2.msra.mxu0 %v7438_v63  ;;  %1779 = vmatprep.mubr.f32.mxu0 %v7439_v31  ;;  %v7445_v53 = vand.u32 4294901760, %v7444_v25  ;;  %v7455_v25 = vand.u32 4294901760, %v7442_v1 }
  0xf7   :  { %1571 = vmatmul.mubr.f32.gmra.mxu1 %v5510_v44  ;;  %2614 = vmatprep.subr.mxu0 %v7441_v49  ;;  %v7448_v44 = vand.u32 4294901760, %v7439_v31  ;;  %v7450_v49 = vand.u32 4294901760, %v7449_v20  ;;  %v7459_v31 = vld [vmem:[#allocation124_spill] sm:$0xff]  ;;  %v7461_v20 = vld [vmem:[#allocation125_spill] sm:$0xff] }
  0xf8   :  { %1577 = vmatprep.mubr.f32.mxu1 %v5520_v18  ;;  %3125 = vmatprep.subr.mxu1 %v3970_v3  ;;  %v7451_v18 = vld [vmem:[#allocation117_spill] sm:$0xff]  ;;  %v7452_v3 = vand.u32 4294901760, %v4032_v35  ;;  %v7460_v35 = vld [vmem:[#allocation12_spill] sm:$0xff] }
  0xf9   :  { %1782 = vmatmul.mubr.f32.vlgmr.msra.gmra.mxu0 %v7442_v1  ;;  %v7463_v1 = vld [vmem:[#allocation13_spill] sm:$0xff] }
  0xfa   :  { %1789 = vmatprep.mubr.f32.mxu0 %v7443_v62  ;;  %2618 = vmatpush1.msra.mxu0 %v7445_v53  ;;  %v7454_v53 = vand.u32 4294901760, %v4045_v40  ;;  %v7462_v40 = vand.u32 4294901760, %v7451_v18 }
  0xfb   :  { %1579 = vmatmul.mubr.f32.gmra.mxu1 %v5534_v60  ;;  %2622 = vmatprep.subr.mxu0 %v7447_v7  ;;  %v7456_v7 = vld [vmem:[#allocation20_spill] sm:$0xff]  ;;  %v7662_v60 = vld [vmem:[#allocation211_spill] sm:$0xff] }
  0xfc   :  { %2229 = vmatprep.mubr.f32.mxu1 %v7448_v44  ;;  %2626 = vmatpush1.msra.mxu0 %v7450_v49  ;;  %v7457_v13 = vand.u32 4294901760, %v7456_v7  ;;  %v7458_v44 = vand.u32 4294901760, %v7443_v62  ;;  %v7464_v49 = vand.u32 4294901760, %v7453_v33  ;;  %v7466_v62 = vld [vmem:[#allocation131_spill] sm:$0xff]  ;;  %v7475_v7 = vand.u32 4294901760, %v4108_v8 }
  0xfd   :  { %1792 = vmatmul.mubr.f32.gmra.mxu0 %v7451_v18  ;;  %2630 = vmatprep.subr.mxu0 %v7452_v3  ;;  %v7467_v3 = vld [vmem:[#allocation22_spill] sm:$0xff]  ;;  %v7470_v18 = vld [vmem:[#allocation24_spill] sm:$0xff]  ;;  %v7481_v8 = vand.u32 4294901760, %v4131_v48 }
  0xfe   :  { %1799 = vmatprep.mubr.f32.mxu0 %v7453_v33  ;;  %2634 = vmatpush1.msra.mxu0 %v7454_v53  ;;  %v7468_v53 = vand.u32 4294901760, %v7467_v3  ;;  %v7472_v33 = vand.u32 4294901760, %v7461_v20  ;;  %v7496_v3 = vld [vmem:[#allocation34_spill] sm:$0xff] }
  0xff   :  { %2233 = vmatmul.mubr.f32.vlgmr.msra.gmra.mxu1 %v7455_v25  ;;  %2638 = vmatprep.subr.mxu0 %v7457_v13  ;;  %v7471_v25 = vand.u32 4294901760, %v7470_v18  ;;  %v7499_v18 = vld [vmem:[#allocation36_spill] sm:$0xff] }
 0x100   :  { %3127 = vmatpush1.msra.mxu1 %v3972_v4  ;;  %2241 = vmatprep.mubr.f32.mxu1 %v7458_v44  ;;  %v7465_v4 = vld [vmem:[#allocation130_spill] sm:$0xff]  ;;  %v7477_v44 = vand.u32 4294901760, %v4119_v42  ;;  %v7483_v42 = vand.u32 4294901760, %v4145_v57 }
 0x101   :  { %1802 = vmatmul.mubr.f32.gmra.mxu0 %v7459_v31  ;;  %3129 = vmatprep.subr.mxu1 %v7460_v35  ;;  %v7476_v13 = vand.u32 4294901760, %v7465_v4 }
 0x102   :  { %1809 = vmatprep.mubr.f32.mxu0 %v7461_v20  ;;  %3131 = vmatpush1.msra.mxu1 %v3976_v9  ;;  %v7469_v9 = vand.u32 4294901760, %v7459_v31  ;;  %v7478_v31 = vand.u32 4294901760, %v7466_v62 }
 0x103   :  { %2245 = vmatmul.mubr.f32.gmra.mxu1 %v7462_v40  ;;  %3133 = vmatprep.subr.mxu1 %v7463_v1  ;;  %v7489_v1 = vld [vmem:[#allocation32_spill] sm:$0xff] }
 0x104   :  { %2253 = vmatprep.mubr.f32.mxu1 %v7464_v49  ;;  %3135 = vmatpush1.msra.mxu1 %v3980_v11  ;;  %v7473_v11 = vld [vmem:[#allocation133_spill] sm:$0xff]  ;;  %v7490_v57 = vand.u32 4294901760, %v7489_v1  ;;  %v7519_v1 = vld [vmem:[#allocation44_spill] sm:$0xff] }
 0x105   :  { %1812 = vmatmul.mubr.f32.gmra.mxu0 %v7465_v4  ;;  %3137 = vmatprep.subr.mxu1 %v3983_v15  ;;  %v7474_v15 = vld [vmem:[#allocation134_spill] sm:$0xff]  ;;  %v7482_v35 = vand.u32 4294901760, %v7473_v11 }
 0x106   :  { %1819 = vmatprep.mubr.f32.mxu0 %v7466_v62  ;;  %2642 = vmatpush1.msra.mxu0 %v7468_v53  ;;  %v7484_v20 = vand.u32 4294901760, %v7474_v15  ;;  %v7492_v4 = vld [vmem:[#allocation18_spill] sm:$0xff]  ;;  %v7494_v62 = vld [vmem:[#allocation19_spill] sm:$0xff]  ;;  %v7497_v53 = vand.u32 4294901760, %v7496_v3 }
 0x107   :  { %2257 = vmatmul.mubr.f32.gmra.mxu1 %v7469_v9  ;;  %2646 = vmatprep.subr.mxu0 %v7471_v25  ;;  %v7498_v9 = vand.u32 4294901760, %v4963_v37  ;;  %v7500_v25 = vand.u32 4294901760, %v7499_v18  ;;  %v7526_v3 = vld [vmem:[#allocation46_spill] sm:$0xff]  ;;  %v7529_v18 = vld [vmem:[#allocation48_spill] sm:$0xff] }
 0x108   :  { %2265 = vmatprep.mubr.f32.mxu1 %v7472_v33  ;;  %3139 = vmatpush1.msra.mxu1 %v3985_v16  ;;  %v7479_v16 = vld [vmem:[#allocation135_spill] sm:$0xff] }
 0x109   :  { %1822 = vmatmul.mubr.f32.gmra.mxu0 %v7473_v11  ;;  %3141 = vmatprep.subr.mxu1 %v3987_v17  ;;  %v7480_v17 = vld [vmem:[#allocation137_spill] sm:$0xff]  ;;  %v7488_v40 = vand.u32 4294901760, %v7479_v16 }
 0x10a   :  { %1829 = vmatprep.mubr.f32.mxu0 %v7474_v15  ;;  %2650 = vmatpush1.msra.mxu0 %v7475_v7  ;;  %v7491_v49 = vand.u32 4294901760, %v7480_v17  ;;  %v7502_v11 = vld [vmem:[#allocation21_spill] sm:$0xff]  ;;  %v7503_v15 = vld [vmem:[#allocation147_spill] sm:$0xff] }
 0x10b   :  { %2269 = vmatmul.mubr.f32.gmra.mxu1 %v7476_v13  ;;  %2654 = vmatprep.subr.mxu0 %v7477_v44  ;;  %v7504_v7 = vld [vmem:[#allocation23_spill] sm:$0xff]  ;;  %v7505_v13 = vld [vmem:[#allocation150_spill] sm:$0xff] }
 0x10c   :  { %2277 = vmatprep.mubr.f32.mxu1 %v7478_v31  ;;  %3143 = vmatpush1.msra.mxu1 %v4000_v22  ;;  %v7485_v22 = vld [vmem:[#allocation140_spill] sm:$0xff]  ;;  %v7506_v44 = vld [vmem:[#allocation38_spill] sm:$0xff] }
 0x10d   :  { %1832 = vmatmul.mubr.f32.gmra.mxu0 %v7479_v16  ;;  %3145 = vmatprep.subr.mxu1 %v4006_v24  ;;  %v7486_v24 = vld [vmem:[#allocation30_spill] sm:$0xff]  ;;  %v7501_v33 = vand.u32 4294901760, %v7485_v22  ;;  %v7507_v31 = vand.u32 4294901760, %v7506_v44  ;;  %v7509_v16 = vld [vmem:[#allocation40_spill] sm:$0xff] }
 0x10e   :  { %1839 = vmatprep.mubr.f32.mxu0 %v7480_v17  ;;  %2658 = vmatpush1.msra.mxu0 %v7481_v8  ;;  %v7487_v48 = vand.u32 4294901760, %v7486_v24  ;;  %v7510_v17 = vand.u32 4294901760, %v7509_v16  ;;  %v7516_v24 = vld [vmem:[#allocation42_spill] sm:$0xff]  ;;  %v7539_v16 = vld [vmem:[#allocation52_spill] sm:$0xff] }
 0x10f   :  { %2281 = vmatmul.mubr.f32.gmra.mxu1 %v7482_v35  ;;  %2662 = vmatprep.subr.mxu0 %v7483_v42  ;;  %v7512_v35 = vld [vmem:[#allocation25_spill] sm:$0xff]  ;;  %v7513_v42 = vld [vmem:[#allocation151_spill] sm:$0xff]  ;;  %v7536_v44 = vld [vmem:[#allocation50_spill] sm:$0xff] }
 0x110   :  { %2289 = vmatprep.mubr.f32.mxu1 %v7484_v20  ;;  %3147 = vmatpush1.msra.mxu1 %v4020_v30  ;;  %v7493_v30 = vld [vmem:[#allocation144_spill] sm:$0xff]  ;;  %v7514_v20 = vld [vmem:[#allocation26_spill] sm:$0xff] }
 0x111   :  { %1842 = vmatmul.mubr.f32.gmra.mxu0 %v4963_v37  ;;  %3149 = vmatprep.subr.mxu1 %v4026_v32  ;;  %v7495_v32 = vld [vmem:[#allocation145_spill] sm:$0xff]  ;;  %v7508_v37 = vand.u32 4294901760, %v7493_v30 }
 0x112   :  { %1849 = vmatprep.mubr.f32.mxu0 %v7485_v22  ;;  %2666 = vmatpush1.msra.mxu0 %v7487_v48  ;;  %v7511_v8 = vand.u32 4294901760, %v7495_v32  ;;  %v7515_v22 = vld [vmem:[#allocation152_spill] sm:$0xff]  ;;  %v7517_v48 = vand.u32 4294901760, %v7516_v24  ;;  %v7546_v24 = vld [vmem:[#allocation54_spill] sm:$0xff] }
 0x113   :  { %2293 = vmatmul.mubr.f32.gmra.mxu1 %v7488_v40  ;;  %2670 = vmatprep.subr.mxu0 %v7490_v57  ;;  %v7518_v40 = vand.u32 4294901760, %v7503_v15  ;;  %v7520_v57 = vand.u32 4294901760, %v7519_v1  ;;  %v7549_v1 = vld [vmem:[#allocation56_spill] sm:$0xff] }
 0x114   :  { %2301 = vmatprep.mubr.f32.mxu1 %v7491_v49  ;;  %3151 = vmatpush1.msra.mxu1 %v7492_v4  ;;  %v7521_v49 = vand.u32 4294901760, %v7505_v13  ;;  %v7522_v4 = vld [vmem:[#allocation27_spill] sm:$0xff] }
 0x115   :  { %1852 = vmatmul.mubr.f32.gmra.mxu0 %v7493_v30  ;;  %3153 = vmatprep.subr.mxu1 %v7494_v62  ;;  %v7523_v30 = vld [vmem:[#allocation155_spill] sm:$0xff]  ;;  %v7524_v62 = vld [vmem:[#allocation28_spill] sm:$0xff] }
 0x116   :  { %1859 = vmatprep.mubr.f32.mxu0 %v7495_v32  ;;  %2674 = vmatpush1.msra.mxu0 %v7497_v53  ;;  %v7525_v32 = vld [vmem:[#allocation157_spill] sm:$0xff]  ;;  %v7527_v53 = vand.u32 4294901760, %v7526_v3  ;;  %v7556_v3 = vld [vmem:[#allocation58_spill] sm:$0xff] }
 0x117   :  { %2305 = vmatmul.mubr.f32.gmra.mxu1 %v7498_v9  ;;  %2678 = vmatprep.subr.mxu0 %v7500_v25  ;;  %v7528_v9 = vand.u32 4294901760, %v7513_v42  ;;  %v7530_v25 = vand.u32 4294901760, %v7529_v18  ;;  %v7559_v18 = vld [vmem:[#allocation60_spill] sm:$0xff] }
 0x118   :  { %2313 = vmatprep.mubr.f32.mxu1 %v7501_v33  ;;  %3155 = vmatpush1.msra.mxu1 %v7502_v11  ;;  %v7531_v33 = vand.u32 4294901760, %v7515_v22  ;;  %v7532_v11 = vld [vmem:[#allocation29_spill] sm:$0xff] }
 0x119   :  { %1862 = vmatmul.mubr.f32.gmra.mxu0 %v7503_v15  ;;  %3157 = vmatprep.subr.mxu1 %v7504_v7  ;;  %v7533_v15 = vld [vmem:[#allocation160_spill] sm:$0xff]  ;;  %v7534_v7 = vld [vmem:[#allocation31_spill] sm:$0xff] }
 0x11a   :  { %1869 = vmatprep.mubr.f32.mxu0 %v7505_v13  ;;  %2682 = vmatpush1.msra.mxu0 %v7507_v31  ;;  %v7535_v13 = vld [vmem:[#allocation161_spill] sm:$0xff]  ;;  %v7537_v31 = vand.u32 4294901760, %v7536_v44  ;;  %v7566_v44 = vld [vmem:[#allocation62_spill] sm:$0xff] }
 0x11b   :  { %2317 = vmatmul.mubr.f32.gmra.mxu1 %v7508_v37  ;;  %2686 = vmatprep.subr.mxu0 %v7510_v17  ;;  %v7538_v37 = vand.u32 4294901760, %v7523_v30  ;;  %v7540_v17 = vand.u32 4294901760, %v7539_v16  ;;  %v7569_v16 = vld [vmem:[#allocation64_spill] sm:$0xff] }
 0x11c   :  { %2325 = vmatprep.mubr.f32.mxu1 %v7511_v8  ;;  %3159 = vmatpush1.msra.mxu1 %v7512_v35  ;;  %v7541_v8 = vand.u32 4294901760, %v7525_v32  ;;  %v7542_v35 = vld [vmem:[#allocation33_spill] sm:$0xff] }
 0x11d   :  { %1872 = vmatmul.mubr.f32.gmra.mxu0 %v7513_v42  ;;  %3161 = vmatprep.subr.mxu1 %v7514_v20  ;;  %v7543_v42 = vld [vmem:[#allocation163_spill] sm:$0xff] }
 0x11e   :  { %1879 = vmatprep.mubr.f32.mxu0 %v7515_v22  ;;  %2690 = vmatpush1.msra.mxu0 %v7517_v48  ;;  %v7544_v20 = vld [vmem:[#allocation35_spill] sm:$0xff]  ;;  %v7545_v22 = vld [vmem:[#allocation166_spill] sm:$0xff]  ;;  %v7547_v48 = vand.u32 4294901760, %v7546_v24 }
 0x11f   :  { %2329 = vmatmul.mubr.f32.gmra.mxu1 %v7518_v40  ;;  %2694 = vmatprep.subr.mxu0 %v7520_v57  ;;  %v7548_v40 = vand.u32 4294901760, %v7533_v15  ;;  %v7550_v57 = vand.u32 4294901760, %v7549_v1  ;;  %v7575_v24 = vld [vmem:[#allocation66_spill] sm:$0xff] }
 0x120   :  { %2337 = vmatprep.mubr.f32.mxu1 %v7521_v49  ;;  %3163 = vmatpush1.msra.mxu1 %v7522_v4  ;;  %v7551_v49 = vand.u32 4294901760, %v7535_v13  ;;  %v7552_v4 = vld [vmem:[#allocation37_spill] sm:$0xff] }
 0x121   :  { %1882 = vmatmul.mubr.f32.gmra.mxu0 %v7523_v30  ;;  %3165 = vmatprep.subr.mxu1 %v7524_v62  ;;  %v7553_v30 = vld [vmem:[#allocation167_spill] sm:$0xff] }
 0x122   :  { %1889 = vmatprep.mubr.f32.mxu0 %v7525_v32  ;;  %2698 = vmatpush1.msra.mxu0 %v7527_v53  ;;  %v7554_v62 = vld [vmem:[#allocation39_spill] sm:$0xff]  ;;  %v7555_v32 = vld [vmem:[#allocation168_spill] sm:$0xff]  ;;  %v7557_v53 = vand.u32 4294901760, %v7556_v3  ;;  %v7585_v3 = vld [vmem:[#allocation70_spill] sm:$0xff] }
 0x123   :  { %2341 = vmatmul.mubr.f32.gmra.mxu1 %v7528_v9  ;;  %2702 = vmatprep.subr.mxu0 %v7530_v25  ;;  %v7558_v9 = vand.u32 4294901760, %v7543_v42  ;;  %v7560_v25 = vand.u32 4294901760, %v7559_v18 }
 0x124   :  { %2349 = vmatprep.mubr.f32.mxu1 %v7531_v33  ;;  %3167 = vmatpush1.msra.mxu1 %v7532_v11  ;;  %v7561_v33 = vand.u32 4294901760, %v7545_v22  ;;  %v7562_v11 = vld [vmem:[#allocation41_spill] sm:$0xff] }
 0x125   :  { %1892 = vmatmul.mubr.f32.gmra.mxu0 %v7533_v15  ;;  %3169 = vmatprep.subr.mxu1 %v7534_v7  ;;  %v7563_v15 = vld [vmem:[#allocation171_spill] sm:$0xff] }
 0x126   :  { %1899 = vmatprep.mubr.f32.mxu0 %v7535_v13  ;;  %2706 = vmatpush1.msra.mxu0 %v7537_v31  ;;  %v7564_v7 = vld [vmem:[#allocation43_spill] sm:$0xff]  ;;  %v7565_v13 = vld [vmem:[#allocation173_spill] sm:$0xff]  ;;  %v7567_v31 = vand.u32 4294901760, %v7566_v44 }
 0x127   :  { %2353 = vmatmul.mubr.f32.gmra.mxu1 %v7538_v37  ;;  %2710 = vmatprep.subr.mxu0 %v7540_v17  ;;  %v7568_v37 = vand.u32 4294901760, %v7553_v30  ;;  %v7570_v17 = vand.u32 4294901760, %v7569_v16  ;;  %v7593_v44 = vld [vmem:[#allocation55_spill] sm:$0xff]  ;;  %v7595_v16 = vld [vmem:[#allocation74_spill] sm:$0xff] }
 0x128   :  { %2361 = vmatprep.mubr.f32.mxu1 %v7541_v8  ;;  %3171 = vmatpush1.msra.mxu1 %v7542_v35  ;;  %v7571_v8 = vand.u32 4294901760, %v7555_v32 }
 0x129   :  { %1902 = vmatmul.mubr.f32.gmra.mxu0 %v7543_v42  ;;  %3173 = vmatprep.subr.mxu1 %v7544_v20  ;;  %v7572_v42 = vld [vmem:[#allocation45_spill] sm:$0xff]  ;;  %v7573_v20 = vld [vmem:[#allocation176_spill] sm:$0xff] }
 0x12a   :  { %1909 = vmatprep.mubr.f32.mxu0 %v7545_v22  ;;  %2714 = vmatpush1.msra.mxu0 %v7547_v48  ;;  %v7574_v22 = vld [vmem:[#allocation177_spill] sm:$0xff]  ;;  %v7576_v48 = vand.u32 4294901760, %v7575_v24  ;;  %v7587_v18 = vand.u32 4294901760, %v7573_v20 }
 0x12b   :  { %2365 = vmatmul.mubr.f32.gmra.mxu1 %v7548_v40  ;;  %2718 = vmatprep.subr.mxu0 %v7550_v57  ;;  %v7577_v40 = vand.u32 4294901760, %v7563_v15  ;;  %v7578_v57 = vld [vmem:[#allocation68_spill] sm:$0xff] }
 0x12c   :  { %2373 = vmatprep.mubr.f32.mxu1 %v7551_v49  ;;  %3175 = vmatpush1.msra.mxu1 %v7552_v4  ;;  %v7579_v49 = vand.u32 4294901760, %v7578_v57  ;;  %v7580_v4 = vand.u32 4294901760, %v7565_v13 }
 0x12d   :  { %1912 = vmatmul.mubr.f32.gmra.mxu0 %v7553_v30  ;;  %3177 = vmatprep.subr.mxu1 %v7554_v62  ;;  %v7581_v30 = vld [vmem:[#allocation49_spill] sm:$0xff]  ;;  %v7582_v62 = vld [vmem:[#allocation179_spill] sm:$0xff] }
 0x12e   :  { %1919 = vmatprep.mubr.f32.mxu0 %v7555_v32  ;;  %2722 = vmatpush1.msra.mxu0 %v7557_v53  ;;  %v7584_v32 = vld [vmem:[#allocation182_spill] sm:$0xff]  ;;  %v7586_v53 = vand.u32 4294901760, %v7585_v3 }
 0x12f   :  { %2377 = vmatmul.mubr.f32.gmra.mxu1 %v7558_v9  ;;  %2726 = vmatprep.subr.mxu0 %v7560_v25  ;;  %v7588_v25 = vld [vmem:[#allocation72_spill] sm:$0xff] }
 0x130   :  { %2385 = vmatprep.mubr.f32.mxu1 %v7561_v33  ;;  %3179 = vmatpush1.msra.mxu1 %v7562_v11  ;;  %v7589_v33 = vand.u32 4294901760, %v7588_v25  ;;  %v7590_v11 = vand.u32 4294901760, %v7574_v22  ;;  %v7608_v25 = vld [vmem:[#allocation80_spill] sm:$0xff] }
 0x131   :  { %1922 = vmatmul.mubr.f32.gmra.mxu0 %v7563_v15  ;;  %3181 = vmatprep.subr.mxu1 %v7564_v7  ;;  %v7591_v15 = vld [vmem:[#allocation53_spill] sm:$0xff]  ;;  %v7592_v7 = vld [vmem:[#allocation183_spill] sm:$0xff] }
 0x132   :  { %1929 = vmatprep.mubr.f32.mxu0 %v7565_v13  ;;  %2730 = vmatpush1.msra.mxu0 %v7567_v31  ;;  %v7594_v31 = vld [vmem:[#allocation184_spill] sm:$0xff] }
 0x133   :  { %2389 = vmatmul.mubr.f32.gmra.mxu1 %v7568_v37  ;;  %2734 = vmatprep.subr.mxu0 %v7570_v17  ;;  %v443_v35 = vpop.f32.mrf.mxu0  ;;  %v7596_v17 = vand.u32 4294901760, %v7595_v16 }
 0x134   :  { %2397 = vmatprep.mubr.f32.mxu1 %v7571_v8  ;;  %3183 = vmatpush1.msra.mxu1 %v7572_v42  ;;  %v7597_v42 = vand.u32 4294901760, %v7582_v62 }
 0x135   :  { %1932 = vmatmul.mubr.f32.gmra.mxu0 %v7573_v20  ;;  %3185 = vmatprep.subr.mxu1 %v7316_v10  ;;  %v445_v1 = vpop.f32.mrf.mxu0  ;;  %v7583_v10 = vld [vmem:[#allocation51_spill] sm:$0xff]  ;;  %v7598_v20 = vld [vmem:[#allocation76_spill] sm:$0xff] }
 0x136   :  { %1939 = vmatprep.mubr.f32.mxu0 %v7574_v22  ;;  %2738 = vmatpush1.msra.mxu0 %v7576_v48  ;;  %v7599_v22 = vand.u32 4294901760, %v7598_v20  ;;  %v7600_v48 = vand.u32 4294901760, %v7584_v32 }
 0x137   :  { %2401 = vmatmul.mubr.f32.gmra.mxu1 %v7577_v40  ;;  %2742 = vmatprep.subr.mxu0 %v7579_v49  ;;  %v7601_v40 = vld [vmem:[#allocation57_spill] sm:$0xff]  ;;  %v7602_v49 = vld [vmem:[#allocation187_spill] sm:$0xff] }
 0x138   :  { %2409 = vmatprep.mubr.f32.mxu1 %v7580_v4  ;;  %3187 = vmatpush1.msra.mxu1 %v7581_v30  ;;  %v7603_v30 = vld [vmem:[#allocation59_spill] sm:$0xff] }
 0x139   :  { %1942 = vmatmul.mubr.f32.gmra.mxu0 %v7582_v62  ;;  %3189 = vmatprep.subr.mxu1 %v7583_v10  ;;  %v7605_v10 = vld [vmem:[#allocation78_spill] sm:$0xff] }
 0x13a   :  { %1949 = vmatprep.mubr.f32.mxu0 %v7584_v32  ;;  %2746 = vmatpush2.msra.mxu0 %v7586_v53  ;;  %v459_v9 = vpop.f32.mrf.mxu0  ;;  %v7606_v3 = vand.u32 4294901760, %v7605_v10  ;;  %v7607_v32 = vand.u32 4294901760, %v7592_v7 }
 0x13b   :  { %2413 = vmatmul.mubr.f32.gmra.mxu1 %v7587_v18  ;;  %2750 = vmatprep.subr.mxu0 %v7589_v33  ;;  %v7609_v33 = vand.u32 4294901760, %v7608_v25  ;;  %v7623_v25 = vld [vmem:[#allocation67_spill] sm:$0xff] }
 0x13c   :  { %2421 = vmatprep.mubr.f32.mxu1 %v7590_v11  ;;  %3191 = vmatpush2.msra.mxu1 %v7591_v15  ;;  %v461_v13 = vpop.f32.mrf.mxu0  ;;  %v7611_v15 = vld [vmem:[#allocation61_spill] sm:$0xff] }
 0x13d   :  { %1952 = vmatmul.mubr.f32.gmra.mxu0 %v7592_v7  ;;  %3193 = vmatprep.subr.mxu1 %v7593_v44 }
 0x13e   :  { %1959 = vmatprep.mubr.f32.mxu0 %v7594_v31  ;;  %v1332_v37 = vpop.f32.mrf.mxu1  ;;  %2754 = vmatpush2.msra.mxu0 %v7596_v17  ;;  %v7613_v17 = vld [vmem:[#allocation63_spill] sm:$0xff] }
 0x13f   :  { %v5808_v8 = vadd.f32 %v1332_v37, %v443_v35  ;;  %2425 = vmatmul.mubr.f32.gmra.mxu1 %v7597_v42  ;;  %2758 = vmatprep.subr.mxu0 %v7599_v22  ;;  %v7604_v35 = vld [vmem:[#allocation189_spill] sm:$0xff]  ;;  %v7612_v37 = vld [vmem:[#allocation191_spill] sm:$0xff]  ;;  %v7615_v42 = vld [vmem:[#allocation82_spill] sm:$0xff] }
 0x140   :  { %v1334_v24 = vpop.f32.mrf.mxu1  ;;  %2433 = vmatprep.mubr.f32.mxu1 %v7600_v48  ;;  %3195 = vmatpush2.msra.mxu1 %v7601_v40  ;;  %v7616_v20 = vand.u32 4294901760, %v7615_v42  ;;  %v7618_v48 = vld [vmem:[#allocation84_spill] sm:$0xff] }
 0x141   :  { %v475_v57 = vpop.f32.mrf.mxu0  ;;  %1962 = vmatmul.mubr.f32.gmra.mxu0 %v7602_v49  ;;  %v5818_v4 = vadd.f32 %v1334_v24, %v445_v1  ;;  %3197 = vmatprep.subr.mxu1 %v7603_v30  ;;  %v7610_v1 = vand.u32 4294901760, %v7594_v31  ;;  %v7617_v31 = vand.u32 4294901760, %v7602_v49  ;;  %v7619_v40 = vand.u32 4294901760, %v7618_v48  ;;  %v7632_v48 = vld [vmem:[#allocation198_spill] sm:$0xff] }
 0x142   :  { %1969 = vmatprep.mubr.f32.mxu0 %v7604_v35  ;;  %v1340_v62 = vpop.f32.mrf.mxu1  ;;  %2762 = vmatpush2.msra.mxu0 %v7606_v3  ;;  %v7622_v3 = vld [vmem:[#allocation194_spill] sm:$0xff] }
 0x143   :  { %v477_v53 = vpop.f32.mrf.mxu0  ;;  %v5824_v18 = vadd.f32 %v1340_v62, %v459_v9  ;;  %2437 = vmatmul.mubr.f32.gmra.mxu1 %v7607_v32  ;;  %2766 = vmatprep.subr.mxu0 %v7609_v33  ;;  %v7614_v9 = vld [vmem:[#allocation192_spill] sm:$0xff]  ;;  %v7621_v62 = vld [vmem:[#allocation65_spill] sm:$0xff]  ;;  %v7625_v33 = vld [vmem:[#allocation86_spill] sm:$0xff] }
 0x144   :  { %v1342_v11 = vpop.f32.mrf.mxu1  ;;  %2445 = vmatprep.mubr.f32.mxu1 %v7610_v1  ;;  %3199 = vmatpush2.msra.mxu1 %v7611_v15 }
 0x145   :  { %v491_v44 = vpop.f32.mrf.mxu0  ;;  %1972 = vmatmul.mubr.f32.gmra.mxu0 %v7612_v37  ;;  %v5834_v16 = vadd.f32 %v1342_v11, %v461_v13  ;;  %3201 = vmatprep.subr.mxu1 %v7613_v17  ;;  %v7620_v13 = vand.u32 4294901760, %v7604_v35  ;;  %v7626_v11 = vand.u32 4294901760, %v7625_v33  ;;  %v7627_v35 = vand.u32 4294901760, %v7612_v37  ;;  %v7628_v17 = vld [vmem:[#allocation88_spill] sm:$0xff] }
 0x146   :  { %1979 = vmatprep.mubr.f32.mxu0 %v7614_v9  ;;  %v1348_v7 = vpop.f32.mrf.mxu1  ;;  %2770 = vmatpush2.msra.mxu0 %v7616_v20  ;;  %v7631_v20 = vld [vmem:[#allocation69_spill] sm:$0xff]  ;;  %v7638_v33 = vld [vmem:[#allocation92_spill] sm:$0xff] }
 0x147   :  { %v493_v22 = vpop.f32.mrf.mxu0  ;;  %v5840_v24 = vadd.f32 %v1348_v7, %v475_v57  ;;  %2449 = vmatmul.mubr.f32.gmra.mxu1 %v7617_v31  ;;  %2774 = vmatprep.subr.mxu0 %v7619_v40  ;;  %v7624_v57 = vld [vmem:[#allocation197_spill] sm:$0xff]  ;;  %v7629_v7 = vand.u32 4294901760, %v7628_v17 }
 0x148   :  { %v1350_v30 = vpop.f32.mrf.mxu1  ;;  %2457 = vmatprep.mubr.f32.mxu1 %v7620_v13  ;;  %3203 = vmatpush2.msra.mxu1 %v7621_v62  ;;  %v7635_v13 = vld [vmem:[#allocation90_spill] sm:$0xff]  ;;  %v7641_v17 = vld [vmem:[#allocation73_spill] sm:$0xff] }
 0x149   :  { %v507_v10 = vpop.f32.mrf.mxu0  ;;  %1982 = vmatmul.mubr.f32.gmra.mxu0 %v7622_v3  ;;  %v5850_v32 = vadd.f32 %v1350_v30, %v477_v53  ;;  %3205 = vmatprep.subr.mxu1 %v7623_v25  ;;  %v7630_v53 = vand.u32 4294901760, %v7614_v9  ;;  %v7633_v30 = vld [vmem:[#allocation71_spill] sm:$0xff]  ;;  %v7636_v62 = vand.u32 4294901760, %v7635_v13  ;;  %v7637_v9 = vand.u32 4294901760, %v7622_v3 }
 0x14a   :  { %1989 = vmatprep.mubr.f32.mxu0 %v7624_v57  ;;  %v1356_v49 = vpop.f32.mrf.mxu1  ;;  %2778 = vmatpush2.msra.mxu0 %v7626_v11  ;;  %v7639_v11 = vand.u32 4294901760, %v7638_v33 }
 0x14b   :  { %v509_v1 = vpop.f32.mrf.mxu0  ;;  %v5856_v15 = vadd.f32 %v1356_v49, %v491_v44  ;;  %2461 = vmatmul.mubr.f32.gmra.mxu1 %v7627_v35  ;;  %2782 = vmatprep.subr.mxu0 %v7629_v7  ;;  %v7634_v44 = vld [vmem:[#allocation199_spill] sm:$0xff] }
 0x14c   :  { %v1358_v42 = vpop.f32.mrf.mxu1  ;;  %2469 = vmatprep.mubr.f32.mxu1 %v7630_v53  ;;  %3207 = vmatpush2.msra.mxu1 %v7631_v20  ;;  %v7643_v20 = vld [vmem:[#allocation75_spill] sm:$0xff] }
 0x14d   :  { %v523_v31 = vpop.f32.mrf.mxu0  ;;  %1992 = vmatmul.mubr.f32.gmra.mxu0 %v7632_v48  ;;  %v5866_v40 = vadd.f32 %v1358_v42, %v493_v22  ;;  %3209 = vmatprep.subr.mxu1 %v7633_v30  ;;  %v7640_v22 = vand.u32 4294901760, %v7624_v57  ;;  %v7642_v42 = vld [vmem:[#allocation202_spill] sm:$0xff]  ;;  %v7647_v57 = vand.u32 4294901760, %v7632_v48 }
 0x14e   :  { %1999 = vmatprep.mubr.f32.mxu0 %v7634_v44  ;;  %v1364_v37 = vpop.f32.mrf.mxu1  ;;  %2786 = vmatpush2.msra.mxu0 %v7636_v62  ;;  %v7645_v30 = vld [vmem:[#allocation94_spill] sm:$0xff] }
 0x14f   :  { %v525_v25 = vpop.f32.mrf.mxu0  ;;  %v5872_v49 = vadd.f32 %v1364_v37, %v507_v10  ;;  %2473 = vmatmul.mubr.f32.gmra.mxu1 %v7637_v9  ;;  %2790 = vmatprep.subr.mxu0 %v7639_v11  ;;  %v7644_v10 = vld [vmem:[#allocation204_spill] sm:$0xff]  ;;  %v7646_v37 = vand.u32 4294901760, %v7645_v30  ;;  %v7653_v30 = vld [vmem:[#allocation79_spill] sm:$0xff] }
 0x150   :  { %v1366_v35 = vpop.f32.mrf.mxu1  ;;  %2481 = vmatprep.mubr.f32.mxu1 %v7640_v22  ;;  %3211 = vmatpush2.msra.mxu1 %v7641_v17  ;;  %v7648_v9 = vld [vmem:[#allocation96_spill] sm:$0xff]  ;;  %v7652_v17 = vld [vmem:[#allocation206_spill] sm:$0xff] }
 0x151   :  { %v539_v7 = vpop.f32.mrf.mxu0  ;;  %2002 = vmatmul.mubr.f32.gmra.mxu0 %v7642_v42  ;;  %v5882_v53 = vadd.f32 %v1366_v35, %v509_v1  ;;  %3213 = vmatprep.subr.mxu1 %v7643_v20  ;;  %v7649_v33 = vand.u32 4294901760, %v7648_v9  ;;  %v7650_v1 = vand.u32 4294901760, %v7634_v44  ;;  %v7651_v35 = vld [vmem:[#allocation77_spill] sm:$0xff]  ;;  %v7657_v44 = vand.u32 4294901760, %v7642_v42 }
 0x152   :  { %2009 = vmatprep.mubr.f32.mxu0 %v7644_v10  ;;  %v1372_v3 = vpop.f32.mrf.mxu1  ;;  %2794 = vmatpush2.msra.mxu0 %v7646_v37 }
 0x153   :  { %v541_v13 = vpop.f32.mrf.mxu0  ;;  %v5888_v62 = vadd.f32 %v1372_v3, %v523_v31  ;;  %2485 = vmatmul.mubr.f32.gmra.mxu1 %v7647_v57  ;;  %2798 = vmatprep.subr.mxu0 %v7649_v33  ;;  %v7654_v31 = vld [vmem:[#allocation208_spill] sm:$0xff]  ;;  %v7655_v3 = vld [vmem:[#allocation97_spill] sm:$0xff]  ;;  %v7658_v33 = vld [vmem:[#allocation99_spill] sm:$0xff] }
 0x154   :  { %v1374_v11 = vpop.f32.mrf.mxu1  ;;  %2493 = vmatprep.mubr.f32.mxu1 %v7650_v1  ;;  %3215 = vmatpush2.msra.mxu1 %v7651_v35  ;;  %v7656_v37 = vand.u32 4294901760, %v7655_v3  ;;  %v7659_v1 = vand.u32 4294901760, %v7658_v33 }
 0x155   :  { %v555_v22 = vpop.f32.mrf.mxu0  ;;  %2012 = vmatmul.mubr.f32.gmra.mxu0 %v7652_v17  ;;  %v5898_v20 = vadd.f32 %v1374_v11, %v525_v25  ;;  %3217 = vmatprep.subr.mxu1 %v7653_v30  ;;  %v7660_v25 = vand.u32 4294901760, %v7644_v10  ;;  %v7661_v11 = vld [vmem:[#allocation81_spill] sm:$0xff]  ;;  %v7667_v10 = vand.u32 4294901760, %v7652_v17 }
 0x156   :  { %2019 = vmatprep.mubr.f32.mxu0 %v7654_v31  ;;  %v1380_v48 = vpop.f32.mrf.mxu1  ;;  %2802 = vmatpush2.msra.mxu0 %v7656_v37  ;;  %v7663_v37 = vld [vmem:[#allocation83_spill] sm:$0xff] }
 0x157   :  { %v557_v57 = vpop.f32.mrf.mxu0  ;;  %v5904_v9 = vadd.f32 %v1380_v48, %v539_v7  ;;  %2497 = vmatmul.mubr.f32.gmra.mxu1 %v7657_v44  ;;  %2806 = vmatprep.subr.mxu0 %v7659_v1  ;;  %v7664_v7 = vld [vmem:[#allocation212_spill] sm:$0xff]  ;;  %v7665_v48 = vld [vmem:[#allocation101_spill] sm:$0xff] }
 0x158   :  { %v1382_v35 = vpop.f32.mrf.mxu1  ;;  %2505 = vmatprep.mubr.f32.mxu1 %v7660_v25  ;;  %3219 = vmatpush2.msra.mxu1 %v7661_v11  ;;  %v7666_v44 = vand.u32 4294901760, %v7665_v48  ;;  %v7668_v25 = vand.u32 4294901760, %v7412_v61 }
 0x159   :  { %v571_v30 = vpop.f32.mrf.mxu0  ;;  %2022 = vmatmul.mubr.f32.gmra.mxu0 %v7662_v60  ;;  %v5914_v3 = vadd.f32 %v1382_v35, %v541_v13  ;;  %3221 = vmatprep.subr.mxu1 %v7663_v37  ;;  %v7669_v13 = vand.u32 4294901760, %v7654_v31  ;;  %v7670_v35 = vld [vmem:[#allocation85_spill] sm:$0xff]  ;;  %v7676_v31 = vand.u32 4294901760, %v7662_v60 }
 0x15a   :  { %2029 = vmatprep.mubr.f32.mxu0 %v7664_v7  ;;  %v1388_v42 = vpop.f32.mrf.mxu1  ;;  %2810 = vmatpush2.msra.mxu0 %v7666_v44  ;;  %v7673_v44 = vld [vmem:[#allocation87_spill] sm:$0xff] }
 0x15b   :  { %v573_v33 = vpop.f32.mrf.mxu0  ;;  %v5920_v1 = vadd.f32 %v1388_v42, %v555_v22  ;;  %2509 = vmatmul.mubr.f32.gmra.mxu1 %v7667_v10  ;;  %2814 = vmatprep.subr.mxu0 %v7668_v25  ;;  %v7674_v22 = vld [vmem:[#allocation217_spill] sm:$0xff]  ;;  %v7675_v42 = vand.u32 4294901760, %v7419_v56  ;;  %v7677_v25 = vld [vmem:[#allocation106_spill] sm:$0xff] }
 0x15c   :  { %v1390_v11 = vpop.f32.mrf.mxu1  ;;  %2517 = vmatprep.mubr.f32.mxu1 %v7669_v13  ;;  %3223 = vmatpush2.msra.mxu1 %v7670_v35  ;;  %v7678_v13 = vand.u32 4294901760, %v7677_v25 }
 0x15d   :  { %v587_v37 = vpop.f32.mrf.mxu0  ;;  %2032 = vmatmul.mubr.f32.gmra.mxu0 %v7671_v27  ;;  %v5930_v48 = vadd.f32 %v1390_v11, %v557_v57  ;;  %3225 = vmatprep.subr.mxu1 %v7673_v44  ;;  %v7679_v57 = vand.u32 4294901760, %v7664_v7  ;;  %v7680_v11 = vld [vmem:[#allocation89_spill] sm:$0xff]  ;;  %v7685_v7 = vand.u32 4294901760, %v7671_v27 }
 0x15e   :  { %2039 = vmatprep.mubr.f32.mxu0 %v7674_v22  ;;  %v1396_v17 = vpop.f32.mrf.mxu1  ;;  %2818 = vmatpush2.msra.mxu0 %v7675_v42  ;;  %v7682_v42 = vld [vmem:[#allocation91_spill] sm:$0xff] }
 0x15f   :  { %7672 = vst [vmem:[#allocation93_spill] sm:$0xff] %v5930_v48  ;;  %v589_v61 = vpop.f32.mrf.mxu0  ;;  %v5936_v10 = vadd.f32 %v1396_v17, %v571_v30  ;;  %2521 = vmatmul.mubr.f32.gmra.mxu1 %v7676_v31  ;;  %2822 = vmatprep.subr.mxu0 %v7678_v13  ;;  %v7681_v48 = vld [vmem:[#allocation218_spill] sm:$0xff]  ;;  %v7683_v30 = vld [vmem:[#allocation219_spill] sm:$0xff]  ;;  %v7684_v17 = vand.u32 4294901760, %v4723_v58  ;;  %v7686_v13 = vand.u32 4294901760, %v4741_v55 }
 0x160   :  { %v1398_v35 = vpop.f32.mrf.mxu1  ;;  %2529 = vmatprep.mubr.f32.mxu1 %v7679_v57  ;;  %3227 = vmatpush2.msra.mxu1 %v7680_v11  ;;  %v7688_v11 = vld [vmem:[#allocation222_spill] sm:$0xff] }
 0x161   :  { %v603_v44 = vpop.f32.mrf.mxu0  ;;  %2042 = vmatmul.mubr.f32.gmra.mxu0 %v7681_v48  ;;  %v5946_v56 = vadd.f32 %v1398_v35, %v573_v33  ;;  %3229 = vmatprep.subr.mxu1 %v7682_v42  ;;  %v7687_v33 = vand.u32 4294901760, %v7674_v22  ;;  %v7690_v42 = vand.u32 4294901760, %v4758_v51  ;;  %v7691_v22 = vand.u32 4294901760, %v7681_v48 }
 0x162   :  { %2049 = vmatprep.mubr.f32.mxu0 %v7683_v30  ;;  %v1404_v60 = vpop.f32.mrf.mxu1  ;;  %2826 = vmatpush2.msra.mxu0 %v7684_v17 }
 0x163   :  { %v605_v31 = vpop.f32.mrf.mxu0  ;;  %v5952_v25 = vadd.f32 %v1404_v60, %v587_v37  ;;  %2533 = vmatmul.mubr.f32.gmra.mxu1 %v7685_v7  ;;  %2830 = vmatprep.subr.mxu0 %v7686_v13  ;;  %v7689_v37 = vld [vmem:[#allocation224_spill] sm:$0xff] }
 0x164   :  { %v1406_v57 = vpop.f32.mrf.mxu1  ;;  %2541 = vmatprep.mubr.f32.mxu1 %v7687_v33  ;;  %3231 = vmatpush2.msra.mxu1 %v7423_v2  ;;  %v7692_v2 = vand.u32 4294901760, %v4768_v28  ;;  %v7698_v33 = vand.u32 4294901760, %v4811_v46 }
 0x165   :  { %v619_v35 = vpop.f32.mrf.mxu0  ;;  %2052 = vmatmul.mubr.f32.gmra.mxu0 %v7688_v11  ;;  %v5962_v58 = vadd.f32 %v1406_v57, %v589_v61  ;;  %3233 = vmatprep.subr.mxu1 %v7426_v50  ;;  %v7693_v61 = vand.u32 4294901760, %v7683_v30  ;;  %v7695_v30 = vand.u32 4294901760, %v7688_v11  ;;  %v7699_v11 = vand.u32 4294901760, %v5489_v45 }
 0x166   :  { %2059 = vmatprep.mubr.f32.mxu0 %v7689_v37  ;;  %v1412_v27 = vpop.f32.mrf.mxu1  ;;  %2834 = vmatpush2.msra.mxu0 %v7690_v42 }
 0x167   :  { %v621_v55 = vpop.f32.mrf.mxu0  ;;  %v5968_v60 = vadd.f32 %v1412_v27, %v603_v44  ;;  %2545 = vmatmul.mubr.f32.gmra.mxu1 %v7691_v22  ;;  %2838 = vmatprep.subr.mxu0 %v7692_v2  ;;  %v7694_v44 = vand.u32 4294901760, %v7432_v38  ;;  %v7701_v27 = vand.u32 4294901760, %v5494_v59 }
 0x168   :  { %v1414_v17 = vpop.f32.mrf.mxu1  ;;  %2553 = vmatprep.mubr.f32.mxu1 %v7693_v61  ;;  %3235 = vmatpush2.msra.mxu1 %v4640_v21  ;;  %v7696_v21 = vand.u32 4294901760, %v4786_v19  ;;  %v7707_v61 = vld [vmem:[#allocation109_spill] sm:$0xff] }
 0x169   :  { %v635_v50 = vpop.f32.mrf.mxu0  ;;  %2062 = vmatmul.mubr.f32.gmra.mxu0 %v5489_v45  ;;  %v5978_v51 = vadd.f32 %v1414_v17, %v605_v31  ;;  %3237 = vmatprep.subr.mxu1 %v7429_v54  ;;  %v7697_v31 = vand.u32 4294901760, %v7689_v37  ;;  %v7706_v17 = vand.u32 4294901760, %v5518_v43 }
 0x16a   :  { %2069 = vmatprep.mubr.f32.mxu0 %v5494_v59  ;;  %v1420_v48 = vpop.f32.mrf.mxu1  ;;  %2842 = vmatpush2.msra.mxu0 %v7694_v44  ;;  %v7704_v59 = vand.u32 4294901760, %v5503_v6 }
 0x16b   :  { %v637_v28 = vpop.f32.mrf.mxu0  ;;  %v5984_v7 = vadd.f32 %v1420_v48, %v619_v35  ;;  %2557 = vmatmul.mubr.f32.gmra.mxu1 %v7695_v30  ;;  %2846 = vmatprep.subr.mxu0 %v7696_v21  ;;  %v7711_v30 = vld [vmem:[#allocation114_spill] sm:$0xff] }
 0x16c   :  { %v1422_v13 = vpop.f32.mrf.mxu1  ;;  %2565 = vmatprep.mubr.f32.mxu1 %v7697_v31  ;;  %3239 = vmatpush2.msra.mxu1 %v7430_v0  ;;  %v7700_v0 = vand.u32 4294901760, %v4825_v26  ;;  %v7703_v26 = vand.u32 4294901760, %v7435_v39 }
 0x16d   :  { %v651_v54 = vpop.f32.mrf.mxu0  ;;  %2072 = vmatmul.mubr.f32.gmra.mxu0 %v5503_v6  ;;  %v5994_v38 = vadd.f32 %v1422_v13, %v621_v55  ;;  %3241 = vmatprep.subr.mxu1 %v7433_v34  ;;  %v7702_v34 = vand.u32 4294901760, %v4829_v47  ;;  %v7705_v47 = vand.u32 4294901760, %v7438_v63 }
 0x16e   :  { %2079 = vmatprep.mubr.f32.mxu0 %v5518_v43  ;;  %v1428_v57 = vpop.f32.mrf.mxu1  ;;  %2850 = vmatpush2.msra.mxu0 %v7698_v33  ;;  %v7708_v43 = vand.u32 4294901760, %v5532_v12 }
 0x16f   :  { %v653_v19 = vpop.f32.mrf.mxu0  ;;  %v6000_v35 = vadd.f32 %v1428_v57, %v635_v50  ;;  %2569 = vmatmul.mubr.f32.gmra.mxu1 %v7699_v11  ;;  %2854 = vmatprep.subr.mxu0 %v7700_v0  ;;  %v7714_v57 = vld [vmem:[#allocation119_spill] sm:$0xff] }
 0x170   :  { %v1430_v37 = vpop.f32.mrf.mxu1  ;;  %2577 = vmatprep.mubr.f32.mxu1 %v7701_v27  ;;  %2858 = vmatpush2.msra.mxu0 %v7702_v34  ;;  %v7716_v34 = vld [vmem:[#allocation123_spill] sm:$0xff] }
 0x171   :  { %v667_v42 = vpop.f32.mrf.mxu0  ;;  %2082 = vmatmul.mubr.f32.gmra.mxu0 %v5532_v12  ;;  %v6011_v46 = vadd.f32 %v1430_v37, %v637_v28  ;;  %3243 = vmatpush2.msra.mxu1 %v7434_v23  ;;  %v7710_v28 = vld [vmem:[#allocation111_spill] sm:$0xff]  ;;  %v7712_v12 = vand.u32 4294901760, %v5554_v5  ;;  %v7715_v37 = vld [vmem:[#allocation122_spill] sm:$0xff] }
 0x172   :  { %2089 = vmatprep.mubr.f32.mxu0 %v5542_v41  ;;  %v1436_v45 = vpop.f32.mrf.mxu1  ;;  %2862 = vmatprep.subr.mxu0 %v7703_v26 }
 0x173   :  { %v669_v55 = vpop.f32.mrf.mxu0  ;;  %v6017_v22 = vadd.f32 %v1436_v45, %v651_v54  ;;  %2581 = vmatmul.mubr.f32.gmra.mxu1 %v7704_v59  ;;  %2866 = vmatpush2.msra.mxu0 %v7705_v47  ;;  %v7713_v54 = vld [vmem:[#allocation116_spill] sm:$0xff]  ;;  %v7717_v47 = vld [vmem:[#allocation126_spill] sm:$0xff] }
 0x174   :  { %v1438_v2 = vpop.f32.mrf.mxu1  ;;  %2589 = vmatprep.mubr.f32.mxu1 %v7706_v17  ;;  %3245 = vmatprep.subr.mxu1 %v4700_v29  ;;  %v7709_v29 = vand.u32 4294901760, %v5542_v41  ;;  %v7718_v17 = vld [vmem:[#allocation127_spill] sm:$0xff] }
 0x175   :  { %v683_v23 = vpop.f32.mrf.mxu0  ;;  %2092 = vmatmul.mubr.f32.gmra.mxu0 %v5554_v5  ;;  %v6027_v39 = vadd.f32 %v1438_v2, %v653_v19  ;;  %3247 = vmatpush2.msra.mxu1 %v4719_v14 }
 0x176   :  { %2868 = vmatprep.mubr.f32.mxu0 %v7707_v61  ;;  %v1444_v6 = vpop.f32.mrf.mxu1  ;;  %3249 = vmatprep.subr.mxu1 %v7436_v52 }
 0x177   :  { %v685_v63 = vpop.f32.mrf.mxu0  ;;  %v6032_v50 = vadd.f32 %v1444_v6, %v667_v42  ;;  %2593 = vmatmul.mubr.f32.gmra.mxu1 %v7708_v43 }
 0x178   :  { %v1446_v48 = vpop.f32.mrf.mxu1  ;;  %2601 = vmatprep.mubr.f32.mxu1 %v7709_v29  ;;  %3251 = vmatpush2.msra.mxu1 %v7437_v36 }
 0x179   :  { %v699_v44 = vpop.f32.mrf.mxu0  ;;  %2870 = vmatmul.mubr.f32.vlgmr.msra.gmra.mxu0 %v7710_v28  ;;  %v6040_v14 = vadd.f32 %v1446_v48, %v669_v55  ;;  %v7719_v48 = vld [vmem:[#allocation128_spill] sm:$0xff] }
 0x17a   :  { %2876 = vmatprep.mubr.f32.mxu0 %v7711_v30  ;;  %v1452_v52 = vpop.f32.mrf.mxu1 }
 0x17b   :  { %v701_v21 = vpop.f32.mrf.mxu0  ;;  %v6043_v13 = vadd.f32 %v1452_v52, %v683_v23  ;;  %2605 = vmatmul.mubr.f32.gmra.mxu1 %v7712_v12 }
 0x17c   :  { %v1454_v31 = vpop.f32.mrf.mxu1  ;;  %3253 = vmatprep.mubr.f32.mxu1 %v7707_v61 }
 0x17d   :  { %v715_v41 = vpop.f32.mrf.mxu0  ;;  %2878 = vmatmul.mubr.f32.gmra.mxu0 %v7713_v54  ;;  %v6049_v36 = vadd.f32 %v1454_v31, %v685_v63  ;;  %v7721_v31 = vld [vmem:[#allocation132_spill] sm:$0xff] }
 0x17e   :  { %2884 = vmatprep.mubr.f32.mxu0 %v7714_v57  ;;  %v1460_v33 = vpop.f32.mrf.mxu1 }
 0x17f   :  { %v717_v19 = vpop.f32.mrf.mxu0  ;;  %v6052_v11 = vadd.f32 %v1460_v33, %v699_v44  ;;  %3255 = vmatmul.mubr.f32.vlgmr.msra.gmra.mxu1 %v7710_v28  ;;  %v7720_v44 = vld [vmem:[#allocation129_spill] sm:$0xff] }
 0x180   :  { %v1462_v0 = vpop.f32.mrf.mxu1  ;;  %3261 = vmatprep.mubr.f32.mxu1 %v7711_v30 }
 0x181   :  { %v731_v5 = vpop.f32.mrf.mxu0  ;;  %2886 = vmatmul.mubr.f32.gmra.mxu0 %v7715_v37  ;;  %v6057_v27 = vadd.f32 %v1462_v0, %v701_v21 }
 0x182   :  { %2892 = vmatprep.mubr.f32.mxu0 %v7716_v34  ;;  %v1468_v42 = vpop.f32.mrf.mxu1 }
 0x183   :  { %v733_v45 = vpop.f32.mrf.mxu0  ;;  %v6060_v26 = vadd.f32 %v1468_v42, %v715_v41  ;;  %3263 = vmatmul.mubr.f32.gmra.mxu1 %v7713_v54  ;;  %v7722_v54 = vld [vmem:[#allocation136_spill] sm:$0xff]  ;;  %v7724_v42 = vld [vmem:[#allocation139_spill] sm:$0xff] }
 0x184   :  { %v1470_v55 = vpop.f32.mrf.mxu1  ;;  %3269 = vmatprep.mubr.f32.mxu1 %v7714_v57 }
 0x185   :  { %v747_v59 = vpop.f32.mrf.mxu0  ;;  %2894 = vmatmul.mubr.f32.gmra.mxu0 %v7717_v47  ;;  %v6065_v2 = vadd.f32 %v1470_v55, %v717_v19 }
 0x186   :  { %2900 = vmatprep.mubr.f32.mxu0 %v7718_v17  ;;  %v1476_v23 = vpop.f32.mrf.mxu1 }
 0x187   :  { %v749_v61 = vpop.f32.mrf.mxu0  ;;  %v6068_v6 = vadd.f32 %v1476_v23, %v731_v5  ;;  %3271 = vmatmul.mubr.f32.gmra.mxu1 %v7715_v37  ;;  %v7723_v37 = vld [vmem:[#allocation138_spill] sm:$0xff]  ;;  %v7725_v23 = vld [vmem:[#allocation141_spill] sm:$0xff] }
 0x188   :  { %v1478_v63 = vpop.f32.mrf.mxu1  ;;  %3277 = vmatprep.mubr.f32.mxu1 %v7716_v34 }
 0x189   :  { %v763_v43 = vpop.f32.mrf.mxu0  ;;  %2902 = vmatmul.mubr.f32.gmra.mxu0 %v7719_v48  ;;  %v6073_v29 = vadd.f32 %v1478_v63, %v733_v45  ;;  %v7726_v63 = vld [vmem:[#allocation142_spill] sm:$0xff] }
 0x18a   :  { %2908 = vmatprep.mubr.f32.mxu0 %v7720_v44  ;;  %v1484_v28 = vpop.f32.mrf.mxu1 }
 0x18b   :  { %v765_v30 = vpop.f32.mrf.mxu0  ;;  %v6076_v52 = vadd.f32 %v1484_v28, %v747_v59  ;;  %3279 = vmatmul.mubr.f32.gmra.mxu1 %v7717_v47 }
 0x18c   :  { %v1486_v21 = vpop.f32.mrf.mxu1  ;;  %3285 = vmatprep.mubr.f32.mxu1 %v7718_v17 }
 0x18d   :  { %v779_v12 = vpop.f32.mrf.mxu0  ;;  %2910 = vmatmul.mubr.f32.gmra.mxu0 %v7721_v31  ;;  %v6081_v41 = vadd.f32 %v1486_v21, %v749_v61  ;;  %v7727_v21 = vld [vmem:[#allocation143_spill] sm:$0xff] }
 0x18e   :  { %2916 = vmatprep.mubr.f32.mxu0 %v7722_v54  ;;  %v1492_v57 = vpop.f32.mrf.mxu1 }
 0x18f   :  { %v781_v33 = vpop.f32.mrf.mxu0  ;;  %v6084_v19 = vadd.f32 %v1492_v57, %v763_v43  ;;  %3287 = vmatmul.mubr.f32.gmra.mxu1 %v7719_v48 }
 0x190   :  { %v1494_v0 = vpop.f32.mrf.mxu1  ;;  %3293 = vmatprep.mubr.f32.mxu1 %v7720_v44 }
 0x191   :  { %v795_v5 = vpop.f32.mrf.mxu0  ;;  %2918 = vmatmul.mubr.f32.gmra.mxu0 %v7723_v37  ;;  %v6089_v34 = vadd.f32 %v1494_v0, %v765_v30 }
 0x192   :  { %2924 = vmatprep.mubr.f32.mxu0 %v7724_v42  ;;  %v1500_v45 = vpop.f32.mrf.mxu1 }
 0x193   :  { %v797_v55 = vpop.f32.mrf.mxu0  ;;  %v6092_v59 = vadd.f32 %v1500_v45, %v779_v12  ;;  %3295 = vmatmul.mubr.f32.gmra.mxu1 %v7721_v31  ;;  %v7728_v31 = vld [vmem:[#allocation146_spill] sm:$0xff]  ;;  %v7731_v45 = vld [vmem:[#allocation149_spill] sm:$0xff] }
 0x194   :  { %v1502_v47 = vpop.f32.mrf.mxu1  ;;  %3301 = vmatprep.mubr.f32.mxu1 %v7722_v54 }
 0x195   :  { %v811_v17 = vpop.f32.mrf.mxu0  ;;  %2926 = vmatmul.mubr.f32.gmra.mxu0 %v7725_v23  ;;  %v6097_v61 = vadd.f32 %v1502_v47, %v781_v33 }
 0x196   :  { %2932 = vmatprep.mubr.f32.mxu0 %v7726_v63  ;;  %v1508_v43 = vpop.f32.mrf.mxu1 }
 0x197   :  { %v813_v48 = vpop.f32.mrf.mxu0  ;;  %v6100_v44 = vadd.f32 %v1508_v43, %v795_v5  ;;  %3303 = vmatmul.mubr.f32.gmra.mxu1 %v7723_v37  ;;  %v7729_v37 = vld [vmem:[#allocation148_spill] sm:$0xff] }
 0x198   :  { %v1510_v28 = vpop.f32.mrf.mxu1  ;;  %3309 = vmatprep.mubr.f32.mxu1 %v7724_v42 }
 0x199   :  { %v827_v30 = vpop.f32.mrf.mxu0  ;;  %2934 = vmatmul.mubr.f32.gmra.mxu0 %v7727_v21  ;;  %v6105_v12 = vadd.f32 %v1510_v28, %v797_v55  ;;  %v7733_v28 = vld [vmem:[#allocation153_spill] sm:$0xff] }
 0x19a   :  { %2940 = vmatprep.mubr.f32.mxu0 %v7728_v31  ;;  %v1516_v54 = vpop.f32.mrf.mxu1 }
 0x19b   :  { %v829_v57 = vpop.f32.mrf.mxu0  ;;  %v6108_v33 = vadd.f32 %v1516_v54, %v811_v17  ;;  %3311 = vmatmul.mubr.f32.gmra.mxu1 %v7725_v23  ;;  %v7735_v54 = vld [vmem:[#allocation154_spill] sm:$0xff] }
 0x19c   :  { %v1518_v0 = vpop.f32.mrf.mxu1  ;;  %3317 = vmatprep.mubr.f32.mxu1 %v7726_v63 }
 0x19d   :  { %v843_v5 = vpop.f32.mrf.mxu0  ;;  %2942 = vmatmul.mubr.f32.gmra.mxu0 %v7729_v37  ;;  %v6113_v42 = vadd.f32 %v1518_v0, %v813_v48 }
 0x19e   :  { %2948 = vmatprep.mubr.f32.mxu0 %v7731_v45  ;;  %v1524_v55 = vpop.f32.mrf.mxu1 }
 0x19f   :  { %7730 = vst [vmem:[#allocation95_spill] sm:$0xff] %v6113_v42  ;;  %v845_v47 = vpop.f32.mrf.mxu0  ;;  %v6116_v43 = vadd.f32 %v1524_v55, %v827_v30  ;;  %3319 = vmatmul.mubr.f32.gmra.mxu1 %v7727_v21  ;;  %v7737_v55 = vld [vmem:[#allocation156_spill] sm:$0xff] }
 0x1a0   :  { %v1526_v17 = vpop.f32.mrf.mxu1  ;;  %3325 = vmatprep.mubr.f32.mxu1 %v7728_v31 }
 0x1a1   :  { %7732 = vst [vmem:[#allocation98_spill] sm:$0xff] %v6116_v43  ;;  %v859_v23 = vpop.f32.mrf.mxu0  ;;  %2950 = vmatmul.mubr.f32.gmra.mxu0 %v7733_v28  ;;  %v6121_v63 = vadd.f32 %v1526_v17, %v829_v57  ;;  %v7739_v43 = vld [vmem:[#allocation158_spill] sm:$0xff] }
 0x1a2   :  { %2956 = vmatprep.mubr.f32.mxu0 %v7735_v54  ;;  %v1532_v48 = vpop.f32.mrf.mxu1 }
 0x1a3   :  { %7734 = vst [vmem:[#allocation100_spill] sm:$0xff] %v6121_v63  ;;  %v861_v0 = vpop.f32.mrf.mxu0  ;;  %v6124_v42 = vadd.f32 %v1532_v48, %v843_v5  ;;  %3327 = vmatmul.mubr.f32.gmra.mxu1 %v7729_v37  ;;  %v7741_v48 = vld [vmem:[#allocation159_spill] sm:$0xff] }
 0x1a4   :  { %v1534_v30 = vpop.f32.mrf.mxu1  ;;  %3333 = vmatprep.mubr.f32.mxu1 %v7731_v45 }
 0x1a5   :  { %7736 = vst [vmem:[#allocation112_spill] sm:$0xff] %v6124_v42  ;;  %v875_v21 = vpop.f32.mrf.mxu0  ;;  %2958 = vmatmul.mubr.f32.gmra.mxu0 %v7737_v55  ;;  %v6129_v31 = vadd.f32 %v1534_v30, %v845_v47  ;;  %v7743_v42 = vld [vmem:[#allocation162_spill] sm:$0xff] }
 0x1a6   :  { %2964 = vmatprep.mubr.f32.mxu0 %v7739_v43  ;;  %v1540_v57 = vpop.f32.mrf.mxu1 }
 0x1a7   :  { %7738 = vst [vmem:[#allocation102_spill] sm:$0xff] %v6129_v31  ;;  %v877_v17 = vpop.f32.mrf.mxu0  ;;  %v6132_v63 = vadd.f32 %v1540_v57, %v859_v23  ;;  %3335 = vmatmul.mubr.f32.gmra.mxu1 %v7733_v28  ;;  %v7745_v57 = vld [vmem:[#allocation164_spill] sm:$0xff] }
 0x1a8   :  { %v1542_v5 = vpop.f32.mrf.mxu1  ;;  %3341 = vmatprep.mubr.f32.mxu1 %v7735_v54 }
 0x1a9   :  { %7740 = vst [vmem:[#allocation104_spill] sm:$0xff] %v6132_v63  ;;  %v891_v37 = vpop.f32.mrf.mxu0  ;;  %2966 = vmatmul.mubr.f32.gmra.mxu0 %v7741_v48  ;;  %v6137_v45 = vadd.f32 %v1542_v5, %v861_v0  ;;  %v7747_v63 = vld [vmem:[#allocation165_spill] sm:$0xff] }
 0x1aa   :  { %2972 = vmatprep.mubr.f32.mxu0 %v7743_v42  ;;  %v1548_v47 = vpop.f32.mrf.mxu1 }
 0x1ab   :  { %7742 = vst [vmem:[#allocation118_spill] sm:$0xff] %v6137_v45  ;;  %v893_v30 = vpop.f32.mrf.mxu0  ;;  %v6140_v31 = vadd.f32 %v1548_v47, %v875_v21  ;;  %3343 = vmatmul.mubr.f32.gmra.mxu1 %v7737_v55  ;;  %v7749_v47 = vld [vmem:[#allocation169_spill] sm:$0xff] }
 0x1ac   :  { %v1550_v23 = vpop.f32.mrf.mxu1  ;;  %3349 = vmatprep.mubr.f32.mxu1 %v7739_v43 }
 0x1ad   :  { %7744 = vst [vmem:[#allocation107_spill] sm:$0xff] %v6140_v31  ;;  %v907_v28 = vpop.f32.mrf.mxu0  ;;  %2974 = vmatmul.mubr.f32.gmra.mxu0 %v7745_v57  ;;  %v6145_v54 = vadd.f32 %v1550_v23, %v877_v17  ;;  %v7751_v31 = vld [vmem:[#allocation170_spill] sm:$0xff] }
 0x1ae   :  { %2980 = vmatprep.mubr.f32.mxu0 %v7747_v63  ;;  %v1556_v0 = vpop.f32.mrf.mxu1 }
 0x1af   :  { %7746 = vst [vmem:[#allocation108_spill] sm:$0xff] %v6145_v54  ;;  %v909_v5 = vpop.f32.mrf.mxu0  ;;  %v6148_v45 = vadd.f32 %v1556_v0, %v891_v37  ;;  %3351 = vmatmul.mubr.f32.gmra.mxu1 %v7741_v48  ;;  %v7753_v0 = vld [vmem:[#allocation172_spill] sm:$0xff] }
 0x1b0   :  { %v1558_v21 = vpop.f32.mrf.mxu1  ;;  %3357 = vmatprep.mubr.f32.mxu1 %v7743_v42 }
 0x1b1   :  { %7748 = vst [vmem:[#allocation120_spill] sm:$0xff] %v6148_v45  ;;  %v923_v55 = vpop.f32.mrf.mxu0  ;;  %2982 = vmatmul.mubr.f32.gmra.mxu0 %v7749_v47  ;;  %v6153_v43 = vadd.f32 %v1558_v21, %v893_v30  ;;  %v7755_v45 = vld [vmem:[#allocation174_spill] sm:$0xff] }
 0x1b2   :  { %2988 = vmatprep.mubr.f32.mxu0 %v7751_v31  ;;  %v1564_v17 = vpop.f32.mrf.mxu1 }
 0x1b3   :  { %7750 = vst [vmem:[#allocation110_spill] sm:$0xff] %v6153_v43  ;;  %v925_v23 = vpop.f32.mrf.mxu0  ;;  %v6156_v54 = vadd.f32 %v1564_v17, %v907_v28  ;;  %3359 = vmatmul.mubr.f32.gmra.mxu1 %v7745_v57  ;;  %v7757_v57 = vld [vmem:[#allocation175_spill] sm:$0xff] }
 0x1b4   :  { %v1566_v37 = vpop.f32.mrf.mxu1  ;;  %3365 = vmatprep.mubr.f32.mxu1 %v7747_v63 }
 0x1b5   :  { %7752 = vst [vmem:[#allocation14_spill] sm:$0xff] %v6156_v54  ;;  %v939_v48 = vpop.f32.mrf.mxu0  ;;  %2990 = vmatmul.mubr.f32.gmra.mxu0 %v7753_v0  ;;  %v6161_v42 = vadd.f32 %v1566_v37, %v909_v5  ;;  %v7759_v5 = vld [vmem:[#allocation178_spill] sm:$0xff] }
 0x1b6   :  { %2996 = vmatprep.mubr.f32.mxu0 %v7755_v45 }
 0x1b7   :  { %7754 = vst [vmem:[#allocation113_spill] sm:$0xff] %v6161_v42  ;;  %v941_v30 = vpop.f32.mrf.mxu0  ;;  %v1572_v21 = vpop.f32.mrf.mxu1  ;;  %3367 = vmatmul.mubr.f32.gmra.mxu1 %v7749_v47 }
 0x1b8   :  { %v6165_v43 = vadd.f32 %v1572_v21, %v923_v55  ;;  %3373 = vmatprep.mubr.f32.mxu1 %v7751_v31  ;;  %v7760_v21 = vld [vmem:[#allocation180_spill] sm:$0xff] }
 0x1b9   :  { %v1783_v28 = vpop.f32.mrf.mxu0  ;;  %2998 = vmatmul.mubr.f32.gmra.mxu0 %v7757_v57  ;;  %v1574_v17 = vpop.f32.mrf.mxu1 }
 0x1ba   :  { %7756 = vst [vmem:[#allocation115_spill] sm:$0xff] %v6165_v43  ;;  %v1784_v63 = vadd.f32 %v1783_v28, %v5808_v8  ;;  %v6170_v54 = vadd.f32 %v1574_v17, %v925_v23  ;;  %3004 = vmatprep.mubr.f32.mxu0 %v7759_v5  ;;  %v7761_v28 = vld [vmem:[#allocation181_spill] sm:$0xff] }
 0x1bb   :  { %v1785_v37 = vpop.f32.mrf.mxu0  ;;  %v1580_v42 = vpop.f32.mrf.mxu1  ;;  %3375 = vmatmul.mubr.f32.gmra.mxu1 %v7753_v0  ;;  %v7762_v0 = vld [vmem:[#allocation185_spill] sm:$0xff] }
 0x1bc   :  { %7758 = vst [vmem:[#allocation15_spill] sm:$0xff] %v6170_v54  ;;  %v1786_v47 = vadd.f32 %v1785_v37, %v5818_v4  ;;  %v6175_v55 = vadd.f32 %v1580_v42, %v939_v48  ;;  %3381 = vmatprep.mubr.f32.mxu1 %v7755_v45 }
 0x1bd   :  { %v1793_v31 = vpop.f32.mrf.mxu0  ;;  %3006 = vmatmul.mubr.f32.gmra.mxu0 %v7760_v21  ;;  %v1582_v43 = vpop.f32.mrf.mxu1 }
 0x1be   :  { %v1794_v8 = vadd.f32 %v1793_v31, %v5824_v18  ;;  %v6180_v23 = vadd.f32 %v1582_v43, %v941_v30  ;;  %3012 = vmatprep.mubr.f32.mxu0 %v7761_v28  ;;  %v7763_v30 = vld [vmem:[#allocation186_spill] sm:$0xff] }
 0x1bf   :  { %v1795_v17 = vpop.f32.mrf.mxu0  ;;  %v2234_v54 = vpop.f32.mrf.mxu1  ;;  %3383 = vmatmul.mubr.f32.gmra.mxu1 %v7757_v57 }
 0x1c0   :  { %v1796_v4 = vadd.f32 %v1795_v17, %v5834_v16  ;;  %v6185_v48 = vadd.f32 %v2234_v54, %v1784_v63  ;;  %3389 = vmatprep.mubr.f32.mxu1 %v7759_v5  ;;  %v7764_v63 = vld [vmem:[#allocation188_spill] sm:$0xff]  ;;  %v7765_v17 = vld [vmem:[#allocation190_spill] sm:$0xff] }
 0x1c1   :  { %v1803_v45 = vpop.f32.mrf.mxu0  ;;  %3014 = vmatmul.mubr.f32.gmra.mxu0 %v7762_v0  ;;  %v2236_v42 = vpop.f32.mrf.mxu1 }
 0x1c2   :  { %v1804_v18 = vadd.f32 %v1803_v45, %v5840_v24  ;;  %v6190_v43 = vadd.f32 %v2236_v42, %v1786_v47  ;;  %3020 = vmatprep.mubr.f32.mxu0 %v7763_v30 }
 0x1c3   :  { %v1805_v37 = vpop.f32.mrf.mxu0  ;;  %v2246_v31 = vpop.f32.mrf.mxu1  ;;  %3391 = vmatmul.mubr.f32.gmra.mxu1 %v7760_v21 }
 0x1c4   :  { %v1806_v16 = vadd.f32 %v1805_v37, %v5850_v32  ;;  %v6195_v54 = vadd.f32 %v2246_v31, %v1794_v8  ;;  %3397 = vmatprep.mubr.f32.mxu1 %v7761_v28  ;;  %v7766_v28 = vld [vmem:[#allocation47_spill] sm:$0xff]  ;;  %v7767_v31 = vld [vmem:[#allocation193_spill] sm:$0xff] }
 0x1c5   :  { %v1813_v57 = vpop.f32.mrf.mxu0  ;;  %3022 = vmatmul.mubr.f32.gmra.mxu0 %v7764_v63  ;;  %v2248_v5 = vpop.f32.mrf.mxu1 }
 0x1c6   :  { %v1814_v24 = vadd.f32 %v1813_v57, %v5856_v15  ;;  %v6200_v47 = vadd.f32 %v2248_v5, %v1796_v4  ;;  %3028 = vmatprep.mubr.f32.mxu0 %v7765_v17 }
 0x1c7   :  { %v1815_v45 = vpop.f32.mrf.mxu0  ;;  %v2258_v42 = vpop.f32.mrf.mxu1  ;;  %3399 = vmatmul.mubr.f32.gmra.mxu1 %v7762_v0 }
 0x1c8   :  { %v1816_v32 = vadd.f32 %v1815_v45, %v5866_v40  ;;  %v6205_v21 = vadd.f32 %v2258_v42, %v1804_v18  ;;  %3405 = vmatprep.mubr.f32.mxu1 %v7763_v30  ;;  %v7768_v30 = vld [vmem:[#allocation195_spill] sm:$0xff]  ;;  %v7769_v42 = vld [vmem:[#allocation196_spill] sm:$0xff] }
 0x1c9   :  { %v1823_v8 = vpop.f32.mrf.mxu0  ;;  %3030 = vmatmul.mubr.f32.gmra.mxu0 %v7766_v28  ;;  %v2260_v37 = vpop.f32.mrf.mxu1 }
 0x1ca   :  { %v1824_v15 = vadd.f32 %v1823_v8, %v5872_v49  ;;  %v6210_v4 = vadd.f32 %v2260_v37, %v1806_v16  ;;  %3036 = vmatprep.mubr.f32.mxu0 %v7767_v31 }
 0x1cb   :  { %v1825_v57 = vpop.f32.mrf.mxu0  ;;  %v2270_v5 = vpop.f32.mrf.mxu1  ;;  %3407 = vmatmul.mubr.f32.gmra.mxu1 %v7764_v63 }
 0x1cc   :  { %v1826_v40 = vadd.f32 %v1825_v57, %v5882_v53  ;;  %v6215_v0 = vadd.f32 %v2270_v5, %v1814_v24  ;;  %3413 = vmatprep.mubr.f32.mxu1 %v7765_v17  ;;  %v7770_v17 = vld [vmem:[#allocation200_spill] sm:$0xff]  ;;  %v7771_v5 = vld [vmem:[#allocation201_spill] sm:$0xff] }
 0x1cd   :  { %v1833_v18 = vpop.f32.mrf.mxu0  ;;  %3038 = vmatmul.mubr.f32.gmra.mxu0 %v7768_v30  ;;  %v2272_v45 = vpop.f32.mrf.mxu1 }
 0x1ce   :  { %v1834_v49 = vadd.f32 %v1833_v18, %v5888_v62  ;;  %v6220_v16 = vadd.f32 %v2272_v45, %v1816_v32  ;;  %3044 = vmatprep.mubr.f32.mxu0 %v7769_v42 }
 0x1cf   :  { %v1835_v8 = vpop.f32.mrf.mxu0  ;;  %v2282_v37 = vpop.f32.mrf.mxu1  ;;  %3415 = vmatmul.mubr.f32.gmra.mxu1 %v7766_v28 }
 0x1d0   :  { %v1836_v53 = vadd.f32 %v1835_v8, %v5898_v20  ;;  %v6225_v63 = vadd.f32 %v2282_v37, %v1824_v15  ;;  %3421 = vmatprep.mubr.f32.mxu1 %v7767_v31  ;;  %v7772_v31 = vld [vmem:[#allocation203_spill] sm:$0xff]  ;;  %v7774_v37 = vld [vmem:[#allocation205_spill] sm:$0xff] }
 0x1d1   :  { %v1843_v24 = vpop.f32.mrf.mxu0  ;;  %3046 = vmatmul.mubr.f32.gmra.mxu0 %v7770_v17  ;;  %v2284_v57 = vpop.f32.mrf.mxu1 }
 0x1d2   :  { %v1844_v62 = vadd.f32 %v1843_v24, %v5904_v9  ;;  %v6230_v32 = vadd.f32 %v2284_v57, %v1826_v40  ;;  %3052 = vmatprep.mubr.f32.mxu0 %v7771_v5 }
 0x1d3   :  { %v1845_v18 = vpop.f32.mrf.mxu0  ;;  %v2294_v45 = vpop.f32.mrf.mxu1  ;;  %3423 = vmatmul.mubr.f32.gmra.mxu1 %v7768_v30  ;;  %v7775_v30 = vld [vmem:[#allocation93_spill] sm:$0xff] }
 0x1d4   :  { %v1846_v20 = vadd.f32 %v1845_v18, %v5914_v3  ;;  %v6235_v28 = vadd.f32 %v2294_v45, %v1834_v49  ;;  %3429 = vmatprep.mubr.f32.mxu1 %v7769_v42  ;;  %v7776_v18 = vld [vmem:[#allocation207_spill] sm:$0xff] }
 0x1d5   :  { %v1853_v15 = vpop.f32.mrf.mxu0  ;;  %3054 = vmatmul.mubr.f32.gmra.mxu0 %v7772_v31  ;;  %v2296_v8 = vpop.f32.mrf.mxu1 }
 0x1d6   :  { %v1854_v9 = vadd.f32 %v1853_v15, %v5920_v1  ;;  %v6240_v40 = vadd.f32 %v2296_v8, %v1836_v53  ;;  %3060 = vmatprep.mubr.f32.mxu0 %v7774_v37  ;;  %v7777_v15 = vld [vmem:[#allocation209_spill] sm:$0xff] }
 0x1d7   :  { %v1855_v24 = vpop.f32.mrf.mxu0  ;;  %v2306_v57 = vpop.f32.mrf.mxu1  ;;  %3431 = vmatmul.mubr.f32.gmra.mxu1 %v7770_v17 }
 0x1d8   :  { %7773 = vst [vmem:[#allocation16_spill] sm:$0xff] %v6240_v40  ;;  %v1856_v3 = vadd.f32 %v1855_v24, %v7775_v30  ;;  %v6245_v49 = vadd.f32 %v2306_v57, %v1844_v62  ;;  %3437 = vmatprep.mubr.f32.mxu1 %v7771_v5  ;;  %v7778_v24 = vld [vmem:[#allocation210_spill] sm:$0xff]  ;;  %v7779_v30 = vld [vmem:[#allocation213_spill] sm:$0xff] }
 0x1d9   :  { %v1863_v42 = vpop.f32.mrf.mxu0  ;;  %3062 = vmatmul.mubr.f32.gmra.mxu0 %v7776_v18  ;;  %v2308_v45 = vpop.f32.mrf.mxu1 }
 0x1da   :  { %v1864_v1 = vadd.f32 %v1863_v42, %v5936_v10  ;;  %v6250_v53 = vadd.f32 %v2308_v45, %v1846_v20  ;;  %3068 = vmatprep.mubr.f32.mxu0 %v7777_v15 }
 0x1db   :  { %v1865_v8 = vpop.f32.mrf.mxu0  ;;  %v2318_v40 = vpop.f32.mrf.mxu1  ;;  %3439 = vmatmul.mubr.f32.gmra.mxu1 %v7772_v31 }
 0x1dc   :  { %v1866_v17 = vadd.f32 %v1865_v8, %v5946_v56  ;;  %v6255_v62 = vadd.f32 %v2318_v40, %v1854_v9  ;;  %3445 = vmatprep.mubr.f32.mxu1 %v7774_v37  ;;  %v7780_v40 = vld [vmem:[#allocation215_spill] sm:$0xff]  ;;  %v7781_v8 = vld [vmem:[#allocation216_spill] sm:$0xff] }
 0x1dd   :  { %v1873_v5 = vpop.f32.mrf.mxu0  ;;  %3070 = vmatmul.mubr.f32.gmra.mxu0 %v7778_v24  ;;  %v2320_v57 = vpop.f32.mrf.mxu1 }
 0x1de   :  { %v1874_v10 = vadd.f32 %v1873_v5, %v5952_v25  ;;  %v6260_v20 = vadd.f32 %v2320_v57, %v1856_v3  ;;  %3076 = vmatprep.mubr.f32.mxu0 %v7779_v30 }
 0x1df   :  { %v1875_v42 = vpop.f32.mrf.mxu0  ;;  %v2330_v45 = vpop.f32.mrf.mxu1  ;;  %3447 = vmatmul.mubr.f32.gmra.mxu1 %v7776_v18 }
 0x1e0   :  { %v1876_v56 = vadd.f32 %v1875_v42, %v5962_v58  ;;  %v6265_v31 = vadd.f32 %v2330_v45, %v1864_v1  ;;  %3453 = vmatprep.mubr.f32.mxu1 %v7777_v15  ;;  %v7782_v15 = vld [vmem:[#allocation220_spill] sm:$0xff]  ;;  %v7783_v45 = vld [vmem:[#allocation221_spill] sm:$0xff] }
 0x1e1   :  { %v1883_v9 = vpop.f32.mrf.mxu0  ;;  %3078 = vmatmul.mubr.f32.gmra.mxu0 %v7780_v40  ;;  %v2332_v37 = vpop.f32.mrf.mxu1 }
 0x1e2   :  { %v1884_v25 = vadd.f32 %v1883_v9, %v5968_v60  ;;  %v6270_v3 = vadd.f32 %v2332_v37, %v1866_v17  ;;  %3084 = vmatprep.mubr.f32.mxu0 %v7781_v8 }
 0x1e3   :  { %v1885_v5 = vpop.f32.mrf.mxu0  ;;  %v2342_v57 = vpop.f32.mrf.mxu1  ;;  %3455 = vmatmul.mubr.f32.gmra.mxu1 %v7778_v24 }
 0x1e4   :  { %v1886_v58 = vadd.f32 %v1885_v5, %v5978_v51  ;;  %v6275_v18 = vadd.f32 %v2342_v57, %v1874_v10  ;;  %3461 = vmatprep.mubr.f32.mxu1 %v7779_v30  ;;  %v7784_v30 = vld [vmem:[#allocation223_spill] sm:$0xff]  ;;  %v7785_v57 = vld [vmem:[#allocation225_spill] sm:$0xff] }
 0x1e5   :  { %v1893_v1 = vpop.f32.mrf.mxu0  ;;  %3086 = vmatmul.mubr.f32.gmra.mxu0 %v7782_v15  ;;  %v2344_v42 = vpop.f32.mrf.mxu1 }
 0x1e6   :  { %v1894_v60 = vadd.f32 %v1893_v1, %v5984_v7  ;;  %v6280_v17 = vadd.f32 %v2344_v42, %v1876_v56  ;;  %3092 = vmatprep.mubr.f32.mxu0 %v7783_v45 }
 0x1e7   :  { %v1895_v9 = vpop.f32.mrf.mxu0  ;;  %v2354_v37 = vpop.f32.mrf.mxu1  ;;  %3463 = vmatmul.mubr.f32.gmra.mxu1 %v7780_v40 }
 0x1e8   :  { %v1896_v51 = vadd.f32 %v1895_v9, %v5994_v38  ;;  %v6285_v24 = vadd.f32 %v2354_v37, %v1884_v25  ;;  %3469 = vmatprep.mubr.f32.mxu1 %v7781_v8  ;;  %v7786_v8 = vld [vmem:[#allocation226_spill] sm:$0xff]  ;;  %v7787_v37 = vld [vmem:[#allocation227_spill] sm:$0xff] }
 0x1e9   :  { %v1903_v10 = vpop.f32.mrf.mxu0  ;;  %3094 = vmatmul.mubr.f32.gmra.mxu0 %v7784_v30  ;;  %v2356_v5 = vpop.f32.mrf.mxu1 }
 0x1ea   :  { %v1904_v7 = vadd.f32 %v1903_v10, %v6000_v35  ;;  %v6290_v56 = vadd.f32 %v2356_v5, %v1886_v58  ;;  %3100 = vmatprep.mubr.f32.mxu0 %v7785_v57 }
 0x1eb   :  { %v1905_v1 = vpop.f32.mrf.mxu0  ;;  %v2366_v42 = vpop.f32.mrf.mxu1  ;;  %3471 = vmatmul.mubr.f32.gmra.mxu1 %v7782_v15 }
 0x1ec   :  { %v1906_v38 = vadd.f32 %v1905_v1, %v6011_v46  ;;  %v6295_v40 = vadd.f32 %v2366_v42, %v1894_v60  ;;  %3477 = vmatprep.mubr.f32.mxu1 %v7783_v45  ;;  %v7788_v45 = vld [vmem:[#allocation103_spill] sm:$0xff]  ;;  %v7789_v42 = vld [vmem:[#allocation228_spill] sm:$0xff] }
 0x1ed   :  { %v1913_v25 = vpop.f32.mrf.mxu0  ;;  %3102 = vmatmul.mubr.f32.gmra.mxu0 %v7786_v8  ;;  %v2368_v9 = vpop.f32.mrf.mxu1 }
 0x1ee   :  { %v1914_v35 = vadd.f32 %v1913_v25, %v6017_v22  ;;  %v6300_v58 = vadd.f32 %v2368_v9, %v1896_v51  ;;  %3108 = vmatprep.mubr.f32.mxu0 %v7787_v37 }
 0x1ef   :  { %v1915_v10 = vpop.f32.mrf.mxu0  ;;  %v2378_v5 = vpop.f32.mrf.mxu1  ;;  %3479 = vmatmul.mubr.f32.gmra.mxu1 %v7784_v30 }
 0x1f0   :  { %v1916_v46 = vadd.f32 %v1915_v10, %v6027_v39  ;;  %v6305_v15 = vadd.f32 %v2378_v5, %v1904_v7  ;;  %3485 = vmatprep.mubr.f32.mxu1 %v7785_v57  ;;  %v7790_v57 = vld [vmem:[#allocation105_spill] sm:$0xff] }
 0x1f1   :  { %v1923_v60 = vpop.f32.mrf.mxu0  ;;  %3110 = vmatmul.mubr.f32.gmra.mxu0 %v7788_v45  ;;  %v2380_v1 = vpop.f32.mrf.mxu1 }
 0x1f2   :  { %v1924_v22 = vadd.f32 %v1923_v60, %v6032_v50  ;;  %v6310_v51 = vadd.f32 %v2380_v1, %v1906_v38  ;;  %3116 = vmatprep.mubr.f32.mxu0 %v7789_v42 }
 0x1f3   :  { %v1925_v25 = vpop.f32.mrf.mxu0  ;;  %v2390_v9 = vpop.f32.mrf.mxu1  ;;  %3487 = vmatmul.mubr.f32.gmra.mxu1 %v7786_v8 }
 0x1f4   :  { %v1926_v39 = vadd.f32 %v1925_v25, %v6040_v14  ;;  %v6315_v30 = vadd.f32 %v2390_v9, %v1914_v35  ;;  %3493 = vmatprep.mubr.f32.mxu1 %v7787_v37 }
 0x1f5   :  { %v1933_v7 = vpop.f32.mrf.mxu0  ;;  %3118 = vmatmul.mubr.f32.gmra.mxu0 %v7790_v57  ;;  %v2392_v10 = vpop.f32.mrf.mxu1 }
 0x1f6   :  { %v1934_v50 = vadd.f32 %v1933_v7, %v6043_v13  ;;  %v6320_v38 = vadd.f32 %v2392_v10, %v1916_v46 }
 0x1f7   :  { %v1935_v5 = vpop.f32.mrf.mxu0  ;;  %v2402_v60 = vpop.f32.mrf.mxu1  ;;  %3495 = vmatmul.mubr.f32.gmra.mxu1 %v7788_v45 }
 0x1f8   :  { %v1936_v8 = vadd.f32 %v1935_v5, %v6049_v36  ;;  %v6324_v1 = vadd.f32 %v2402_v60, %v1924_v22  ;;  %3501 = vmatprep.mubr.f32.mxu1 %v7789_v42 }
 0x1f9   :  { %v1943_v14 = vpop.f32.mrf.mxu0  ;;  %v2404_v35 = vpop.f32.mrf.mxu1 }
 0x1fa   :  { %v1944_v37 = vadd.f32 %v1943_v14, %v6052_v11  ;;  %v6328_v25 = vadd.f32 %v2404_v35, %v1926_v39 }
 0x1fb   :  { %v1945_v9 = vpop.f32.mrf.mxu0  ;;  %v2414_v13 = vpop.f32.mrf.mxu1  ;;  %3503 = vmatmul.mubr.f32.gmra.mxu1 %v7790_v57 }
 0x1fc   :  { %v1946_v46 = vadd.f32 %v1945_v9, %v6057_v27  ;;  %v6332_v7 = vadd.f32 %v2414_v13, %v1934_v50 }
 0x1fd   :  { %v1953_v45 = vpop.f32.mrf.mxu0  ;;  %v2416_v36 = vpop.f32.mrf.mxu1 }
 0x1fe   :  { %v1954_v22 = vadd.f32 %v1953_v45, %v6060_v26  ;;  %v6335_v10 = vadd.f32 %v2416_v36, %v1936_v8 }
 0x1ff   :  { %v1955_v42 = vpop.f32.mrf.mxu0  ;;  %v2426_v5 = vpop.f32.mrf.mxu1 }
 0x200   :  { %v1956_v11 = vadd.f32 %v1955_v42, %v6065_v2  ;;  %v6338_v39 = vadd.f32 %v2426_v5, %v1944_v37 }
 0x201   :  { %v1963_v60 = vpop.f32.mrf.mxu0  ;;  %v2428_v14 = vpop.f32.mrf.mxu1 }
 0x202   :  { %v1964_v57 = vadd.f32 %v1963_v60, %v6068_v6  ;;  %v6341_v35 = vadd.f32 %v2428_v14, %v1946_v46 }
 0x203   :  { %v1965_v27 = vpop.f32.mrf.mxu0  ;;  %v2438_v50 = vpop.f32.mrf.mxu1 }
 0x204   :  { %v1966_v9 = vadd.f32 %v1965_v27, %v6073_v29  ;;  %v6344_v13 = vadd.f32 %v2438_v50, %v1954_v22 }
 0x205   :  { %v1973_v26 = vpop.f32.mrf.mxu0  ;;  %v2440_v8 = vpop.f32.mrf.mxu1 }
 0x206   :  { %v1974_v45 = vadd.f32 %v1973_v26, %v6076_v52  ;;  %v6347_v36 = vadd.f32 %v2440_v8, %v1956_v11 }
 0x207   :  { %v1975_v2 = vpop.f32.mrf.mxu0  ;;  %v2450_v37 = vpop.f32.mrf.mxu1 }
 0x208   :  { %v1976_v42 = vadd.f32 %v1975_v2, %v6081_v41  ;;  %v6350_v5 = vadd.f32 %v2450_v37, %v1964_v57 }
 0x209   :  { %v1983_v6 = vpop.f32.mrf.mxu0  ;;  %v2452_v46 = vpop.f32.mrf.mxu1 }
 0x20a   :  { %v1984_v60 = vadd.f32 %v1983_v6, %v6084_v19  ;;  %v6353_v14 = vadd.f32 %v2452_v46, %v1966_v9 }
 0x20b   :  { %v1985_v29 = vpop.f32.mrf.mxu0  ;;  %v2462_v22 = vpop.f32.mrf.mxu1 }
 0x20c   :  { %v1986_v27 = vadd.f32 %v1985_v29, %v6089_v34  ;;  %v6356_v50 = vadd.f32 %v2462_v22, %v1974_v45 }
 0x20d   :  { %v1993_v52 = vpop.f32.mrf.mxu0  ;;  %v2464_v11 = vpop.f32.mrf.mxu1 }
 0x20e   :  { %v1994_v26 = vadd.f32 %v1993_v52, %v6092_v59  ;;  %v6359_v8 = vadd.f32 %v2464_v11, %v1976_v42 }
 0x20f   :  { %v1995_v41 = vpop.f32.mrf.mxu0  ;;  %v2474_v57 = vpop.f32.mrf.mxu1 }
 0x210   :  { %v1996_v2 = vadd.f32 %v1995_v41, %v6097_v61  ;;  %v6362_v37 = vadd.f32 %v2474_v57, %v1984_v60  ;;  %v7795_v41 = vld [vmem:[#allocation95_spill] sm:$0xff] }
 0x211   :  { %v2003_v19 = vpop.f32.mrf.mxu0  ;;  %v2476_v9 = vpop.f32.mrf.mxu1 }
 0x212   :  { %7791 = vst [vmem:[#allocation17_spill] sm:$0xff] %v6362_v37  ;;  %v2004_v6 = vadd.f32 %v2003_v19, %v6100_v44  ;;  %v6365_v46 = vadd.f32 %v2476_v9, %v1986_v27  ;;  %v7797_v19 = vld [vmem:[#allocation98_spill] sm:$0xff] }
 0x213   :  { %v2005_v34 = vpop.f32.mrf.mxu0  ;;  %v2486_v45 = vpop.f32.mrf.mxu1 }
 0x214   :  { %7792 = vst [vmem:[#allocation117_spill] sm:$0xff] %v6365_v46  ;;  %v2006_v29 = vadd.f32 %v2005_v34, %v6105_v12  ;;  %v6368_v22 = vadd.f32 %v2486_v45, %v1994_v26  ;;  %v7799_v34 = vld [vmem:[#allocation100_spill] sm:$0xff] }
 0x215   :  { %v2013_v59 = vpop.f32.mrf.mxu0  ;;  %v2488_v42 = vpop.f32.mrf.mxu1 }
 0x216   :  { %7793 = vst [vmem:[#allocation121_spill] sm:$0xff] %v6368_v22  ;;  %v2014_v52 = vadd.f32 %v2013_v59, %v6108_v33  ;;  %v6371_v11 = vadd.f32 %v2488_v42, %v1996_v2  ;;  %v7801_v59 = vld [vmem:[#allocation112_spill] sm:$0xff] }
 0x217   :  { %v2015_v61 = vpop.f32.mrf.mxu0  ;;  %v2498_v60 = vpop.f32.mrf.mxu1 }
 0x218   :  { %7794 = vst [vmem:[#allocation20_spill] sm:$0xff] %v6371_v11  ;;  %v2016_v57 = vadd.f32 %v2015_v61, %v7795_v41  ;;  %v6374_v37 = vadd.f32 %v2498_v60, %v2004_v6  ;;  %v7803_v60 = vld [vmem:[#allocation102_spill] sm:$0xff] }
 0x219   :  { %v2023_v44 = vpop.f32.mrf.mxu0  ;;  %v2500_v27 = vpop.f32.mrf.mxu1 }
 0x21a   :  { %7796 = vst [vmem:[#allocation124_spill] sm:$0xff] %v6374_v37  ;;  %v2024_v9 = vadd.f32 %v2023_v44, %v7797_v19  ;;  %v6377_v46 = vadd.f32 %v2500_v27, %v2006_v29  ;;  %v7805_v27 = vld [vmem:[#allocation104_spill] sm:$0xff] }
 0x21b   :  { %v2025_v12 = vpop.f32.mrf.mxu0  ;;  %v2510_v26 = vpop.f32.mrf.mxu1 }
 0x21c   :  { %7798 = vst [vmem:[#allocation12_spill] sm:$0xff] %v6377_v46  ;;  %v2026_v45 = vadd.f32 %v2025_v12, %v7799_v34  ;;  %v6380_v22 = vadd.f32 %v2510_v26, %v2014_v52  ;;  %v7807_v26 = vld [vmem:[#allocation118_spill] sm:$0xff] }
 0x21d   :  { %v2033_v33 = vpop.f32.mrf.mxu0  ;;  %v2512_v2 = vpop.f32.mrf.mxu1 }
 0x21e   :  { %7800 = vst [vmem:[#allocation125_spill] sm:$0xff] %v6380_v22  ;;  %v2034_v42 = vadd.f32 %v2033_v33, %v7801_v59  ;;  %v6383_v11 = vadd.f32 %v2512_v2, %v2016_v57  ;;  %v7809_v2 = vld [vmem:[#allocation107_spill] sm:$0xff] }
 0x21f   :  { %v2035_v6 = vpop.f32.mrf.mxu0  ;;  %v2522_v61 = vpop.f32.mrf.mxu1 }
 0x220   :  { %7802 = vst [vmem:[#allocation13_spill] sm:$0xff] %v6383_v11  ;;  %v2036_v41 = vadd.f32 %v2035_v6, %v7803_v60  ;;  %v6386_v37 = vadd.f32 %v2522_v61, %v2024_v9  ;;  %v7811_v61 = vld [vmem:[#allocation108_spill] sm:$0xff] }
 0x221   :  { %v2043_v29 = vpop.f32.mrf.mxu0  ;;  %v2524_v44 = vpop.f32.mrf.mxu1 }
 0x222   :  { %7804 = vst [vmem:[#allocation130_spill] sm:$0xff] %v6386_v37  ;;  %v2044_v19 = vadd.f32 %v2043_v29, %v7805_v27  ;;  %v6389_v46 = vadd.f32 %v2524_v44, %v2026_v45  ;;  %v7813_v44 = vld [vmem:[#allocation120_spill] sm:$0xff] }
 0x223   :  { %v2045_v52 = vpop.f32.mrf.mxu0  ;;  %v2534_v12 = vpop.f32.mrf.mxu1 }
 0x224   :  { %7806 = vst [vmem:[#allocation131_spill] sm:$0xff] %v6389_v46  ;;  %v2046_v34 = vadd.f32 %v2045_v52, %v7807_v26  ;;  %v6392_v22 = vadd.f32 %v2534_v12, %v2034_v42  ;;  %v7815_v12 = vld [vmem:[#allocation110_spill] sm:$0xff] }
 0x225   :  { %v2053_v57 = vpop.f32.mrf.mxu0  ;;  %v2536_v33 = vpop.f32.mrf.mxu1 }
 0x226   :  { %7808 = vst [vmem:[#allocation22_spill] sm:$0xff] %v6392_v22  ;;  %v2054_v59 = vadd.f32 %v2053_v57, %v7809_v2  ;;  %v6395_v11 = vadd.f32 %v2536_v33, %v2036_v41  ;;  %v7817_v33 = vld [vmem:[#allocation14_spill] sm:$0xff] }
 0x227   :  { %v2055_v9 = vpop.f32.mrf.mxu0  ;;  %v2546_v6 = vpop.f32.mrf.mxu1 }
 0x228   :  { %7810 = vst [vmem:[#allocation24_spill] sm:$0xff] %v6395_v11  ;;  %v2056_v60 = vadd.f32 %v2055_v9, %v7811_v61  ;;  %v6398_v37 = vadd.f32 %v2546_v6, %v2044_v19  ;;  %v7818_v6 = vld [vmem:[#allocation113_spill] sm:$0xff] }
 0x229   :  { %v2063_v45 = vpop.f32.mrf.mxu0  ;;  %v2548_v29 = vpop.f32.mrf.mxu1 }
 0x22a   :  { %7812 = vst [vmem:[#allocation133_spill] sm:$0xff] %v6398_v37  ;;  %v2064_v27 = vadd.f32 %v2063_v45, %v7813_v44  ;;  %v6401_v46 = vadd.f32 %v2548_v29, %v2046_v34  ;;  %v7819_v29 = vld [vmem:[#allocation115_spill] sm:$0xff] }
 0x22b   :  { %v2065_v42 = vpop.f32.mrf.mxu0  ;;  %v2558_v52 = vpop.f32.mrf.mxu1 }
 0x22c   :  { %7814 = vst [vmem:[#allocation134_spill] sm:$0xff] %v6401_v46  ;;  %v2066_v26 = vadd.f32 %v2065_v42, %v7815_v12  ;;  %v6404_v22 = vadd.f32 %v2558_v52, %v2054_v59  ;;  %v3706_v59 = vlaneseq  ;;  %v7821_v12 = vld [vmem:[#allocation15_spill] sm:$0xff] }
 0x22d   :  { %v2073_v41 = vpop.f32.mrf.mxu0  ;;  %v2560_v57 = vpop.f32.mrf.mxu1 }
 0x22e   :  { %7816 = vst [vmem:[#allocation135_spill] sm:$0xff] %v6404_v22  ;;  %v2074_v2 = vadd.f32 %v2073_v41, %v7817_v33  ;;  %v6407_v11 = vadd.f32 %v2560_v57, %v2056_v60 }
 0x22f   :  { %v2075_v19 = vpop.f32.mrf.mxu0  ;;  %v2570_v9 = vpop.f32.mrf.mxu1 }
 0x230   :  { %v2076_v61 = vadd.f32 %v2075_v19, %v7818_v6  ;;  %v6410_v37 = vadd.f32 %v2570_v9, %v2064_v27  ;;  %v3707_v27 = vshrl.u32 %v3706_v59, 7 }
 0x231   :  { %v2083_v34 = vpop.f32.mrf.mxu0  ;;  %v2572_v45 = vpop.f32.mrf.mxu1 }
 0x232   :  { %v2084_v44 = vadd.f32 %v2083_v34, %v7819_v29  ;;  %v6413_v46 = vadd.f32 %v2572_v45, %v2066_v26  ;;  %v3712_v59 = vsub.s32 1, %v3707_v27 }
 0x233   :  { %v2085_v42 = vpop.f32.mrf.mxu0  ;;  %v2582_v52 = vpop.f32.mrf.mxu1 }
 0x234   :  { %7820 = vst [vmem:[#allocation137_spill] sm:$0xff] %v6413_v46  ;;  %v2086_v22 = vadd.f32 %v2085_v42, %v7821_v12  ;;  %v6416_v41 = vadd.f32 %v2582_v52, %v2074_v2  ;;  %v3708_v42 = vsub.s32 0, %v3707_v27 }
 0x235   :  { %v2093_v60 = vpop.f32.mrf.mxu0  ;;  %v2584_v57 = vpop.f32.mrf.mxu1 }
 0x236   :  { %v2094_v33 = vadd.f32 %v2093_v60, %v6175_v55  ;;  %v6419_v19 = vadd.f32 %v2584_v57, %v2076_v61  ;;  %v3704_v55 = vld [vmem:[%s6573_s2] sm:$0x3]  ;;  %s3937_s2 = smov [#allocation8]  }
 0x237   :  { %v2095_v9 = vpop.f32.mrf.mxu0  ;;  %v2594_v6 = vpop.f32.mrf.mxu1  ;;  %v6434_v57 = vrot.slane %v3704_v55, %v3708_v42  ;;  %s3849_s24 = sshll.u32 %s3937_s2, 4  ;;  %s3850_s24 = int_to_ptr.vmem [resolvable:$true] %s3849_s24 }
 0x238   :  { %7822 = vst [vmem:[#allocation140_spill] sm:$0xff] %v6419_v19  ;;  %v2096_v34 = vadd.f32 %v2095_v9, %v6180_v23  ;;  %v6422_v26 = vadd.f32 %v2594_v6, %v2084_v44  ;;  %s3907_s25 = scalar_lea.vmem %s3850_s24, 8192  ;;  %p3912_p11 = scmp.lt.s32.totalorder %s3850_s24, %s3850_s24 }
 0x239   :  { %v2871_v45 = vpop.f32.mrf.mxu0  ;;  %v2596_v29 = vpop.f32.mrf.mxu1  ;;  %p3908_p10 = scmp.ne.s32.totalorder %s3850_s24, %s3907_s25  ;;  %p3913_p12 = scmp.lt.s32.totalorder %s3907_s25, %s3907_s25 }
 0x23a   :  { %7823 = vst [vmem:[#allocation30_spill] sm:$0xff] %v6422_v26  ;;  %v6424_v46 = vadd.f32 %v2596_v29, %v2086_v22  ;;  %v2872_v23 = vadd.f32 %v2871_v45, %v6185_v48 }
 0x23b   :  { %v2873_v2 = vpop.f32.mrf.mxu0  ;;  %v2606_v52 = vpop.f32.mrf.mxu1  ;;  %p3914_p13 = por %p3913_p12, %p3912_p11 }
 0x23c   :  { %7824 = vst [vmem:[#allocation32_spill] sm:$0xff] %v6424_v46  ;;  %v6429_v61 = vadd.f32 %v2606_v52, %v2094_v33  ;;  %v2874_v6 = vadd.f32 %v2873_v2, %v6190_v43  ;;  %v6437_v46 = vrot.slane %v3704_v55, %v3712_v59 }
 0x23d   :  { %v2879_v12 = vpop.f32.mrf.mxu0  ;;  %v2608_v60 = vpop.f32.mrf.mxu1  ;;  %p3915_p0 = pnand %p3914_p13, %p3908_p10 }
 0x23e   :  { %7825 = vst [vmem:[#allocation18_spill] sm:$0xff] %v6429_v61  ;;  %v6432_v44 = vadd.f32 %v2608_v60, %v2096_v34  ;;  %v2880_v33 = vadd.f32 %v2879_v12, %v6195_v54 }
 0x23f   :  { %v2881_v22 = vpop.f32.mrf.mxu0  ;;  %v3256_v9 = vpop.f32.mrf.mxu1 }
 0x240   :  { %v3257_v29 = vadd.f32 %v3256_v9, %v2872_v23  ;;  %v2882_v34 = vadd.f32 %v2881_v22, %v6200_v47 }
 0x241   :  { %v2887_v26 = vpop.f32.mrf.mxu0  ;;  %v3258_v19 = vpop.f32.mrf.mxu1 }
 0x242   :  { %v3716_v27 = vadd.f32 %v6434_v57, %v3257_v29  ;;  %v3259_v52 = vadd.f32 %v3258_v19, %v2874_v6  ;;  %v2888_v2 = vadd.f32 %v2887_v26, %v6205_v21 }
 0x243   :  { %v2889_v61 = vpop.f32.mrf.mxu0  ;;  %v3264_v48 = vpop.f32.mrf.mxu1 }
 0x244   :  { %3780 = vst [vmem:[#allocation8] sm:$0xff] %v3716_v27  ;;  %v3717_v45 = vadd.f32 %v6437_v46, %v3259_v52  ;;  %v3265_v42 = vadd.f32 %v3264_v48, %v2880_v33  ;;  %v2890_v19 = vadd.f32 %v2889_v61, %v6210_v4 }
 0x245   :  { %v2895_v60 = vpop.f32.mrf.mxu0  ;;  %v3266_v43 = vpop.f32.mrf.mxu1 }
 0x246   :  { %3781 = vst [vmem:[#allocation8 + $0x8] sm:$0xff] %v3717_v45  ;;  %v3718_v55 = vadd.f32 %v6434_v57, %v3265_v42  ;;  %v3267_v59 = vadd.f32 %v3266_v43, %v2882_v34  ;;  %v2896_v6 = vadd.f32 %v2895_v60, %v6215_v0 }
 0x247   :  { %v2897_v54 = vpop.f32.mrf.mxu0  ;;  %v3272_v12 = vpop.f32.mrf.mxu1 }
 0x248   :  { %3782 = vst [vmem:[#allocation8 + $0x10] sm:$0xff] %v3718_v55  ;;  %v3719_v23 = vadd.f32 %v6437_v46, %v3267_v59  ;;  %v3273_v47 = vadd.f32 %v3272_v12, %v2888_v2  ;;  %v2898_v27 = vadd.f32 %v2897_v54, %v6220_v16 }
 0x249   :  { %v2903_v22 = vpop.f32.mrf.mxu0  ;;  %v3274_v9 = vpop.f32.mrf.mxu1 }
 0x24a   :  { %3783 = vst [vmem:[#allocation8 + $0x18] sm:$0xff] %v3719_v23  ;;  %v3720_v29 = vadd.f32 %v6434_v57, %v3273_v47  ;;  %v3275_v21 = vadd.f32 %v3274_v9, %v2890_v19  ;;  %v2904_v34 = vadd.f32 %v2903_v22, %v6225_v63  ;;  %v7826_v47 = vld [vmem:[#allocation16_spill] sm:$0xff] }
 0x24b   :  { %v2905_v26 = vpop.f32.mrf.mxu0  ;;  %v3280_v33 = vpop.f32.mrf.mxu1 }
 0x24c   :  { %3784 = vst [vmem:[#allocation8 + $0x20] sm:$0xff] %v3720_v29  ;;  %v3721_v52 = vadd.f32 %v6437_v46, %v3275_v21  ;;  %v3281_v4 = vadd.f32 %v3280_v33, %v2896_v6  ;;  %v2906_v43 = vadd.f32 %v2905_v26, %v6230_v32 }
 0x24d   :  { %v2911_v61 = vpop.f32.mrf.mxu0  ;;  %v3282_v48 = vpop.f32.mrf.mxu1 }
 0x24e   :  { %3785 = vst [vmem:[#allocation8 + $0x28] sm:$0xff] %v3721_v52  ;;  %v3722_v45 = vadd.f32 %v6434_v57, %v3281_v4  ;;  %v3283_v0 = vadd.f32 %v3282_v48, %v2898_v27  ;;  %v2912_v54 = vadd.f32 %v2911_v61, %v6235_v28 }
 0x24f   :  { %v2913_v42 = vpop.f32.mrf.mxu0  ;;  %v3288_v60 = vpop.f32.mrf.mxu1 }
 0x250   :  { %3786 = vst [vmem:[#allocation8 + $0x30] sm:$0xff] %v3722_v45  ;;  %v3723_v2 = vadd.f32 %v6437_v46, %v3283_v0  ;;  %v3289_v16 = vadd.f32 %v3288_v60, %v2904_v34  ;;  %v2914_v22 = vadd.f32 %v2913_v42, %v7826_v47 }
 0x251   :  { %v2919_v55 = vpop.f32.mrf.mxu0  ;;  %v3290_v59 = vpop.f32.mrf.mxu1 }
 0x252   :  { %3787 = vst [vmem:[#allocation8 + $0x38] sm:$0xff] %v3723_v2  ;;  %v3724_v12 = vadd.f32 %v6434_v57, %v3289_v16  ;;  %v3291_v63 = vadd.f32 %v3290_v59, %v2906_v43  ;;  %v2920_v21 = vadd.f32 %v2919_v55, %v6245_v49 }
 0x253   :  { %v2921_v19 = vpop.f32.mrf.mxu0  ;;  %v3296_v23 = vpop.f32.mrf.mxu1 }
 0x254   :  { %3788 = vst [vmem:[#allocation8 + $0x40] sm:$0xff] %v3724_v12  ;;  %v3725_v9 = vadd.f32 %v6437_v46, %v3291_v63  ;;  %v3297_v32 = vadd.f32 %v3296_v23, %v2912_v54  ;;  %v2922_v52 = vadd.f32 %v2921_v19, %v6250_v53 }
 0x255   :  { %v2927_v6 = vpop.f32.mrf.mxu0  ;;  %v3298_v29 = vpop.f32.mrf.mxu1 }
 0x256   :  { %3789 = vst [vmem:[#allocation8 + $0x48] sm:$0xff] %v3725_v9  ;;  %v3726_v26 = vadd.f32 %v6434_v57, %v3297_v32  ;;  %v3299_v28 = vadd.f32 %v3298_v29, %v2914_v22  ;;  %v2928_v45 = vadd.f32 %v2927_v6, %v6255_v62 }
 0x257   :  { %v2929_v33 = vpop.f32.mrf.mxu0  ;;  %v3304_v27 = vpop.f32.mrf.mxu1 }
 0x258   :  { %3790 = vst [vmem:[#allocation8 + $0x50] sm:$0xff] %v3726_v26  ;;  %v3727_v4 = vadd.f32 %v6437_v46, %v3299_v28  ;;  %v3305_v61 = vadd.f32 %v3304_v27, %v2920_v21  ;;  %v2930_v43 = vadd.f32 %v2929_v33, %v6260_v20 }
 0x259   :  { %v2935_v48 = vpop.f32.mrf.mxu0  ;;  %v3306_v34 = vpop.f32.mrf.mxu1 }
 0x25a   :  { %3791 = vst [vmem:[#allocation8 + $0x58] sm:$0xff] %v3727_v4  ;;  %v3728_v0 = vadd.f32 %v6434_v57, %v3305_v61  ;;  %v3307_v49 = vadd.f32 %v3306_v34, %v2922_v52  ;;  %v2936_v59 = vadd.f32 %v2935_v48, %v6265_v31 }
 0x25b   :  { %v2937_v42 = vpop.f32.mrf.mxu0  ;;  %v3312_v60 = vpop.f32.mrf.mxu1 }
 0x25c   :  { %3792 = vst [vmem:[#allocation8 + $0x60] sm:$0xff] %v3728_v0  ;;  %v3729_v2 = vadd.f32 %v6437_v46, %v3307_v49  ;;  %v3313_v53 = vadd.f32 %v3312_v60, %v2928_v45  ;;  %v2938_v19 = vadd.f32 %v2937_v42, %v6270_v3 }
 0x25d   :  { %v2943_v16 = vpop.f32.mrf.mxu0  ;;  %v3314_v55 = vpop.f32.mrf.mxu1 }
 0x25e   :  { %3793 = vst [vmem:[#allocation8 + $0x68] sm:$0xff] %v3729_v2  ;;  %v3730_v54 = vadd.f32 %v6434_v57, %v3313_v53  ;;  %v3315_v62 = vadd.f32 %v3314_v55, %v2930_v43  ;;  %v2944_v9 = vadd.f32 %v2943_v16, %v6275_v18 }
 0x25f   :  { %v2945_v12 = vpop.f32.mrf.mxu0  ;;  %v3320_v63 = vpop.f32.mrf.mxu1 }
 0x260   :  { %3794 = vst [vmem:[#allocation8 + $0x70] sm:$0xff] %v3730_v54  ;;  %v3731_v23 = vadd.f32 %v6437_v46, %v3315_v62  ;;  %v3321_v20 = vadd.f32 %v3320_v63, %v2936_v59  ;;  %v2946_v21 = vadd.f32 %v2945_v12, %v6280_v17 }
 0x261   :  { %v2951_v47 = vpop.f32.mrf.mxu0  ;;  %v3322_v22 = vpop.f32.mrf.mxu1 }
 0x262   :  { %3795 = vst [vmem:[#allocation8 + $0x78] sm:$0xff] %v3731_v23  ;;  %v3732_v32 = vadd.f32 %v6434_v57, %v3321_v20  ;;  %v3323_v31 = vadd.f32 %v3322_v22, %v2938_v19  ;;  %v2952_v27 = vadd.f32 %v2951_v47, %v6285_v24 }
 0x263   :  { %v2953_v6 = vpop.f32.mrf.mxu0  ;;  %v3328_v29 = vpop.f32.mrf.mxu1 }
 0x264   :  { %3796 = vst [vmem:[#allocation8 + $0x80] sm:$0xff] %v3732_v32  ;;  %v3733_v26 = vadd.f32 %v6437_v46, %v3323_v31  ;;  %v3329_v3 = vadd.f32 %v3328_v29, %v2944_v9  ;;  %v2954_v48 = vadd.f32 %v2953_v6, %v6290_v56 }
 0x265   :  { %v2959_v28 = vpop.f32.mrf.mxu0  ;;  %v3330_v33 = vpop.f32.mrf.mxu1 }
 0x266   :  { %3797 = vst [vmem:[#allocation8 + $0x88] sm:$0xff] %v3733_v26  ;;  %v3734_v52 = vadd.f32 %v6434_v57, %v3329_v3  ;;  %v3331_v18 = vadd.f32 %v3330_v33, %v2946_v21  ;;  %v2960_v49 = vadd.f32 %v2959_v28, %v6295_v40 }
 0x267   :  { %v2961_v4 = vpop.f32.mrf.mxu0  ;;  %v3336_v61 = vpop.f32.mrf.mxu1 }
 0x268   :  { %3798 = vst [vmem:[#allocation8 + $0x90] sm:$0xff] %v3734_v52  ;;  %v3735_v34 = vadd.f32 %v6437_v46, %v3331_v18  ;;  %v3337_v17 = vadd.f32 %v3336_v61, %v2952_v27  ;;  %v2962_v2 = vadd.f32 %v2961_v4, %v6300_v58 }
 0x269   :  { %v2967_v45 = vpop.f32.mrf.mxu0  ;;  %v3338_v0 = vpop.f32.mrf.mxu1 }
 0x26a   :  { %3799 = vst [vmem:[#allocation8 + $0x98] sm:$0xff] %v3735_v34  ;;  %v3736_v42 = vadd.f32 %v6434_v57, %v3337_v17  ;;  %v3339_v24 = vadd.f32 %v3338_v0, %v2954_v48  ;;  %v2968_v59 = vadd.f32 %v2967_v45, %v6305_v15 }
 0x26b   :  { %v2969_v60 = vpop.f32.mrf.mxu0  ;;  %v3344_v43 = vpop.f32.mrf.mxu1 }
 0x26c   :  { %3800 = vst [vmem:[#allocation8 + $0xa0] sm:$0xff] %v3736_v42  ;;  %v3737_v53 = vadd.f32 %v6437_v46, %v3339_v24  ;;  %v3345_v56 = vadd.f32 %v3344_v43, %v2960_v49  ;;  %v2970_v63 = vadd.f32 %v2969_v60, %v6310_v51 }
 0x26d   :  { %v2975_v16 = vpop.f32.mrf.mxu0  ;;  %v3346_v55 = vpop.f32.mrf.mxu1 }
 0x26e   :  { %3801 = vst [vmem:[#allocation8 + $0xa8] sm:$0xff] %v3737_v53  ;;  %v3738_v54 = vadd.f32 %v6434_v57, %v3345_v56  ;;  %v3347_v40 = vadd.f32 %v3346_v55, %v2962_v2  ;;  %v2976_v47 = vadd.f32 %v2975_v16, %v6315_v30 }
 0x26f   :  { %v2977_v62 = vpop.f32.mrf.mxu0  ;;  %v3352_v12 = vpop.f32.mrf.mxu1 }
 0x270   :  { %3802 = vst [vmem:[#allocation8 + $0xb0] sm:$0xff] %v3738_v54  ;;  %v3739_v19 = vadd.f32 %v6437_v46, %v3347_v40  ;;  %v3353_v58 = vadd.f32 %v3352_v12, %v2968_v59  ;;  %v2978_v31 = vadd.f32 %v2977_v62, %v6320_v38 }
 0x271   :  { %v2983_v23 = vpop.f32.mrf.mxu0  ;;  %v3354_v20 = vpop.f32.mrf.mxu1 }
 0x272   :  { %3803 = vst [vmem:[#allocation8 + $0xb8] sm:$0xff] %v3739_v19  ;;  %v3740_v22 = vadd.f32 %v6434_v57, %v3353_v58  ;;  %v3355_v15 = vadd.f32 %v3354_v20, %v2970_v63  ;;  %v2984_v26 = vadd.f32 %v2983_v23, %v6324_v1 }
 0x273   :  { %v2985_v9 = vpop.f32.mrf.mxu0  ;;  %v3360_v32 = vpop.f32.mrf.mxu1 }
 0x274   :  { %3804 = vst [vmem:[#allocation8 + $0xc0] sm:$0xff] %v3740_v22  ;;  %v3741_v6 = vadd.f32 %v6437_v46, %v3355_v15  ;;  %v3361_v51 = vadd.f32 %v3360_v32, %v2976_v47  ;;  %v2986_v27 = vadd.f32 %v2985_v9, %v6328_v25 }
 0x275   :  { %v2991_v29 = vpop.f32.mrf.mxu0  ;;  %v3362_v21 = vpop.f32.mrf.mxu1 }
 0x276   :  { %3805 = vst [vmem:[#allocation8 + $0xc8] sm:$0xff] %v3741_v6  ;;  %v3742_v3 = vadd.f32 %v6434_v57, %v3361_v51  ;;  %v3363_v30 = vadd.f32 %v3362_v21, %v2978_v31  ;;  %v2992_v61 = vadd.f32 %v2991_v29, %v6332_v7 }
 0x277   :  { %v2993_v28 = vpop.f32.mrf.mxu0  ;;  %v3368_v33 = vpop.f32.mrf.mxu1 }
 0x278   :  { %3806 = vst [vmem:[#allocation8 + $0xd0] sm:$0xff] %v3742_v3  ;;  %v3743_v52 = vadd.f32 %v6437_v46, %v3363_v30  ;;  %v3369_v38 = vadd.f32 %v3368_v33, %v2984_v26  ;;  %v2994_v45 = vadd.f32 %v2993_v28, %v6335_v10  ;;  %v7827_v33 = vld [vmem:[#allocation17_spill] sm:$0xff] }
 0x279   :  { %v2999_v18 = vpop.f32.mrf.mxu0  ;;  %v3370_v4 = vpop.f32.mrf.mxu1 }
 0x27a   :  { %3807 = vst [vmem:[#allocation8 + $0xd8] sm:$0xff] %v3743_v52  ;;  %v3744_v48 = vadd.f32 %v6434_v57, %v3369_v38  ;;  %v3371_v1 = vadd.f32 %v3370_v4, %v2986_v27  ;;  %v3000_v24 = vadd.f32 %v2999_v18, %v6338_v39  ;;  %v7828_v4 = vld [vmem:[#allocation117_spill] sm:$0xff] }
 0x27b   :  { %v3001_v34 = vpop.f32.mrf.mxu0  ;;  %v3376_v17 = vpop.f32.mrf.mxu1 }
 0x27c   :  { %3808 = vst [vmem:[#allocation8 + $0xe0] sm:$0xff] %v3744_v48  ;;  %v3745_v0 = vadd.f32 %v6437_v46, %v3371_v1  ;;  %v3377_v25 = vadd.f32 %v3376_v17, %v2992_v61  ;;  %v3002_v53 = vadd.f32 %v3001_v34, %v6341_v35  ;;  %v7829_v17 = vld [vmem:[#allocation121_spill] sm:$0xff] }
 0x27d   :  { %v3007_v49 = vpop.f32.mrf.mxu0  ;;  %v3378_v42 = vpop.f32.mrf.mxu1 }
 0x27e   :  { %3809 = vst [vmem:[#allocation8 + $0xe8] sm:$0xff] %v3745_v0  ;;  %v3746_v60 = vadd.f32 %v6434_v57, %v3377_v25  ;;  %v3379_v7 = vadd.f32 %v3378_v42, %v2994_v45  ;;  %v3008_v59 = vadd.f32 %v3007_v49, %v6344_v13 }
 0x27f   :  { %v3009_v43 = vpop.f32.mrf.mxu0  ;;  %v3384_v2 = vpop.f32.mrf.mxu1 }
 0x280   :  { %3810 = vst [vmem:[#allocation8 + $0xf0] sm:$0xff] %v3746_v60  ;;  %v3747_v56 = vadd.f32 %v6437_v46, %v3379_v7  ;;  %v3385_v10 = vadd.f32 %v3384_v2, %v3000_v24  ;;  %v3010_v12 = vadd.f32 %v3009_v43, %v6347_v36  ;;  %v7830_v24 = vld [vmem:[#allocation20_spill] sm:$0xff] }
 0x281   :  { %v3015_v16 = vpop.f32.mrf.mxu0  ;;  %v3386_v55 = vpop.f32.mrf.mxu1 }
 0x282   :  { %3811 = vst [vmem:[#allocation8 + $0xf8] sm:$0xff] %v3747_v56  ;;  %v3748_v54 = vadd.f32 %v6434_v57, %v3385_v10  ;;  %v3387_v39 = vadd.f32 %v3386_v55, %v3002_v53  ;;  %v3016_v23 = vadd.f32 %v3015_v16, %v6350_v5  ;;  %v7831_v56 = vld [vmem:[#allocation124_spill] sm:$0xff] }
 0x283   :  { %v3017_v40 = vpop.f32.mrf.mxu0  ;;  %v3392_v62 = vpop.f32.mrf.mxu1 }
 0x284   :  { %3812 = vst [vmem:[#allocation8 + $0x100] sm:$0xff] %v3748_v54  ;;  %v3749_v63 = vadd.f32 %v6437_v46, %v3387_v39  ;;  %v3393_v35 = vadd.f32 %v3392_v62, %v3008_v59  ;;  %v3018_v15 = vadd.f32 %v3017_v40, %v6353_v14  ;;  %v7832_v39 = vld [vmem:[#allocation12_spill] sm:$0xff] }
 0x285   :  { %v3023_v19 = vpop.f32.mrf.mxu0  ;;  %v3394_v58 = vpop.f32.mrf.mxu1 }
 0x286   :  { %3813 = vst [vmem:[#allocation8 + $0x108] sm:$0xff] %v3749_v63  ;;  %v3750_v20 = vadd.f32 %v6434_v57, %v3393_v35  ;;  %v3395_v13 = vadd.f32 %v3394_v58, %v3010_v12  ;;  %v3024_v6 = vadd.f32 %v3023_v19, %v6356_v50  ;;  %v7833_v19 = vld [vmem:[#allocation125_spill] sm:$0xff] }
 0x287   :  { %v3025_v47 = vpop.f32.mrf.mxu0  ;;  %v3400_v22 = vpop.f32.mrf.mxu1 }
 0x288   :  { %3814 = vst [vmem:[#allocation8 + $0x110] sm:$0xff] %v3750_v20  ;;  %v3751_v9 = vadd.f32 %v6437_v46, %v3395_v13  ;;  %v3401_v36 = vadd.f32 %v3400_v22, %v3016_v23  ;;  %v3026_v26 = vadd.f32 %v3025_v47, %v6359_v8  ;;  %v7834_v22 = vld [vmem:[#allocation13_spill] sm:$0xff] }
 0x289   :  { %v3031_v32 = vpop.f32.mrf.mxu0  ;;  %v3402_v31 = vpop.f32.mrf.mxu1 }
 0x28a   :  { %3815 = vst [vmem:[#allocation8 + $0x118] sm:$0xff] %v3751_v9  ;;  %v3752_v51 = vadd.f32 %v6434_v57, %v3401_v36  ;;  %v3403_v5 = vadd.f32 %v3402_v31, %v3018_v15  ;;  %v3032_v27 = vadd.f32 %v3031_v32, %v7827_v33 }
 0x28b   :  { %v3033_v29 = vpop.f32.mrf.mxu0  ;;  %v3408_v21 = vpop.f32.mrf.mxu1 }
 0x28c   :  { %3816 = vst [vmem:[#allocation8 + $0x120] sm:$0xff] %v3752_v51  ;;  %v3753_v3 = vadd.f32 %v6437_v46, %v3403_v5  ;;  %v3409_v14 = vadd.f32 %v3408_v21, %v3024_v6  ;;  %v3034_v61 = vadd.f32 %v3033_v29, %v7828_v4  ;;  %v7835_v6 = vld [vmem:[#allocation130_spill] sm:$0xff] }
 0x28d   :  { %v3039_v30 = vpop.f32.mrf.mxu0  ;;  %v3410_v28 = vpop.f32.mrf.mxu1 }
 0x28e   :  { %3817 = vst [vmem:[#allocation8 + $0x128] sm:$0xff] %v3753_v3  ;;  %v3754_v52 = vadd.f32 %v6434_v57, %v3409_v14  ;;  %v3411_v50 = vadd.f32 %v3410_v28, %v3026_v26  ;;  %v3040_v45 = vadd.f32 %v3039_v30, %v7829_v17  ;;  %v7836_v3 = vld [vmem:[#allocation131_spill] sm:$0xff] }
 0x28f   :  { %v3041_v38 = vpop.f32.mrf.mxu0  ;;  %v3416_v18 = vpop.f32.mrf.mxu1 }
 0x290   :  { %3818 = vst [vmem:[#allocation8 + $0x130] sm:$0xff] %v3754_v52  ;;  %v3755_v48 = vadd.f32 %v6437_v46, %v3411_v50  ;;  %v3417_v8 = vadd.f32 %v3416_v18, %v3032_v27  ;;  %v3042_v60 = vadd.f32 %v3041_v38, %v7830_v24  ;;  %v7837_v52 = vld [vmem:[#allocation22_spill] sm:$0xff] }
 0x291   :  { %v3047_v1 = vpop.f32.mrf.mxu0  ;;  %v3418_v34 = vpop.f32.mrf.mxu1 }
 0x292   :  { %3819 = vst [vmem:[#allocation8 + $0x138] sm:$0xff] %v3755_v48  ;;  %v3756_v0 = vadd.f32 %v6434_v57, %v3417_v8  ;;  %v3419_v25 = vadd.f32 %v3418_v34, %v3034_v61  ;;  %v3048_v10 = vadd.f32 %v3047_v1, %v7831_v56  ;;  %v7838_v48 = vld [vmem:[#allocation24_spill] sm:$0xff] }
 0x293   :  { %v3049_v49 = vpop.f32.mrf.mxu0  ;;  %v3424_v42 = vpop.f32.mrf.mxu1 }
 0x294   :  { %3820 = vst [vmem:[#allocation8 + $0x140] sm:$0xff] %v3756_v0  ;;  %v3757_v7 = vadd.f32 %v6437_v46, %v3419_v25  ;;  %v3425_v43 = vadd.f32 %v3424_v42, %v3040_v45  ;;  %v3050_v40 = vadd.f32 %v3049_v49, %v7832_v39  ;;  %v7839_v0 = vld [vmem:[#allocation133_spill] sm:$0xff] }
 0x295   :  { %v3055_v2 = vpop.f32.mrf.mxu0  ;;  %v3426_v53 = vpop.f32.mrf.mxu1 }
 0x296   :  { %3821 = vst [vmem:[#allocation8 + $0x148] sm:$0xff] %v3757_v7  ;;  %v3758_v16 = vadd.f32 %v6434_v57, %v3425_v43  ;;  %v3427_v55 = vadd.f32 %v3426_v53, %v3042_v60  ;;  %v3056_v58 = vadd.f32 %v3055_v2, %v7833_v19  ;;  %v7840_v7 = vld [vmem:[#allocation134_spill] sm:$0xff] }
 0x297   :  { %v3057_v59 = vpop.f32.mrf.mxu0  ;;  %v3432_v54 = vpop.f32.mrf.mxu1 }
 0x298   :  { %3822 = vst [vmem:[#allocation8 + $0x150] sm:$0xff] %v3758_v16  ;;  %v3759_v62 = vadd.f32 %v6437_v46, %v3427_v55  ;;  %v3433_v12 = vadd.f32 %v3432_v54, %v3048_v10  ;;  %v3058_v15 = vadd.f32 %v3057_v59, %v7834_v22  ;;  %v7841_v16 = vld [vmem:[#allocation135_spill] sm:$0xff]  ;;  %v7842_v22 = vld [vmem:[#allocation137_spill] sm:$0xff] }
 0x299   :  { %v3063_v63 = vpop.f32.mrf.mxu0  ;;  %v3434_v35 = vpop.f32.mrf.mxu1 }
 0x29a   :  { %3823 = vst [vmem:[#allocation8 + $0x158] sm:$0xff] %v3759_v62  ;;  %v3760_v23 = vadd.f32 %v6434_v57, %v3433_v12  ;;  %v3435_v20 = vadd.f32 %v3434_v35, %v3050_v40  ;;  %v3064_v51 = vadd.f32 %v3063_v63, %v7835_v6 }
 0x29b   :  { %v3065_v13 = vpop.f32.mrf.mxu0  ;;  %v3440_v47 = vpop.f32.mrf.mxu1 }
 0x29c   :  { %3824 = vst [vmem:[#allocation8 + $0x160] sm:$0xff] %v3760_v23  ;;  %v3761_v9 = vadd.f32 %v6437_v46, %v3435_v20  ;;  %v3441_v36 = vadd.f32 %v3440_v47, %v3056_v58  ;;  %v3066_v14 = vadd.f32 %v3065_v13, %v7836_v3 }
 0x29d   :  { %v3071_v32 = vpop.f32.mrf.mxu0  ;;  %v3442_v31 = vpop.f32.mrf.mxu1 }
 0x29e   :  { %3825 = vst [vmem:[#allocation8 + $0x168] sm:$0xff] %v3761_v9  ;;  %v3762_v5 = vadd.f32 %v6434_v57, %v3441_v36  ;;  %v3443_v29 = vadd.f32 %v3442_v31, %v3058_v15  ;;  %v3072_v50 = vadd.f32 %v3071_v32, %v7837_v52 }
 0x29f   :  { %v3073_v21 = vpop.f32.mrf.mxu0  ;;  %v3448_v26 = vpop.f32.mrf.mxu1 }
 0x2a0   :  { %3826 = vst [vmem:[#allocation8 + $0x170] sm:$0xff] %v3762_v5  ;;  %v3763_v30 = vadd.f32 %v6437_v46, %v3443_v29  ;;  %v3449_v28 = vadd.f32 %v3448_v26, %v3064_v51  ;;  %v3074_v8 = vadd.f32 %v3073_v21, %v7838_v48  ;;  %v7843_v29 = vld [vmem:[#allocation140_spill] sm:$0xff] }
 0x2a1   :  { %v3079_v33 = vpop.f32.mrf.mxu0  ;;  %v3450_v27 = vpop.f32.mrf.mxu1 }
 0x2a2   :  { %3827 = vst [vmem:[#allocation8 + $0x178] sm:$0xff] %v3763_v30  ;;  %v3764_v38 = vadd.f32 %v6434_v57, %v3449_v28  ;;  %v3451_v18 = vadd.f32 %v3450_v27, %v3066_v14  ;;  %v3080_v25 = vadd.f32 %v3079_v33, %v7839_v0  ;;  %v7844_v28 = vld [vmem:[#allocation30_spill] sm:$0xff] }
 0x2a3   :  { %v3081_v4 = vpop.f32.mrf.mxu0  ;;  %v3456_v61 = vpop.f32.mrf.mxu1 }
 0x2a4   :  { %3828 = vst [vmem:[#allocation8 + $0x180] sm:$0xff] %v3764_v38  ;;  %v3765_v1 = vadd.f32 %v6437_v46, %v3451_v18  ;;  %v3457_v34 = vadd.f32 %v3456_v61, %v3072_v50  ;;  %v3082_v43 = vadd.f32 %v3081_v4, %v7840_v7  ;;  %v7845_v50 = vld [vmem:[#allocation32_spill] sm:$0xff] }
 0x2a5   :  { %v3087_v17 = vpop.f32.mrf.mxu0  ;;  %v3458_v45 = vpop.f32.mrf.mxu1 }
 0x2a6   :  { %3829 = vst [vmem:[#allocation8 + $0x188] sm:$0xff] %v3765_v1  ;;  %v3766_v49 = vadd.f32 %v6434_v57, %v3457_v34  ;;  %v3459_v42 = vadd.f32 %v3458_v45, %v3074_v8  ;;  %v3088_v55 = vadd.f32 %v3087_v17, %v7841_v16  ;;  %v7846_v8 = vld [vmem:[#allocation18_spill] sm:$0xff] }
 0x2a7   :  { %v3089_v24 = vpop.f32.mrf.mxu0  ;;  %v3464_v60 = vpop.f32.mrf.mxu1 }
 0x2a8   :  { %3830 = vst [vmem:[#allocation8 + $0x190] sm:$0xff] %v3766_v49  ;;  %v3767_v2 = vadd.f32 %v6437_v46, %v3459_v42  ;;  %v3465_v53 = vadd.f32 %v3464_v60, %v3080_v25  ;;  %v3090_v62 = vadd.f32 %v3089_v24, %v6407_v11 }
 0x2a9   :  { %v3095_v56 = vpop.f32.mrf.mxu0  ;;  %v3466_v10 = vpop.f32.mrf.mxu1 }
 0x2aa   :  { %3831 = vst [vmem:[#allocation8 + $0x198] sm:$0xff] %v3767_v2  ;;  %v3768_v59 = vadd.f32 %v6434_v57, %v3465_v53  ;;  %v3467_v54 = vadd.f32 %v3466_v10, %v3082_v43  ;;  %v3096_v58 = vadd.f32 %v3095_v56, %v6410_v37 }
 0x2ab   :  { %v3097_v39 = vpop.f32.mrf.mxu0  ;;  %v3472_v40 = vpop.f32.mrf.mxu1 }
 0x2ac   :  { %3832 = vst [vmem:[#allocation8 + $0x1a0] sm:$0xff] %v3768_v59  ;;  %v3769_v12 = vadd.f32 %v6437_v46, %v3467_v54  ;;  %v3473_v63 = vadd.f32 %v3472_v40, %v3088_v55  ;;  %v3098_v15 = vadd.f32 %v3097_v39, %v7842_v22 }
 0x2ad   :  { %v3103_v35 = vpop.f32.mrf.mxu0  ;;  %v3474_v19 = vpop.f32.mrf.mxu1 }
 0x2ae   :  { %3833 = vst [vmem:[#allocation8 + $0x1a8] sm:$0xff] %v3769_v12  ;;  %v3770_v23 = vadd.f32 %v6434_v57, %v3473_v63  ;;  %v3475_v20 = vadd.f32 %v3474_v19, %v3090_v62  ;;  %v3104_v31 = vadd.f32 %v3103_v35, %v6416_v41 }
 0x2af   :  { %v3105_v13 = vpop.f32.mrf.mxu0  ;;  %v3480_v47 = vpop.f32.mrf.mxu1 }
 0x2b0   :  { %3834 = vst [vmem:[#allocation8 + $0x1b0] sm:$0xff] %v3770_v23  ;;  %v3771_v9 = vadd.f32 %v6437_v46, %v3475_v20  ;;  %v3481_v11 = vadd.f32 %v3480_v47, %v3096_v58  ;;  %v3106_v21 = vadd.f32 %v3105_v13, %v7843_v29 }
 0x2b1   :  { %v3111_v36 = vpop.f32.mrf.mxu0  ;;  %v3482_v32 = vpop.f32.mrf.mxu1 }
 0x2b2   :  { %3835 = vst [vmem:[#allocation8 + $0x1b8] sm:$0xff] %v3771_v9  ;;  %v3772_v6 = vadd.f32 %v6434_v57, %v3481_v11  ;;  %v3483_v37 = vadd.f32 %v3482_v32, %v3098_v15  ;;  %v3112_v33 = vadd.f32 %v3111_v36, %v7844_v28 }
 0x2b3   :  { %v3113_v51 = vpop.f32.mrf.mxu0  ;;  %v3488_v5 = vpop.f32.mrf.mxu1 }
 0x2b4   :  { %3836 = vst [vmem:[#allocation8 + $0x1c0] sm:$0xff] %v3772_v6  ;;  %v3773_v26 = vadd.f32 %v6437_v46, %v3483_v37  ;;  %v3489_v3 = vadd.f32 %v3488_v5, %v3104_v31  ;;  %v3114_v38 = vadd.f32 %v3113_v51, %v7845_v50 }
 0x2b5   :  { %v3119_v14 = vpop.f32.mrf.mxu0  ;;  %v3490_v30 = vpop.f32.mrf.mxu1 }
 0x2b6   :  { %3837 = vst [vmem:[#allocation8 + $0x1c8] sm:$0xff] %v3773_v26  ;;  %v3774_v27 = vadd.f32 %v6434_v57, %v3489_v3  ;;  %v3491_v41 = vadd.f32 %v3490_v30, %v3106_v21  ;;  %v3120_v1 = vadd.f32 %v3119_v14, %v7846_v8 }
 0x2b7   :  { %v3496_v52 = vpop.f32.mrf.mxu1  ;;  %v3121_v61 = vpop.f32.mrf.mxu0 }
 0x2b8   :  { %3838 = vst [vmem:[#allocation8 + $0x1d0] sm:$0xff] %v3774_v27  ;;  %v3775_v18 = vadd.f32 %v6437_v46, %v3491_v41  ;;  %v3497_v4 = vadd.f32 %v3496_v52, %v3112_v33  ;;  %v3122_v0 = vadd.f32 %v3121_v61, %v6432_v44 }
 0x2b9   :  { %v3498_v48 = vpop.f32.mrf.mxu1 }
 0x2ba   :  { %3839 = vst [vmem:[#allocation8 + $0x1d8] sm:$0xff] %v3775_v18  ;;  %v3776_v34 = vadd.f32 %v6434_v57, %v3497_v4  ;;  %v3499_v17 = vadd.f32 %v3498_v48, %v3114_v38 }
 0x2bb   :  { %v3504_v45 = vpop.f32.mrf.mxu1 }
 0x2bc   :  { %3840 = vst [vmem:[#allocation8 + $0x1e0] sm:$0xff] %v3776_v34  ;;  %v3777_v25 = vadd.f32 %v6437_v46, %v3499_v17  ;;  %v3505_v49 = vadd.f32 %v3504_v45, %v3120_v1 }
 0x2bd   :  { %v3506_v42 = vpop.f32.mrf.mxu1 }
 0x2be   :  { %3841 = vst [vmem:[#allocation8 + $0x1e8] sm:$0xff] %v3777_v25  ;;  %v3778_v24 = vadd.f32 %v6434_v57, %v3505_v49  ;;  %v3507_v60 = vadd.f32 %v3506_v42, %v3122_v0 }
 0x2c0   :  { %3842 = vst [vmem:[#allocation8 + $0x1f0] sm:$0xff] %v3778_v24  ;;  %v3779_v7 = vadd.f32 %v6437_v46, %v3507_v60 }
 0x2c2   :  { %3843 = vst [vmem:[#allocation8 + $0x1f8] sm:$0xff] %v3779_v7 }
 0x2c3   :  { %3918 = shalt.err (!%p3915_p0)
}
 0x2c4   :  { %3855 = dma.vmem_to_hbm [thread:$0]  %s3850_s24, 8192, %s6574_s3, [#allocation5], %s3934_s15, %s3934_s15, %s3935_s16  }
 0x2c5   :  { %3931 = dma.done.wait [#allocation5], 8192  }
 0x2c6   :  { %3932 = vsyncadd [#allocation5], 4294959104 }
 0x2c7   :  { %3859 = vsyncpa [#allocation4], 1 }
 0x2c8   :  { %3860 = vsyncpa [#allocation7], 1 }
 0x2c9   :  { %3861 = vsyncpa [#allocation5], 1 }

</bundles_post_ra>
